<compile_context>
chip_gen: v5e
topology: v5e:2x2
jax: 0.10.0
libtpu: 0.0.40
codegen_flags: <defaults>
</compile_context>

<pallas_src>
import jax
import jax.numpy as jnp
import numpy as np
from jax import lax
from jax.experimental import pallas as pl
from jax.experimental.pallas import tpu as pltpu


# ----------------------------- Pallas kernel -------------------------------

def _make_upcat_kernel(He, We, Cout, LPAD):
    """Fully fused UpCat forward for one batch element.

    Layout: channels on sublanes, flattened zero-padded spatial grid on lanes.
    Output pixel (y, x) lives at flat lane p = y*(We+2) + x; the padded input
    image pixel (Y, X) lives at lane (Y+1)*(We+2) + (X+1).  Tap values are
    obtained with circular lane rolls; wrapped lanes only ever land on masked
    (invalid) positions, which never feed valid outputs.
    """
    Wp = We + 2
    inv_hw = 1.0 / float(He * We)
    taps = [(dy, dx) for dy in range(3) for dx in range(3)]   # t = dy*3 + dx

    def lshift(v, s):
        # aligned[p] = v[(p + s) % LPAD]  (left circular shift by s; s may be < 0)
        r = (-s) % LPAD
        if r == 0:
            return v
        return pltpu.roll(v, r, axis=1)                        # XLU, free slot

    def inst_norm_lrelu(acc, m, gamma, beta):
        # Two-pass masked InstanceNorm (biased var, eps=1e-5) + affine + LeakyReLU(0.1).
        mean = jnp.sum(acc * m, axis=1, keepdims=True) * inv_hw
        d = (acc - mean) * m
        var = jnp.sum(d * d, axis=1, keepdims=True) * inv_hw
        y = (acc - mean) * lax.rsqrt(var + 1e-5) * gamma + beta
        return jnp.where(y >= 0, y, 0.1 * y)

    def kernel(x_ref, xe_ref, wd_ref, sd_ref, w0_ref, w1_ref, pv_ref, m_ref, o_ref):
        m = m_ref[...]                                         # (1, LPAD) validity mask
        x = x_ref[0, :, :]                                     # (Cin, H*W)

        # ---- deconv(k=2,s=2) + pixel-shuffle + replicate/zero pad + concat ----
        # xe_ref already holds the zero-padded encoder channels and the upsample
        # bias pre-placed in the upsample channel rows at valid interior lanes.
        # Each 2x2 sub-pixel plane is scattered onto the padded grid via a 0/1
        # scatter matmul (MXU) -> no strided/masked VMEM scatter stores.
        cat0 = xe_ref[0, :, :]                                 # (Ce+Cup, LPAD)
        for o in range(4):                                     # o = dy*2 + dx
            y_o = jnp.dot(wd_ref[o], x,
                          preferred_element_type=jnp.float32,
                          precision=lax.Precision.HIGHEST)     # (Ce+Cup, H*W), top rows 0
            cat0 = cat0 + jnp.dot(y_o, sd_ref[o],
                                  preferred_element_type=jnp.float32,
                                  precision=lax.Precision.HIGHEST)

        # ---- conv_0: 9 accumulating tap dots on lane-rolled inputs ----
        acc = jnp.zeros((Cout, LPAD), jnp.float32)
        for t, (dy, dx) in enumerate(taps):
            acc = acc + jnp.dot(w0_ref[t], lshift(cat0, dy * Wp + dx),
                                preferred_element_type=jnp.float32,
                                precision=lax.Precision.HIGHEST)
        acc = acc + pv_ref[:, 0:1]                             # conv_0 bias
        h = inst_norm_lrelu(acc, m, pv_ref[:, 1:2], pv_ref[:, 2:3])
        z = h * m                                              # zero ring / invalid lanes

        # ---- conv_1: the intermediate never leaves vregs/VMEM ----
        # z stores the image at lanes y*Wp+x; conv_1's padded grid wants it at
        # (y+1)*Wp+(x+1), so fold that -(Wp+1) offset into each tap's shift.
        acc = jnp.zeros((Cout, LPAD), jnp.float32)
        for t, (dy, dx) in enumerate(taps):
            acc = acc + jnp.dot(w1_ref[t], lshift(z, dy * Wp + dx - (Wp + 1)),
                                preferred_element_type=jnp.float32,
                                precision=lax.Precision.HIGHEST)
        acc = acc + pv_ref[:, 3:4]                             # conv_1 bias
        out = inst_norm_lrelu(acc, m, pv_ref[:, 4:5], pv_ref[:, 5:6])
        o_ref[0, :, :] = out.astype(o_ref.dtype)

    return kernel


# ------------------------------ wrapper -------------------------------------

def _upcat_forward(params, x, x_e):
    """UpCat.forward. Inputs/outputs are NCHW (PyTorch convention)."""
    # TODO(synk): x_e=None (no skip connection) path is not implemented in the fused kernel.
    N, Cin, H, W = x.shape
    Cup = params["up_w"].shape[1]
    Cout = params["w0"].shape[0]
    Ce = x_e.shape[1]
    C0 = Ce + Cup
    He, We = x_e.shape[2], x_e.shape[3]
    HW = H * W
    Wp = We + 2
    Lp = (He + 2) * Wp
    LPAD = ((Lp + 127) // 128) * 128                           # lane-dense grid length

    # Wrap-around invariants for the circular-roll tap trick (see kernel docstring):
    # conv_0 reads never wrap onto valid lanes; conv_1 negative-shift wraps land on
    # lanes that the validity mask zeroes out before the taps read them.
    assert (He + 1) * Wp + (We + 1) < Lp <= LPAD
    assert LPAD - (Wp + 1) >= He * Wp

    # ---- trace-time constants (numpy -> baked into the executable) ----
    # Scatter matrices: sub-pixel plane o of the deconv -> padded grid lanes,
    # including the bottom/right replicate padding (is_pad=True) and the zero ring.
    # TODO(synk): the dense scatter matrices do not scale to large decoder
    # resolutions; there they would be replaced by spatially tiled strided DMA.
    sd_np = np.zeros((4, HW, LPAD), np.float32)
    for py in range(1, He + 1):
        for px in range(1, We + 1):
            Y = min(py - 1, 2 * H - 1)                         # replicate bottom edge
            X = min(px - 1, 2 * W - 1)                         # replicate right edge
            o = (Y % 2) * 2 + (X % 2)
            j = (Y // 2) * W + (X // 2)
            sd_np[o, j, py * Wp + px] = 1.0
    mask_np = np.zeros((1, LPAD), np.float32)
    for p in range(Lp):
        if (p % Wp) < We and (p // Wp) < He:
            mask_np[0, p] = 1.0
    sd = jnp.asarray(sd_np)
    mask = jnp.asarray(mask_np)

    # ---- parameter repacking (tiny XLA ops) ----
    # Deconv weights embedded into the concat channel rows: (4, Ce+Cup, Cin),
    # rows < Ce are zero so the scatter lands in the upsample channels only.
    wd_perm = jnp.transpose(params["up_w"], (2, 3, 1, 0)).reshape(4, Cup, Cin)
    wd_emb = jnp.zeros((4, C0, Cin), jnp.float32).at[:, Ce:, :].set(wd_perm)
    # Conv tap weights, one (Cout, Cin_conv) slab per tap t = dy*3 + dx.
    w0p = jnp.transpose(params["w0"], (2, 3, 0, 1)).reshape(9, Cout, C0)
    w1p = jnp.transpose(params["w1"], (2, 3, 0, 1)).reshape(9, Cout, Cout)
    # Per-channel bias/gamma/beta for both conv blocks packed into one (Cout, 6).
    pv = jnp.stack([params["b0"], params["g0"], params["bt0"],
                    params["b1"], params["g1"], params["bt1"]], axis=1)

    # Encoder features on the zero-padded grid, with the ConvTranspose bias
    # pre-placed in the (otherwise zero) upsample channel rows at valid lanes.
    xe_pad = jnp.pad(x_e, ((0, 0), (0, 0), (1, 1), (1, 1)))
    ub_img = jnp.broadcast_to(params["up_b"][None, :, None, None], (N, Cup, He, We))
    ub_pad = jnp.pad(ub_img, ((0, 0), (0, 0), (1, 1), (1, 1)))
    xe_cat = jnp.concatenate([xe_pad, ub_pad], axis=1).reshape(N, C0, Lp)
    xe_cat = jnp.pad(xe_cat, ((0, 0), (0, 0), (0, LPAD - Lp)))

    x_flat = x.reshape(N, Cin, HW)                             # free reshape (trailing dims)

    flops_per_image = (2 * 4 * C0 * Cin * HW          # deconv dots
                       + 2 * 4 * C0 * HW * LPAD       # scatter dots
                       + 2 * 9 * Cout * C0 * LPAD     # conv_0 taps
                       + 2 * 9 * Cout * Cout * LPAD)  # conv_1 taps
    bytes_accessed = 4 * (x_flat.size + xe_cat.size + wd_emb.size + sd.size
                          + w0p.size + w1p.size + pv.size + mask.size
                          + N * Cout * LPAD)
    cost = pl.CostEstimate(flops=int(N * flops_per_image),
                           transcendentals=int(N * 2 * Cout),
                           bytes_accessed=int(bytes_accessed))

    out_flat = pl.pallas_call(
        _make_upcat_kernel(He, We, Cout, LPAD),
        out_shape=jax.ShapeDtypeStruct((N, Cout, LPAD), jnp.float32),
        grid_spec=pltpu.PrefetchScalarGridSpec(
            num_scalar_prefetch=0,
            grid=(N,),
            in_specs=[
                pl.BlockSpec((1, Cin, HW), lambda n: (n, 0, 0)),
                pl.BlockSpec((1, C0, LPAD), lambda n: (n, 0, 0)),
                # Invariant operands: constant index_maps -> stay VMEM-resident.
                pl.BlockSpec((4, C0, Cin), lambda n: (0, 0, 0)),
                pl.BlockSpec((4, HW, LPAD), lambda n: (0, 0, 0)),
                pl.BlockSpec((9, Cout, C0), lambda n: (0, 0, 0)),
                pl.BlockSpec((9, Cout, Cout), lambda n: (0, 0, 0)),
                pl.BlockSpec((Cout, 6), lambda n: (0, 0)),
                pl.BlockSpec((1, LPAD), lambda n: (0, 0)),
            ],
            out_specs=pl.BlockSpec((1, Cout, LPAD), lambda n: (n, 0, 0)),
        ),
        # Batch stays a parallel grid axis so v7x's two TensorCores each take an
        # image; on single-TC v5e/v6e the per-step overhead is negligible here.
        compiler_params=pltpu.CompilerParams(dimension_semantics=("parallel",)),
        cost_estimate=cost,
    )(x_flat, xe_cat, wd_emb, sd, w0p, w1p, pv, mask)

    # Valid output pixels live at lanes y*Wp + x, y < He, x < We.
    return out_flat[:, :, :Lp].reshape(N, Cout, He + 2, We + 2)[:, :, :He, :We]


upcat_forward = jax.jit(_upcat_forward)


# --------------------------- pure-JAX reference -----------------------------

def _conv_block_ref(x, w, b, g, beta):
    y = lax.conv_general_dilated(
        x, w, (1, 1), ((1, 1), (1, 1)),
        dimension_numbers=("NCHW", "OIHW", "NCHW"),
        precision=lax.Precision.HIGHEST,
    ) + b[None, :, None, None]
    mean = jnp.mean(y, axis=(2, 3), keepdims=True)
    var = jnp.var(y, axis=(2, 3), keepdims=True)
    yn = (y - mean) * lax.rsqrt(var + 1e-5) * g[None, :, None, None] + beta[None, :, None, None]
    return jnp.where(yn >= 0, yn, 0.1 * yn)


def upcat_reference(params, x, x_e):
    N, Cin, H, W = x.shape
    w = params["up_w"]
    Cup = w.shape[1]
    y = jnp.einsum("nchw,cokl->nohkwl", x, w, precision=lax.Precision.HIGHEST)
    x0 = y.reshape(N, Cup, 2 * H, 2 * W) + params["up_b"][None, :, None, None]
    ph = x_e.shape[2] - x0.shape[2]
    pw = x_e.shape[3] - x0.shape[3]
    if ph or pw:
        x0 = jnp.pad(x0, ((0, 0), (0, 0), (0, ph), (0, pw)), mode="edge")
    h = jnp.concatenate([x_e, x0], axis=1)
    h = _conv_block_ref(h, params["w0"], params["b0"], params["g0"], params["bt0"])
    h = _conv_block_ref(h, params["w1"], params["b1"], params["g1"], params["bt1"])
    return h


# --------------------------------- main -------------------------------------

if __name__ == "__main__":
    # UpCat(spatial_dims=2, in_chns=8, cat_chns=4, out_chns=8, halves=True)
    in_chns, cat_chns, out_chns = 8, 4, 8
    up_chns = in_chns // 2
    c0_in = cat_chns + up_chns

    key = jax.random.PRNGKey(0)
    ks = jax.random.split(key, 10)
    params = {
        # ConvTranspose2d(in_chns, up_chns, 2, 2): weight (Cin, Cup, 2, 2)
        "up_w": 0.2 * jax.random.normal(ks[0], (in_chns, up_chns, 2, 2), jnp.float32),
        "up_b": 0.1 * jax.random.normal(ks[1], (up_chns,), jnp.float32),
        # conv_0: Conv2d(c0_in, out_chns, 3, pad=1)
        "w0": 0.2 * jax.random.normal(ks[2], (out_chns, c0_in, 3, 3), jnp.float32),
        "b0": 0.1 * jax.random.normal(ks[3], (out_chns,), jnp.float32),
        "g0": jnp.ones((out_chns,), jnp.float32),
        "bt0": jnp.zeros((out_chns,), jnp.float32),
        # conv_1: Conv2d(out_chns, out_chns, 3, pad=1)
        "w1": 0.2 * jax.random.normal(ks[4], (out_chns, out_chns, 3, 3), jnp.float32),
        "b1": 0.1 * jax.random.normal(ks[5], (out_chns,), jnp.float32),
        "g1": jnp.ones((out_chns,), jnp.float32),
        "bt1": jnp.zeros((out_chns,), jnp.float32),
    }

    # x: features to be upsampled (NCHW); x_e: encoder features (NCHW)
    x = jax.random.normal(ks[8], (2, in_chns, 8, 8), jnp.float32)
    x_e = jax.random.normal(ks[9], (2, cat_chns, 16, 16), jnp.float32)

    out = jax.block_until_ready(upcat_forward(params, x, x_e))
    assert out.shape == (2, out_chns, 16, 16), out.shape

    ref = jax.block_until_ready(upcat_reference(params, x, x_e))
    np.testing.assert_allclose(np.asarray(out), np.asarray(ref), rtol=5e-3, atol=5e-3)

    print("KERNEL_OK")
</pallas_src>

<mosaic_0001>
module attributes {stable_mosaic.version = 11 : i64} {
  func.func @kernel(%arg0: i32, %arg1: memref<1x8x64xf32, #tpu.memory_space<vmem>>, %arg2: memref<1x8x384xf32, #tpu.memory_space<vmem>>, %arg3: memref<4x8x8xf32, #tpu.memory_space<vmem>>, %arg4: memref<4x64x384xf32, #tpu.memory_space<vmem>>, %arg5: memref<9x8x8xf32, #tpu.memory_space<vmem>>, %arg6: memref<9x8x8xf32, #tpu.memory_space<vmem>>, %arg7: memref<8x6xf32, #tpu.memory_space<vmem>>, %arg8: memref<1x384xf32, #tpu.memory_space<vmem>>, %arg9: memref<1x8x384xf32, #tpu.memory_space<vmem>>) attributes {dimension_semantics = [#tpu.dimension_semantics<parallel>], iteration_bounds = array<i64: 2>, scalar_prefetch = 0 : i64, scratch_operands = 0 : i64, tpu.core_type = #tpu.core_type<tc>, window_params = [{transform_indices = @transform_0, window_bounds = array<i64: 1, 8, 64>}, {transform_indices = @transform_1, window_bounds = array<i64: 1, 8, 384>}, {pipeline_mode = #tpu.pipeline_mode<synchronous>, transform_indices = @transform_2, window_bounds = array<i64: 4, 8, 8>}, {pipeline_mode = #tpu.pipeline_mode<synchronous>, transform_indices = @transform_3, window_bounds = array<i64: 4, 64, 384>}, {pipeline_mode = #tpu.pipeline_mode<synchronous>, transform_indices = @transform_4, window_bounds = array<i64: 9, 8, 8>}, {pipeline_mode = #tpu.pipeline_mode<synchronous>, transform_indices = @transform_5, window_bounds = array<i64: 9, 8, 8>}, {pipeline_mode = #tpu.pipeline_mode<synchronous>, transform_indices = @transform_6, window_bounds = array<i64: 8, 6>}, {pipeline_mode = #tpu.pipeline_mode<synchronous>, transform_indices = @transform_7, window_bounds = array<i64: 1, 384>}, {transform_indices = @transform_8, window_bounds = array<i64: 1, 8, 384>}]} {
    %c0 = arith.constant 0 : index
    %c0_0 = arith.constant 0 : index
    %0 = vector.load %arg8[%c0, %c0_0] : memref<1x384xf32, #tpu.memory_space<vmem>>, vector<1x384xf32>
    %c0_1 = arith.constant 0 : index
    %c0_2 = arith.constant 0 : index
    %c0_3 = arith.constant 0 : index
    %1 = vector.load %arg1[%c0_1, %c0_2, %c0_3] : memref<1x8x64xf32, #tpu.memory_space<vmem>>, vector<1x8x64xf32>
    %2 = vector.shape_cast %1 : vector<1x8x64xf32> to vector<8x64xf32>
    %c0_4 = arith.constant 0 : index
    %c0_5 = arith.constant 0 : index
    %c0_6 = arith.constant 0 : index
    %3 = vector.load %arg2[%c0_4, %c0_5, %c0_6] : memref<1x8x384xf32, #tpu.memory_space<vmem>>, vector<1x8x384xf32>
    %4 = vector.shape_cast %3 : vector<1x8x384xf32> to vector<8x384xf32>
    %c0_7 = arith.constant 0 : index
    %c0_8 = arith.constant 0 : index
    %c0_9 = arith.constant 0 : index
    %5 = vector.load %arg3[%c0_7, %c0_8, %c0_9] : memref<4x8x8xf32, #tpu.memory_space<vmem>>, vector<1x8x8xf32>
    %6 = vector.shape_cast %5 : vector<1x8x8xf32> to vector<8x8xf32>
    %cst = arith.constant dense<0.000000e+00> : vector<8x64xf32>
    %7 = tpu.matmul %6, %2, %cst {dimension_numbers = #tpu.dot_dimension_numbers<[1], [0], [0], [1], [0, 0, 1, 1], [], []>, precision = #tpu.contract_precision<fp32>} : vector<8x8xf32>, vector<8x64xf32>, vector<8x64xf32> -> vector<8x64xf32>
    %c0_10 = arith.constant 0 : index
    %c0_11 = arith.constant 0 : index
    %c0_12 = arith.constant 0 : index
    %8 = vector.load %arg4[%c0_10, %c0_11, %c0_12] : memref<4x64x384xf32, #tpu.memory_space<vmem>>, vector<1x64x384xf32>
    %9 = vector.shape_cast %8 : vector<1x64x384xf32> to vector<64x384xf32>
    %cst_13 = arith.constant dense<0.000000e+00> : vector<8x384xf32>
    %10 = tpu.matmul %7, %9, %cst_13 {dimension_numbers = #tpu.dot_dimension_numbers<[1], [0], [0], [1], [0, 0, 1, 1], [], []>, precision = #tpu.contract_precision<fp32>} : vector<8x64xf32>, vector<64x384xf32>, vector<8x384xf32> -> vector<8x384xf32>
    %11 = arith.addf %4, %10 : vector<8x384xf32>
    %c1 = arith.constant 1 : index
    %c0_14 = arith.constant 0 : index
    %c0_15 = arith.constant 0 : index
    %12 = vector.load %arg3[%c1, %c0_14, %c0_15] : memref<4x8x8xf32, #tpu.memory_space<vmem>>, vector<1x8x8xf32>
    %13 = vector.shape_cast %12 : vector<1x8x8xf32> to vector<8x8xf32>
    %cst_16 = arith.constant dense<0.000000e+00> : vector<8x64xf32>
    %14 = tpu.matmul %13, %2, %cst_16 {dimension_numbers = #tpu.dot_dimension_numbers<[1], [0], [0], [1], [0, 0, 1, 1], [], []>, precision = #tpu.contract_precision<fp32>} : vector<8x8xf32>, vector<8x64xf32>, vector<8x64xf32> -> vector<8x64xf32>
    %c1_17 = arith.constant 1 : index
    %c0_18 = arith.constant 0 : index
    %c0_19 = arith.constant 0 : index
    %15 = vector.load %arg4[%c1_17, %c0_18, %c0_19] : memref<4x64x384xf32, #tpu.memory_space<vmem>>, vector<1x64x384xf32>
    %16 = vector.shape_cast %15 : vector<1x64x384xf32> to vector<64x384xf32>
    %cst_20 = arith.constant dense<0.000000e+00> : vector<8x384xf32>
    %17 = tpu.matmul %14, %16, %cst_20 {dimension_numbers = #tpu.dot_dimension_numbers<[1], [0], [0], [1], [0, 0, 1, 1], [], []>, precision = #tpu.contract_precision<fp32>} : vector<8x64xf32>, vector<64x384xf32>, vector<8x384xf32> -> vector<8x384xf32>
    %18 = arith.addf %11, %17 : vector<8x384xf32>
    %c2 = arith.constant 2 : index
    %c0_21 = arith.constant 0 : index
    %c0_22 = arith.constant 0 : index
    %19 = vector.load %arg3[%c2, %c0_21, %c0_22] : memref<4x8x8xf32, #tpu.memory_space<vmem>>, vector<1x8x8xf32>
    %20 = vector.shape_cast %19 : vector<1x8x8xf32> to vector<8x8xf32>
    %cst_23 = arith.constant dense<0.000000e+00> : vector<8x64xf32>
    %21 = tpu.matmul %20, %2, %cst_23 {dimension_numbers = #tpu.dot_dimension_numbers<[1], [0], [0], [1], [0, 0, 1, 1], [], []>, precision = #tpu.contract_precision<fp32>} : vector<8x8xf32>, vector<8x64xf32>, vector<8x64xf32> -> vector<8x64xf32>
    %c2_24 = arith.constant 2 : index
    %c0_25 = arith.constant 0 : index
    %c0_26 = arith.constant 0 : index
    %22 = vector.load %arg4[%c2_24, %c0_25, %c0_26] : memref<4x64x384xf32, #tpu.memory_space<vmem>>, vector<1x64x384xf32>
    %23 = vector.shape_cast %22 : vector<1x64x384xf32> to vector<64x384xf32>
    %cst_27 = arith.constant dense<0.000000e+00> : vector<8x384xf32>
    %24 = tpu.matmul %21, %23, %cst_27 {dimension_numbers = #tpu.dot_dimension_numbers<[1], [0], [0], [1], [0, 0, 1, 1], [], []>, precision = #tpu.contract_precision<fp32>} : vector<8x64xf32>, vector<64x384xf32>, vector<8x384xf32> -> vector<8x384xf32>
    %25 = arith.addf %18, %24 : vector<8x384xf32>
    %c3 = arith.constant 3 : index
    %c0_28 = arith.constant 0 : index
    %c0_29 = arith.constant 0 : index
    %26 = vector.load %arg3[%c3, %c0_28, %c0_29] : memref<4x8x8xf32, #tpu.memory_space<vmem>>, vector<1x8x8xf32>
    %27 = vector.shape_cast %26 : vector<1x8x8xf32> to vector<8x8xf32>
    %cst_30 = arith.constant dense<0.000000e+00> : vector<8x64xf32>
    %28 = tpu.matmul %27, %2, %cst_30 {dimension_numbers = #tpu.dot_dimension_numbers<[1], [0], [0], [1], [0, 0, 1, 1], [], []>, precision = #tpu.contract_precision<fp32>} : vector<8x8xf32>, vector<8x64xf32>, vector<8x64xf32> -> vector<8x64xf32>
    %c3_31 = arith.constant 3 : index
    %c0_32 = arith.constant 0 : index
    %c0_33 = arith.constant 0 : index
    %29 = vector.load %arg4[%c3_31, %c0_32, %c0_33] : memref<4x64x384xf32, #tpu.memory_space<vmem>>, vector<1x64x384xf32>
    %30 = vector.shape_cast %29 : vector<1x64x384xf32> to vector<64x384xf32>
    %cst_34 = arith.constant dense<0.000000e+00> : vector<8x384xf32>
    %31 = tpu.matmul %28, %30, %cst_34 {dimension_numbers = #tpu.dot_dimension_numbers<[1], [0], [0], [1], [0, 0, 1, 1], [], []>, precision = #tpu.contract_precision<fp32>} : vector<8x64xf32>, vector<64x384xf32>, vector<8x384xf32> -> vector<8x384xf32>
    %32 = arith.addf %25, %31 : vector<8x384xf32>
    %cst_35 = arith.constant 0.000000e+00 : f32
    %33 = vector.broadcast %cst_35 : f32 to vector<8x384xf32>
    %c0_36 = arith.constant 0 : index
    %c0_37 = arith.constant 0 : index
    %c0_38 = arith.constant 0 : index
    %34 = vector.load %arg5[%c0_36, %c0_37, %c0_38] : memref<9x8x8xf32, #tpu.memory_space<vmem>>, vector<1x8x8xf32>
    %35 = vector.shape_cast %34 : vector<1x8x8xf32> to vector<8x8xf32>
    %cst_39 = arith.constant dense<0.000000e+00> : vector<8x384xf32>
    %36 = tpu.matmul %35, %32, %cst_39 {dimension_numbers = #tpu.dot_dimension_numbers<[1], [0], [0], [1], [0, 0, 1, 1], [], []>, precision = #tpu.contract_precision<fp32>} : vector<8x8xf32>, vector<8x384xf32>, vector<8x384xf32> -> vector<8x384xf32>
    %37 = arith.addf %33, %36 : vector<8x384xf32>
    %c1_40 = arith.constant 1 : index
    %c0_41 = arith.constant 0 : index
    %c0_42 = arith.constant 0 : index
    %38 = vector.load %arg5[%c1_40, %c0_41, %c0_42] : memref<9x8x8xf32, #tpu.memory_space<vmem>>, vector<1x8x8xf32>
    %39 = vector.shape_cast %38 : vector<1x8x8xf32> to vector<8x8xf32>
    %c383_i32 = arith.constant 383 : i32
    %40 = tpu.dynamic_rotate %32 by %c383_i32 dim 1 : vector<8x384xf32>, i32 -> vector<8x384xf32>
    %cst_43 = arith.constant dense<0.000000e+00> : vector<8x384xf32>
    %41 = tpu.matmul %39, %40, %cst_43 {dimension_numbers = #tpu.dot_dimension_numbers<[1], [0], [0], [1], [0, 0, 1, 1], [], []>, precision = #tpu.contract_precision<fp32>} : vector<8x8xf32>, vector<8x384xf32>, vector<8x384xf32> -> vector<8x384xf32>
    %42 = arith.addf %37, %41 : vector<8x384xf32>
    %c2_44 = arith.constant 2 : index
    %c0_45 = arith.constant 0 : index
    %c0_46 = arith.constant 0 : index
    %43 = vector.load %arg5[%c2_44, %c0_45, %c0_46] : memref<9x8x8xf32, #tpu.memory_space<vmem>>, vector<1x8x8xf32>
    %44 = vector.shape_cast %43 : vector<1x8x8xf32> to vector<8x8xf32>
    %c382_i32 = arith.constant 382 : i32
    %45 = tpu.dynamic_rotate %32 by %c382_i32 dim 1 : vector<8x384xf32>, i32 -> vector<8x384xf32>
    %cst_47 = arith.constant dense<0.000000e+00> : vector<8x384xf32>
    %46 = tpu.matmul %44, %45, %cst_47 {dimension_numbers = #tpu.dot_dimension_numbers<[1], [0], [0], [1], [0, 0, 1, 1], [], []>, precision = #tpu.contract_precision<fp32>} : vector<8x8xf32>, vector<8x384xf32>, vector<8x384xf32> -> vector<8x384xf32>
    %47 = arith.addf %42, %46 : vector<8x384xf32>
    %c3_48 = arith.constant 3 : index
    %c0_49 = arith.constant 0 : index
    %c0_50 = arith.constant 0 : index
    %48 = vector.load %arg5[%c3_48, %c0_49, %c0_50] : memref<9x8x8xf32, #tpu.memory_space<vmem>>, vector<1x8x8xf32>
    %49 = vector.shape_cast %48 : vector<1x8x8xf32> to vector<8x8xf32>
    %c366_i32 = arith.constant 366 : i32
    %50 = tpu.dynamic_rotate %32 by %c366_i32 dim 1 : vector<8x384xf32>, i32 -> vector<8x384xf32>
    %cst_51 = arith.constant dense<0.000000e+00> : vector<8x384xf32>
    %51 = tpu.matmul %49, %50, %cst_51 {dimension_numbers = #tpu.dot_dimension_numbers<[1], [0], [0], [1], [0, 0, 1, 1], [], []>, precision = #tpu.contract_precision<fp32>} : vector<8x8xf32>, vector<8x384xf32>, vector<8x384xf32> -> vector<8x384xf32>
    %52 = arith.addf %47, %51 : vector<8x384xf32>
    %c4 = arith.constant 4 : index
    %c0_52 = arith.constant 0 : index
    %c0_53 = arith.constant 0 : index
    %53 = vector.load %arg5[%c4, %c0_52, %c0_53] : memref<9x8x8xf32, #tpu.memory_space<vmem>>, vector<1x8x8xf32>
    %54 = vector.shape_cast %53 : vector<1x8x8xf32> to vector<8x8xf32>
    %c365_i32 = arith.constant 365 : i32
    %55 = tpu.dynamic_rotate %32 by %c365_i32 dim 1 : vector<8x384xf32>, i32 -> vector<8x384xf32>
    %cst_54 = arith.constant dense<0.000000e+00> : vector<8x384xf32>
    %56 = tpu.matmul %54, %55, %cst_54 {dimension_numbers = #tpu.dot_dimension_numbers<[1], [0], [0], [1], [0, 0, 1, 1], [], []>, precision = #tpu.contract_precision<fp32>} : vector<8x8xf32>, vector<8x384xf32>, vector<8x384xf32> -> vector<8x384xf32>
    %57 = arith.addf %52, %56 : vector<8x384xf32>
    %c5 = arith.constant 5 : index
    %c0_55 = arith.constant 0 : index
    %c0_56 = arith.constant 0 : index
    %58 = vector.load %arg5[%c5, %c0_55, %c0_56] : memref<9x8x8xf32, #tpu.memory_space<vmem>>, vector<1x8x8xf32>
    %59 = vector.shape_cast %58 : vector<1x8x8xf32> to vector<8x8xf32>
    %c364_i32 = arith.constant 364 : i32
    %60 = tpu.dynamic_rotate %32 by %c364_i32 dim 1 : vector<8x384xf32>, i32 -> vector<8x384xf32>
    %cst_57 = arith.constant dense<0.000000e+00> : vector<8x384xf32>
    %61 = tpu.matmul %59, %60, %cst_57 {dimension_numbers = #tpu.dot_dimension_numbers<[1], [0], [0], [1], [0, 0, 1, 1], [], []>, precision = #tpu.contract_precision<fp32>} : vector<8x8xf32>, vector<8x384xf32>, vector<8x384xf32> -> vector<8x384xf32>
    %62 = arith.addf %57, %61 : vector<8x384xf32>
    %c6 = arith.constant 6 : index
    %c0_58 = arith.constant 0 : index
    %c0_59 = arith.constant 0 : index
    %63 = vector.load %arg5[%c6, %c0_58, %c0_59] : memref<9x8x8xf32, #tpu.memory_space<vmem>>, vector<1x8x8xf32>
    %64 = vector.shape_cast %63 : vector<1x8x8xf32> to vector<8x8xf32>
    %c348_i32 = arith.constant 348 : i32
    %65 = tpu.dynamic_rotate %32 by %c348_i32 dim 1 : vector<8x384xf32>, i32 -> vector<8x384xf32>
    %cst_60 = arith.constant dense<0.000000e+00> : vector<8x384xf32>
    %66 = tpu.matmul %64, %65, %cst_60 {dimension_numbers = #tpu.dot_dimension_numbers<[1], [0], [0], [1], [0, 0, 1, 1], [], []>, precision = #tpu.contract_precision<fp32>} : vector<8x8xf32>, vector<8x384xf32>, vector<8x384xf32> -> vector<8x384xf32>
    %67 = arith.addf %62, %66 : vector<8x384xf32>
    %c7 = arith.constant 7 : index
    %c0_61 = arith.constant 0 : index
    %c0_62 = arith.constant 0 : index
    %68 = vector.load %arg5[%c7, %c0_61, %c0_62] : memref<9x8x8xf32, #tpu.memory_space<vmem>>, vector<1x8x8xf32>
    %69 = vector.shape_cast %68 : vector<1x8x8xf32> to vector<8x8xf32>
    %c347_i32 = arith.constant 347 : i32
    %70 = tpu.dynamic_rotate %32 by %c347_i32 dim 1 : vector<8x384xf32>, i32 -> vector<8x384xf32>
    %cst_63 = arith.constant dense<0.000000e+00> : vector<8x384xf32>
    %71 = tpu.matmul %69, %70, %cst_63 {dimension_numbers = #tpu.dot_dimension_numbers<[1], [0], [0], [1], [0, 0, 1, 1], [], []>, precision = #tpu.contract_precision<fp32>} : vector<8x8xf32>, vector<8x384xf32>, vector<8x384xf32> -> vector<8x384xf32>
    %72 = arith.addf %67, %71 : vector<8x384xf32>
    %c8 = arith.constant 8 : index
    %c0_64 = arith.constant 0 : index
    %c0_65 = arith.constant 0 : index
    %73 = vector.load %arg5[%c8, %c0_64, %c0_65] : memref<9x8x8xf32, #tpu.memory_space<vmem>>, vector<1x8x8xf32>
    %74 = vector.shape_cast %73 : vector<1x8x8xf32> to vector<8x8xf32>
    %c346_i32 = arith.constant 346 : i32
    %75 = tpu.dynamic_rotate %32 by %c346_i32 dim 1 : vector<8x384xf32>, i32 -> vector<8x384xf32>
    %cst_66 = arith.constant dense<0.000000e+00> : vector<8x384xf32>
    %76 = tpu.matmul %74, %75, %cst_66 {dimension_numbers = #tpu.dot_dimension_numbers<[1], [0], [0], [1], [0, 0, 1, 1], [], []>, precision = #tpu.contract_precision<fp32>} : vector<8x8xf32>, vector<8x384xf32>, vector<8x384xf32> -> vector<8x384xf32>
    %77 = arith.addf %72, %76 : vector<8x384xf32>
    %c0_67 = arith.constant 0 : index
    %c0_68 = arith.constant 0 : index
    %78 = vector.load %arg7[%c0_67, %c0_68] : memref<8x6xf32, #tpu.memory_space<vmem>>, vector<8x1xf32>
    %79 = vector.broadcast %78 : vector<8x1xf32> to vector<8x384xf32>
    %80 = arith.addf %77, %79 : vector<8x384xf32>
    %c0_69 = arith.constant 0 : index
    %c1_70 = arith.constant 1 : index
    %81 = vector.load %arg7[%c0_69, %c1_70] : memref<8x6xf32, #tpu.memory_space<vmem>>, vector<8x1xf32>
    %c0_71 = arith.constant 0 : index
    %c2_72 = arith.constant 2 : index
    %82 = vector.load %arg7[%c0_71, %c2_72] : memref<8x6xf32, #tpu.memory_space<vmem>>, vector<8x1xf32>
    %83 = vector.broadcast %0 : vector<1x384xf32> to vector<8x384xf32>
    %84 = arith.mulf %80, %83 : vector<8x384xf32>
    %cst_73 = arith.constant dense<0.000000e+00> : vector<8xf32>
    %85 = vector.multi_reduction <add>, %84, %cst_73 [1] : vector<8x384xf32> to vector<8xf32>
    %86 = vector.shape_cast %85 : vector<8xf32> to vector<8x1xf32>
    %cst_74 = arith.constant 3.906250e-03 : f32
    %87 = vector.broadcast %cst_74 : f32 to vector<8x1xf32>
    %88 = arith.mulf %86, %87 : vector<8x1xf32>
    %89 = vector.broadcast %88 : vector<8x1xf32> to vector<8x384xf32>
    %90 = arith.subf %80, %89 : vector<8x384xf32>
    %91 = vector.broadcast %0 : vector<1x384xf32> to vector<8x384xf32>
    %92 = arith.mulf %90, %91 : vector<8x384xf32>
    %93 = arith.mulf %92, %92 : vector<8x384xf32>
    %cst_75 = arith.constant dense<0.000000e+00> : vector<8xf32>
    %94 = vector.multi_reduction <add>, %93, %cst_75 [1] : vector<8x384xf32> to vector<8xf32>
    %95 = vector.shape_cast %94 : vector<8xf32> to vector<8x1xf32>
    %cst_76 = arith.constant 3.906250e-03 : f32
    %96 = vector.broadcast %cst_76 : f32 to vector<8x1xf32>
    %97 = arith.mulf %95, %96 : vector<8x1xf32>
    %98 = vector.broadcast %88 : vector<8x1xf32> to vector<8x384xf32>
    %99 = arith.subf %80, %98 : vector<8x384xf32>
    %cst_77 = arith.constant 9.99999974E-6 : f32
    %100 = vector.broadcast %cst_77 : f32 to vector<8x1xf32>
    %101 = arith.addf %97, %100 : vector<8x1xf32>
    %102 = math.rsqrt %101 : vector<8x1xf32>
    %103 = vector.broadcast %102 : vector<8x1xf32> to vector<8x384xf32>
    %104 = arith.mulf %99, %103 : vector<8x384xf32>
    %105 = vector.broadcast %81 : vector<8x1xf32> to vector<8x384xf32>
    %106 = arith.mulf %104, %105 : vector<8x384xf32>
    %107 = vector.broadcast %82 : vector<8x1xf32> to vector<8x384xf32>
    %108 = arith.addf %106, %107 : vector<8x384xf32>
    %cst_78 = arith.constant 0.000000e+00 : f32
    %109 = vector.broadcast %cst_78 : f32 to vector<8x384xf32>
    %110 = arith.cmpf oge, %108, %109 : vector<8x384xf32>
    %cst_79 = arith.constant 1.000000e-01 : f32
    %111 = vector.broadcast %cst_79 : f32 to vector<8x384xf32>
    %112 = arith.mulf %111, %108 : vector<8x384xf32>
    %113 = arith.select %110, %108, %112 : vector<8x384xi1>, vector<8x384xf32>
    %114 = vector.broadcast %0 : vector<1x384xf32> to vector<8x384xf32>
    %115 = arith.mulf %113, %114 : vector<8x384xf32>
    %cst_80 = arith.constant 0.000000e+00 : f32
    %116 = vector.broadcast %cst_80 : f32 to vector<8x384xf32>
    %c0_81 = arith.constant 0 : index
    %c0_82 = arith.constant 0 : index
    %c0_83 = arith.constant 0 : index
    %117 = vector.load %arg6[%c0_81, %c0_82, %c0_83] : memref<9x8x8xf32, #tpu.memory_space<vmem>>, vector<1x8x8xf32>
    %118 = vector.shape_cast %117 : vector<1x8x8xf32> to vector<8x8xf32>
    %c19_i32 = arith.constant 19 : i32
    %119 = tpu.dynamic_rotate %115 by %c19_i32 dim 1 : vector<8x384xf32>, i32 -> vector<8x384xf32>
    %cst_84 = arith.constant dense<0.000000e+00> : vector<8x384xf32>
    %120 = tpu.matmul %118, %119, %cst_84 {dimension_numbers = #tpu.dot_dimension_numbers<[1], [0], [0], [1], [0, 0, 1, 1], [], []>, precision = #tpu.contract_precision<fp32>} : vector<8x8xf32>, vector<8x384xf32>, vector<8x384xf32> -> vector<8x384xf32>
    %121 = arith.addf %116, %120 : vector<8x384xf32>
    %c1_85 = arith.constant 1 : index
    %c0_86 = arith.constant 0 : index
    %c0_87 = arith.constant 0 : index
    %122 = vector.load %arg6[%c1_85, %c0_86, %c0_87] : memref<9x8x8xf32, #tpu.memory_space<vmem>>, vector<1x8x8xf32>
    %123 = vector.shape_cast %122 : vector<1x8x8xf32> to vector<8x8xf32>
    %c18_i32 = arith.constant 18 : i32
    %124 = tpu.dynamic_rotate %115 by %c18_i32 dim 1 : vector<8x384xf32>, i32 -> vector<8x384xf32>
    %cst_88 = arith.constant dense<0.000000e+00> : vector<8x384xf32>
    %125 = tpu.matmul %123, %124, %cst_88 {dimension_numbers = #tpu.dot_dimension_numbers<[1], [0], [0], [1], [0, 0, 1, 1], [], []>, precision = #tpu.contract_precision<fp32>} : vector<8x8xf32>, vector<8x384xf32>, vector<8x384xf32> -> vector<8x384xf32>
    %126 = arith.addf %121, %125 : vector<8x384xf32>
    %c2_89 = arith.constant 2 : index
    %c0_90 = arith.constant 0 : index
    %c0_91 = arith.constant 0 : index
    %127 = vector.load %arg6[%c2_89, %c0_90, %c0_91] : memref<9x8x8xf32, #tpu.memory_space<vmem>>, vector<1x8x8xf32>
    %128 = vector.shape_cast %127 : vector<1x8x8xf32> to vector<8x8xf32>
    %c17_i32 = arith.constant 17 : i32
    %129 = tpu.dynamic_rotate %115 by %c17_i32 dim 1 : vector<8x384xf32>, i32 -> vector<8x384xf32>
    %cst_92 = arith.constant dense<0.000000e+00> : vector<8x384xf32>
    %130 = tpu.matmul %128, %129, %cst_92 {dimension_numbers = #tpu.dot_dimension_numbers<[1], [0], [0], [1], [0, 0, 1, 1], [], []>, precision = #tpu.contract_precision<fp32>} : vector<8x8xf32>, vector<8x384xf32>, vector<8x384xf32> -> vector<8x384xf32>
    %131 = arith.addf %126, %130 : vector<8x384xf32>
    %c3_93 = arith.constant 3 : index
    %c0_94 = arith.constant 0 : index
    %c0_95 = arith.constant 0 : index
    %132 = vector.load %arg6[%c3_93, %c0_94, %c0_95] : memref<9x8x8xf32, #tpu.memory_space<vmem>>, vector<1x8x8xf32>
    %133 = vector.shape_cast %132 : vector<1x8x8xf32> to vector<8x8xf32>
    %c1_i32 = arith.constant 1 : i32
    %134 = tpu.dynamic_rotate %115 by %c1_i32 dim 1 : vector<8x384xf32>, i32 -> vector<8x384xf32>
    %cst_96 = arith.constant dense<0.000000e+00> : vector<8x384xf32>
    %135 = tpu.matmul %133, %134, %cst_96 {dimension_numbers = #tpu.dot_dimension_numbers<[1], [0], [0], [1], [0, 0, 1, 1], [], []>, precision = #tpu.contract_precision<fp32>} : vector<8x8xf32>, vector<8x384xf32>, vector<8x384xf32> -> vector<8x384xf32>
    %136 = arith.addf %131, %135 : vector<8x384xf32>
    %c4_97 = arith.constant 4 : index
    %c0_98 = arith.constant 0 : index
    %c0_99 = arith.constant 0 : index
    %137 = vector.load %arg6[%c4_97, %c0_98, %c0_99] : memref<9x8x8xf32, #tpu.memory_space<vmem>>, vector<1x8x8xf32>
    %138 = vector.shape_cast %137 : vector<1x8x8xf32> to vector<8x8xf32>
    %cst_100 = arith.constant dense<0.000000e+00> : vector<8x384xf32>
    %139 = tpu.matmul %138, %115, %cst_100 {dimension_numbers = #tpu.dot_dimension_numbers<[1], [0], [0], [1], [0, 0, 1, 1], [], []>, precision = #tpu.contract_precision<fp32>} : vector<8x8xf32>, vector<8x384xf32>, vector<8x384xf32> -> vector<8x384xf32>
    %140 = arith.addf %136, %139 : vector<8x384xf32>
    %c5_101 = arith.constant 5 : index
    %c0_102 = arith.constant 0 : index
    %c0_103 = arith.constant 0 : index
    %141 = vector.load %arg6[%c5_101, %c0_102, %c0_103] : memref<9x8x8xf32, #tpu.memory_space<vmem>>, vector<1x8x8xf32>
    %142 = vector.shape_cast %141 : vector<1x8x8xf32> to vector<8x8xf32>
    %c383_i32_104 = arith.constant 383 : i32
    %143 = tpu.dynamic_rotate %115 by %c383_i32_104 dim 1 : vector<8x384xf32>, i32 -> vector<8x384xf32>
    %cst_105 = arith.constant dense<0.000000e+00> : vector<8x384xf32>
    %144 = tpu.matmul %142, %143, %cst_105 {dimension_numbers = #tpu.dot_dimension_numbers<[1], [0], [0], [1], [0, 0, 1, 1], [], []>, precision = #tpu.contract_precision<fp32>} : vector<8x8xf32>, vector<8x384xf32>, vector<8x384xf32> -> vector<8x384xf32>
    %145 = arith.addf %140, %144 : vector<8x384xf32>
    %c6_106 = arith.constant 6 : index
    %c0_107 = arith.constant 0 : index
    %c0_108 = arith.constant 0 : index
    %146 = vector.load %arg6[%c6_106, %c0_107, %c0_108] : memref<9x8x8xf32, #tpu.memory_space<vmem>>, vector<1x8x8xf32>
    %147 = vector.shape_cast %146 : vector<1x8x8xf32> to vector<8x8xf32>
    %c367_i32 = arith.constant 367 : i32
    %148 = tpu.dynamic_rotate %115 by %c367_i32 dim 1 : vector<8x384xf32>, i32 -> vector<8x384xf32>
    %cst_109 = arith.constant dense<0.000000e+00> : vector<8x384xf32>
    %149 = tpu.matmul %147, %148, %cst_109 {dimension_numbers = #tpu.dot_dimension_numbers<[1], [0], [0], [1], [0, 0, 1, 1], [], []>, precision = #tpu.contract_precision<fp32>} : vector<8x8xf32>, vector<8x384xf32>, vector<8x384xf32> -> vector<8x384xf32>
    %150 = arith.addf %145, %149 : vector<8x384xf32>
    %c7_110 = arith.constant 7 : index
    %c0_111 = arith.constant 0 : index
    %c0_112 = arith.constant 0 : index
    %151 = vector.load %arg6[%c7_110, %c0_111, %c0_112] : memref<9x8x8xf32, #tpu.memory_space<vmem>>, vector<1x8x8xf32>
    %152 = vector.shape_cast %151 : vector<1x8x8xf32> to vector<8x8xf32>
    %c366_i32_113 = arith.constant 366 : i32
    %153 = tpu.dynamic_rotate %115 by %c366_i32_113 dim 1 : vector<8x384xf32>, i32 -> vector<8x384xf32>
    %cst_114 = arith.constant dense<0.000000e+00> : vector<8x384xf32>
    %154 = tpu.matmul %152, %153, %cst_114 {dimension_numbers = #tpu.dot_dimension_numbers<[1], [0], [0], [1], [0, 0, 1, 1], [], []>, precision = #tpu.contract_precision<fp32>} : vector<8x8xf32>, vector<8x384xf32>, vector<8x384xf32> -> vector<8x384xf32>
    %155 = arith.addf %150, %154 : vector<8x384xf32>
    %c8_115 = arith.constant 8 : index
    %c0_116 = arith.constant 0 : index
    %c0_117 = arith.constant 0 : index
    %156 = vector.load %arg6[%c8_115, %c0_116, %c0_117] : memref<9x8x8xf32, #tpu.memory_space<vmem>>, vector<1x8x8xf32>
    %157 = vector.shape_cast %156 : vector<1x8x8xf32> to vector<8x8xf32>
    %c365_i32_118 = arith.constant 365 : i32
    %158 = tpu.dynamic_rotate %115 by %c365_i32_118 dim 1 : vector<8x384xf32>, i32 -> vector<8x384xf32>
    %cst_119 = arith.constant dense<0.000000e+00> : vector<8x384xf32>
    %159 = tpu.matmul %157, %158, %cst_119 {dimension_numbers = #tpu.dot_dimension_numbers<[1], [0], [0], [1], [0, 0, 1, 1], [], []>, precision = #tpu.contract_precision<fp32>} : vector<8x8xf32>, vector<8x384xf32>, vector<8x384xf32> -> vector<8x384xf32>
    %160 = arith.addf %155, %159 : vector<8x384xf32>
    %c0_120 = arith.constant 0 : index
    %c3_121 = arith.constant 3 : index
    %161 = vector.load %arg7[%c0_120, %c3_121] : memref<8x6xf32, #tpu.memory_space<vmem>>, vector<8x1xf32>
    %162 = vector.broadcast %161 : vector<8x1xf32> to vector<8x384xf32>
    %163 = arith.addf %160, %162 : vector<8x384xf32>
    %c0_122 = arith.constant 0 : index
    %c4_123 = arith.constant 4 : index
    %164 = vector.load %arg7[%c0_122, %c4_123] : memref<8x6xf32, #tpu.memory_space<vmem>>, vector<8x1xf32>
    %c0_124 = arith.constant 0 : index
    %c5_125 = arith.constant 5 : index
    %165 = vector.load %arg7[%c0_124, %c5_125] : memref<8x6xf32, #tpu.memory_space<vmem>>, vector<8x1xf32>
    %166 = vector.broadcast %0 : vector<1x384xf32> to vector<8x384xf32>
    %167 = arith.mulf %163, %166 : vector<8x384xf32>
    %cst_126 = arith.constant dense<0.000000e+00> : vector<8xf32>
    %168 = vector.multi_reduction <add>, %167, %cst_126 [1] : vector<8x384xf32> to vector<8xf32>
    %169 = vector.shape_cast %168 : vector<8xf32> to vector<8x1xf32>
    %cst_127 = arith.constant 3.906250e-03 : f32
    %170 = vector.broadcast %cst_127 : f32 to vector<8x1xf32>
    %171 = arith.mulf %169, %170 : vector<8x1xf32>
    %172 = vector.broadcast %171 : vector<8x1xf32> to vector<8x384xf32>
    %173 = arith.subf %163, %172 : vector<8x384xf32>
    %174 = vector.broadcast %0 : vector<1x384xf32> to vector<8x384xf32>
    %175 = arith.mulf %173, %174 : vector<8x384xf32>
    %176 = arith.mulf %175, %175 : vector<8x384xf32>
    %cst_128 = arith.constant dense<0.000000e+00> : vector<8xf32>
    %177 = vector.multi_reduction <add>, %176, %cst_128 [1] : vector<8x384xf32> to vector<8xf32>
    %178 = vector.shape_cast %177 : vector<8xf32> to vector<8x1xf32>
    %cst_129 = arith.constant 3.906250e-03 : f32
    %179 = vector.broadcast %cst_129 : f32 to vector<8x1xf32>
    %180 = arith.mulf %178, %179 : vector<8x1xf32>
    %181 = vector.broadcast %171 : vector<8x1xf32> to vector<8x384xf32>
    %182 = arith.subf %163, %181 : vector<8x384xf32>
    %cst_130 = arith.constant 9.99999974E-6 : f32
    %183 = vector.broadcast %cst_130 : f32 to vector<8x1xf32>
    %184 = arith.addf %180, %183 : vector<8x1xf32>
    %185 = math.rsqrt %184 : vector<8x1xf32>
    %186 = vector.broadcast %185 : vector<8x1xf32> to vector<8x384xf32>
    %187 = arith.mulf %182, %186 : vector<8x384xf32>
    %188 = vector.broadcast %164 : vector<8x1xf32> to vector<8x384xf32>
    %189 = arith.mulf %187, %188 : vector<8x384xf32>
    %190 = vector.broadcast %165 : vector<8x1xf32> to vector<8x384xf32>
    %191 = arith.addf %189, %190 : vector<8x384xf32>
    %cst_131 = arith.constant 0.000000e+00 : f32
    %192 = vector.broadcast %cst_131 : f32 to vector<8x384xf32>
    %193 = arith.cmpf oge, %191, %192 : vector<8x384xf32>
    %cst_132 = arith.constant 1.000000e-01 : f32
    %194 = vector.broadcast %cst_132 : f32 to vector<8x384xf32>
    %195 = arith.mulf %194, %191 : vector<8x384xf32>
    %196 = arith.select %193, %191, %195 : vector<8x384xi1>, vector<8x384xf32>
    %c0_133 = arith.constant 0 : index
    %c0_134 = arith.constant 0 : index
    %c0_135 = arith.constant 0 : index
    %197 = vector.load %arg9[%c0_133, %c0_134, %c0_135] : memref<1x8x384xf32, #tpu.memory_space<vmem>>, vector<1x8x384xf32>
    %198 = vector.shape_cast %197 : vector<1x8x384xf32> to vector<8x384xf32>
    %199 = vector.shape_cast %196 : vector<8x384xf32> to vector<1x8x384xf32>
    tpu.vector_store %arg9[%c0_133, %c0_134, %c0_135], %199 {strides = array<i32>} : memref<1x8x384xf32, #tpu.memory_space<vmem>>, vector<1x8x384xf32>,
    return
  }
  func.func @transform_0(%arg0: i32) -> (i32, i32, i32) {
    %c0_i32 = arith.constant 0 : i32
    %c0_i32_0 = arith.constant 0 : i32
    %c0_i32_1 = arith.constant 0 : i32
    return %arg0, %c0_i32, %c0_i32_0 : i32, i32, i32
  }
  func.func @transform_1(%arg0: i32) -> (i32, i32, i32) {
    %c0_i32 = arith.constant 0 : i32
    %c0_i32_0 = arith.constant 0 : i32
    %c0_i32_1 = arith.constant 0 : i32
    return %arg0, %c0_i32, %c0_i32_0 : i32, i32, i32
  }
  func.func @transform_2(%arg0: i32) -> (i32, i32, i32) {
    %c0_i32 = arith.constant 0 : i32
    %c0_i32_0 = arith.constant 0 : i32
    %c0_i32_1 = arith.constant 0 : i32
    %c0_i32_2 = arith.constant 0 : i32
    return %c0_i32, %c0_i32_0, %c0_i32_1 : i32, i32, i32
  }
  func.func @transform_3(%arg0: i32) -> (i32, i32, i32) {
    %c0_i32 = arith.constant 0 : i32
    %c0_i32_0 = arith.constant 0 : i32
    %c0_i32_1 = arith.constant 0 : i32
    %c0_i32_2 = arith.constant 0 : i32
    return %c0_i32, %c0_i32_0, %c0_i32_1 : i32, i32, i32
  }
  func.func @transform_4(%arg0: i32) -> (i32, i32, i32) {
    %c0_i32 = arith.constant 0 : i32
    %c0_i32_0 = arith.constant 0 : i32
    %c0_i32_1 = arith.constant 0 : i32
    %c0_i32_2 = arith.constant 0 : i32
    return %c0_i32, %c0_i32_0, %c0_i32_1 : i32, i32, i32
  }
  func.func @transform_5(%arg0: i32) -> (i32, i32, i32) {
    %c0_i32 = arith.constant 0 : i32
    %c0_i32_0 = arith.constant 0 : i32
    %c0_i32_1 = arith.constant 0 : i32
    %c0_i32_2 = arith.constant 0 : i32
    return %c0_i32, %c0_i32_0, %c0_i32_1 : i32, i32, i32
  }
  func.func @transform_6(%arg0: i32) -> (i32, i32) {
    %c0_i32 = arith.constant 0 : i32
    %c0_i32_0 = arith.constant 0 : i32
    %c0_i32_1 = arith.constant 0 : i32
    return %c0_i32, %c0_i32_0 : i32, i32
  }
  func.func @transform_7(%arg0: i32) -> (i32, i32) {
    %c0_i32 = arith.constant 0 : i32
    %c0_i32_0 = arith.constant 0 : i32
    %c0_i32_1 = arith.constant 0 : i32
    return %c0_i32, %c0_i32_0 : i32, i32
  }
  func.func @transform_8(%arg0: i32) -> (i32, i32, i32) {
    %c0_i32 = arith.constant 0 : i32
    %c0_i32_0 = arith.constant 0 : i32
    %c0_i32_1 = arith.constant 0 : i32
    return %arg0, %c0_i32, %c0_i32_0 : i32, i32, i32
  }
}

</mosaic_0001>

<bundles_post_ra>
// kernel: _upcat_forward.1
= control target key start
LH: loop header
LB: loop body
LE: loop exit
PB: predicated region body
PF: predicated region fallthrough
CT: control target
= control target key end

     0   :  { %s12500_s27 = smov 0   ;;  %s15973_s0 = inlined_call_operand.vmem [shape: f32[2,8,64], index: 0, kind: input, shape index: {}]   ;;  %s15974_s1 = inlined_call_operand.vmem [shape: f32[2,8,384], index: 1, kind: input, shape index: {}]   ;;  %s15975_s2 = inlined_call_operand.vmem [shape: f32[4,8,8], index: 2, kind: input, shape index: {}]   ;;  %s15976_s3 = inlined_call_operand.vmem [shape: f32[4,64,384], index: 3, kind: input, shape index: {}]   ;;  %s15977_s4 = inlined_call_operand.vmem [shape: f32[9,8,8], index: 4, kind: input, shape index: {}]   ;;  %s15978_s5 = inlined_call_operand.vmem [shape: f32[9,8,8], index: 5, kind: input, shape index: {}]   ;;  %s15979_s6 = inlined_call_operand.vmem [shape: f32[8,6], index: 6, kind: input, shape index: {}]   ;;  %s15980_s7 = inlined_call_operand.vmem [shape: f32[1,384], index: 7, kind: input, shape index: {}]   ;;  %s15981_s8 = inlined_call_operand.vmem [shape: f32[2,8,384], index: 8, kind: output, shape index: {}]  }
   0x1 LB: > { %s12287_s28 = sadd.s32 4294967295, %s12434_s27   ;;  %p12291_p0 = scmp.ge.s32.totalorder %s12434_s27, 1  ;;  %s12434_s27 = sphi %s12500_s27, %s18_s27  }
   0x2   : > { %p271_p1 = scmp.lt.s32.totalorder %s12434_s27, 3 }
   0x4   : > { %p272_p2 = pnand %p12291_p0, %p271_p1 }
   0x6   : > { %275 = sbr.rel (%p272_p2) target bundleno = 2705 (0xa91), region = 52 }
   0xb   : > { %p309_p3 = scmp.lt.s32.totalorder %s12287_s28, 1  ;;  %v328_v0 = vld [vmem:[%s15975_s2] sm:$0xff]  ;;  %vm329_vm0 = vcmask 64512   ;;  %v500_v1 = vld [vmem:[%s15976_s3 + $0xa8] sm:$0xff]  ;;  %v497_v2 = vld [vmem:[%s15976_s3 + $0x90] sm:$0xff]  ;;  %vm503_vm1 = vcmask 523264  }
   0xc   : > { %v331_v3 = vsel %vm329_vm0, %v328_v0, 0  ;;  %v12518_v4 = vand.u32 4294901760, %v500_v1  ;;  %v12520_v5 = vand.u32 4294901760, %v497_v2  ;;  %v494_v6 = vld [vmem:[%s15976_s3 + $0x78] sm:$0xff]  ;;  %v491_v7 = vld [vmem:[%s15976_s3 + $0x60] sm:$0xff]  ;;  %v488_v8 = vld [vmem:[%s15976_s3 + $0x48] sm:$0xff] }
   0xd   : > { %s16159_s28 = smov (!%p309_p3, %s12287_s28), 1  ;;  %v12533_v9 = vand.u32 4294901760, %v331_v3  ;;  %v12535_v10 = vand.u32 4294901760, %v494_v6  ;;  %v12537_v11 = vand.u32 4294901760, %v491_v7  ;;  %v12539_v12 = vand.u32 4294901760, %v488_v8  ;;  %v485_v13 = vld [vmem:[%s15976_s3 + $0x30] sm:$0xff] }
   0xe   : > { %v12545_v14 = vsub.f32 %v500_v1, %v12518_v4  ;;  %v12548_v15 = vsub.f32 %v497_v2, %v12520_v5  ;;  %v12550_v16 = vand.u32 4294901760, %v485_v13  ;;  %v482_v17 = vld [vmem:[%s15976_s3 + $0x18] sm:$0xff]  ;;  %s12292_s23 = sshll.u32 %s16159_s28, 3  ;;  %v479_v55 = vld [vmem:[%s15976_s3] sm:$0xff]  ;;  %v501_v59 = vld [vmem:[%s15976_s3 + $0xb0] sm:$0xff]  ;;  %s12388_s11 = smul.u32 24, %s16159_s28 }
   0xf   : > { %v351_v18 = vsub.f32 %v331_v3, %v12533_v9  ;;  %v12558_v19 = vsub.f32 %v494_v6, %v12535_v10  ;;  %v12561_v20 = vsub.f32 %v491_v7, %v12537_v11  ;;  %v12564_v21 = vsub.f32 %v488_v8, %v12539_v12  ;;  %s312_s26 = scalar_lea.vmem %s15973_s0, %s12292_s23  ;;  %v498_v62 = vld [vmem:[%s15976_s3 + $0x98] sm:$0xff]  ;;  %v495_v2 = vld [vmem:[%s15976_s3 + $0x80] sm:$0xff]  ;;  %v492_v8 = vld [vmem:[%s15976_s3 + $0x68] sm:$0xff]  ;;  %s12436_s15 = smov 127  }
  0x10   : > { %v550_v22 = vand.u32 4294901760, %v12545_v14  ;;  %v556_v23 = vand.u32 4294901760, %v12548_v15  ;;  %v12572_v24 = vsub.f32 %v485_v13, %v12550_v16  ;;  %v324_v25 = vld [vmem:[%s312_s26] sm:$0xff]  ;;  %v12576_v29 = vand.u32 4294901760, %v482_v17  ;;  %s14555_s14 = scalar_lea.vmem %s15974_s1, %s12388_s11  ;;  %s12437_s16 = smov 126  }
  0x11   : > { %v352_v26 = vand.u32 4294901760, %v351_v18  ;;  %v562_v27 = vand.u32 4294901760, %v12558_v19  ;;  %v568_v28 = vand.u32 4294901760, %v12561_v20  ;;  %v12578_v30 = vand.u32 4294901760, %v324_v25  ;;  %s12438_s17 = smov 110   ;;  %s12439_s18 = smov 109  }
  0x12   : > { %v551_v31 = vsub.f32 %v12545_v14, %v550_v22  ;;  %v557_v32 = vsub.f32 %v12548_v15, %v556_v23  ;;  %v574_v33 = vand.u32 4294901760, %v12564_v21  ;;  %v580_v36 = vand.u32 4294901760, %v12572_v24  ;;  %s12440_s19 = smov 108   ;;  %s12441_s20 = smov 92  }
  0x13   : > { %v353_v34 = vsub.f32 %v351_v18, %v352_v26  ;;  %v563_v35 = vsub.f32 %v12558_v19, %v562_v27  ;;  %v12592_v37 = vsub.f32 %v324_v25, %v12578_v30  ;;  %349 = vmatpush.msra.mxu0 %v12578_v30  ;;  %425 = vmatpush.msra.mxu3 %v12578_v30  ;;  %v12650_v56 = vand.u32 4294901760, %v479_v55  ;;  %s12442_s21 = smov 91   ;;  %s12443_s22 = smov 90  }
  0x14   : > { %v552_v38 = vand.u32 4294901760, %v551_v31  ;;  %v558_v39 = vand.u32 4294901760, %v557_v32  ;;  %v569_v40 = vsub.f32 %v12561_v20, %v568_v28  ;;  %429 = vmatmul.f32.vlgmr.msra.gmra.mxu3 %v352_v26  ;;  %v575_v44 = vsub.f32 %v12564_v21, %v574_v33  ;;  %s12447_s9 = smov 18   ;;  %s12448_s10 = smov 19  }
  0x15   : > { %v354_v41 = vand.u32 4294901760, %v353_v34  ;;  %402 = vmatpush.msra.mxu2 %v12592_v37  ;;  %v12601_v42 = vand.u32 4294901760, %v12592_v37  ;;  %v564_v43 = vand.u32 4294901760, %v563_v35  ;;  %v12607_v45 = vsub.f32 %v482_v17, %v12576_v29  ;;  %v489_v17 = vld [vmem:[%s15976_s3 + $0x50] sm:$0xff]  ;;  %v480_v35 = vld [vmem:[%s15976_s3 + $0x8] sm:$0xff]  ;;  %s12449_s12 = smov 17  }
  0x16   : > { %553 = vmatpush.msrb.mxu3 %v552_v38  ;;  %405 = vmatmul.f32.vlgmr.msra.gmra.mxu2 %v351_v18  ;;  %v570_v47 = vand.u32 4294901760, %v569_v40  ;;  %v581_v48 = vsub.f32 %v12572_v24, %v580_v36  ;;  %v576_v51 = vand.u32 4294901760, %v575_v44  ;;  %v591_v57 = vsub.f32 %v479_v55, %v12650_v56  ;;  %s12450_s13 = smov 1  }
  0x17   : > { %355 = vmatmul.f32.vlgmr.msra.gmra.mxu0 %v354_v41  ;;  %v377_v46 = vsub.f32 %v12592_v37, %v12601_v42  ;;  %v586_v49 = vand.u32 4294901760, %v12607_v45  ;;  %516 = vmatpush.msrb.mxu2 %v12518_v4  ;;  %v12660_v60 = vand.u32 4294901760, %v501_v59  ;;  %v12671_v0 = vand.u32 4294901760, %v498_v62 }
  0x18   : > { %451 = vmatpush.msrb.mxu0 %v12601_v42  ;;  %559 = vmatpush.msrb.mxu3 %v558_v39  ;;  %v582_v53 = vand.u32 4294901760, %v581_v48  ;;  %v592_v58 = vand.u32 4294901760, %v591_v57  ;;  %v12680_v6 = vand.u32 4294901760, %v495_v2  ;;  %v12758_v38 = vand.u32 4294901760, %v480_v35 }
  0x19   : > { %v12618_v50 = vand.u32 4294901760, %v377_v46  ;;  %v587_v52 = vsub.f32 %v12607_v45, %v586_v49  ;;  %518 = vmatpush.msrb.mxu2 %v12520_v5  ;;  %v12669_v63 = vsub.f32 %v501_v59, %v12660_v60  ;;  %v12683_v7 = vsub.f32 %v498_v62, %v12671_v0 }
  0x1a   : > { %611 = vmatpush.msra.mxu0 %v12545_v14  ;;  %565 = vmatpush.msrb.mxu3 %v564_v43  ;;  %v593_v61 = vsub.f32 %v591_v57, %v592_v58  ;;  %v12696_v14 = vand.u32 4294901760, %v492_v8  ;;  %v12770_v43 = vsub.f32 %v480_v35, %v12758_v38 }
  0x1b   : > { %379 = vmatpush.msra.mxu1 %v12618_v50  ;;  %v588_v54 = vand.u32 4294901760, %v587_v52  ;;  %520 = vmatpush.msrb.mxu2 %v12535_v10  ;;  %v787_v3 = vand.u32 4294901760, %v12669_v63  ;;  %v793_v13 = vand.u32 4294901760, %v12683_v7 }
  0x1c   : > { %614 = vmatpush.msra.mxu0 %v12548_v15  ;;  %571 = vmatpush.msrb.mxu3 %v570_v47  ;;  %v594_v1 = vand.u32 4294901760, %v593_v61  ;;  %v12699_v15 = vsub.f32 %v495_v2, %v12680_v6  ;;  %v502_v61 = vld [vmem:[%s15976_s3 + $0xb8] sm:$0xff] }
  0x1d   : > { %381 = vmatmul.f32.vlgmr.msra.gmra.mxu1 %v12533_v9  ;;  %522 = vmatpush.msrb.mxu2 %v12537_v11  ;;  %v794_v18 = vsub.f32 %v12683_v7, %v793_v13  ;;  %v12787_v2 = vand.u32 4294901760, %v502_v61 }
  0x1e   : > { %617 = vmatpush.msra.mxu0 %v12558_v19  ;;  %473 = vmatpush.msrb.mxu1 %v12578_v30  ;;  %v799_v19 = vand.u32 4294901760, %v12699_v15 }
  0x1f   : > { %577 = vmatpush.msrb.mxu3 %v576_v51  ;;  %453 = vmatmul.f32.vlgmr.msrb.gmra.mxu0 %v12533_v9 }
  0x20   : > { %648 = vmatpush.msra.mxu1 %v12518_v4  ;;  %620 = vmatpush.msra.mxu0 %v12561_v20  ;;  %v12712_v20 = vand.u32 4294901760, %v489_v17 }
  0x21   : > { %583 = vmatpush.msrb.mxu3 %v582_v53  ;;  %524 = vmatpush.msrb.mxu2 %v12539_v12 }
  0x22   : > { %650 = vmatpush.msra.mxu1 %v12520_v5  ;;  %623 = vmatpush.msra.mxu0 %v12564_v21  ;;  %v486_v21 = vld [vmem:[%s15976_s3 + $0x38] sm:$0xff]  ;;  %v12729_v26 = vsub.f32 %v489_v17, %v12712_v20 }
  0x23   : > { %589 = vmatpush.msrb.mxu3 %v588_v54  ;;  %526 = vmatpush.msrb.mxu2 %v12550_v16  ;;  %v12726_v25 = vand.u32 4294901760, %v486_v21 }
  0x24   : > { %652 = vmatpush.msra.mxu1 %v12535_v10  ;;  %626 = vmatpush.msra.mxu0 %v12572_v24  ;;  %v483_v24 = vld [vmem:[%s15976_s3 + $0x20] sm:$0xff] }
  0x25   : > { %475 = vmatmul.f32.vlgmr.msrb.gmra.mxu1 %v12533_v9  ;;  %528 = vmatpush.msrb.mxu2 %v12576_v29  ;;  %v788_v9 = vsub.f32 %v12669_v63, %v787_v3  ;;  %v12740_v31 = vand.u32 4294901760, %v483_v24  ;;  %v12743_v32 = vsub.f32 %v486_v21, %v12726_v25  ;;  %v12807_v21 = vsub.f32 %v502_v61, %v12787_v2 }
  0x26   : > { %654 = vmatpush.msra.mxu1 %v12537_v11  ;;  %629 = vmatpush.msra.mxu0 %v12607_v45  ;;  %v829_v45 = vand.u32 4294901760, %v12770_v43 }
  0x27   : > { %530 = vmatpush.msrb.mxu2 %v12650_v56  ;;  %595 = vmatpush.msrb.mxu3 %v594_v1  ;;  %v817_v34 = vand.u32 4294901760, %v12743_v32  ;;  %v12761_v39 = vsub.f32 %v483_v24, %v12740_v31 }
  0x28   : > { %656 = vmatpush.msra.mxu1 %v12539_v12  ;;  %632 = vmatpush.msra.mxu0 %v591_v57  ;;  %v830_v47 = vsub.f32 %v12770_v43, %v829_v45 }
  0x29   : > { %681 = vmatpush.msra.mxu2 %v550_v22  ;;  %724 = vmatpush.msra.mxu3 %v12518_v4  ;;  %v789_v4 = vand.u32 4294901760, %v788_v9  ;;  %v12715_v22 = vsub.f32 %v492_v8, %v12696_v14  ;;  %v818_v40 = vsub.f32 %v12743_v32, %v817_v34  ;;  %v823_v41 = vand.u32 4294901760, %v12761_v39  ;;  %v499_v8 = vld [vmem:[%s15976_s3 + $0xa0] sm:$0xff] }
  0x2a   : > { %658 = vmatpush.msra.mxu1 %v12550_v16  ;;  %753 = vmatpush.msrb.mxu0 %v12660_v60  ;;  %v831_v48 = vand.u32 4294901760, %v830_v47  ;;  %v12797_v17 = vand.u32 4294901760, %v499_v8 }
  0x2b   : > { %685 = vmatpush.msra.mxu2 %v556_v23  ;;  %726 = vmatpush.msra.mxu3 %v12520_v5  ;;  %v795_v5 = vand.u32 4294901760, %v794_v18  ;;  %v800_v23 = vsub.f32 %v12699_v15, %v799_v19  ;;  %v819_v44 = vand.u32 4294901760, %v818_v40  ;;  %v484_v40 = vld [vmem:[%s15976_s3 + $0x28] sm:$0xff] }
  0x2c   : > { %660 = vmatpush.msra.mxu1 %v12576_v29  ;;  %755 = vmatpush.msrb.mxu0 %v12671_v0 }
  0x2d   : > { %689 = vmatpush.msra.mxu2 %v562_v27  ;;  %728 = vmatpush.msra.mxu3 %v12535_v10  ;;  %v805_v27 = vand.u32 4294901760, %v12715_v22  ;;  %v801_v10 = vand.u32 4294901760, %v800_v23 }
  0x2e   : > { %662 = vmatpush.msra.mxu1 %v12650_v56  ;;  %757 = vmatpush.msrb.mxu0 %v12680_v6 }
  0x2f   : > { %693 = vmatpush.msra.mxu2 %v568_v28  ;;  %730 = vmatpush.msra.mxu3 %v12537_v11  ;;  %v811_v28 = vand.u32 4294901760, %v12729_v26 }
  0x30   : > { %759 = vmatpush.msrb.mxu0 %v12696_v14  ;;  %790 = vmatpush.msrb.mxu1 %v789_v4  ;;  %v496_v4 = vld [vmem:[%s15976_s3 + $0x88] sm:$0xff] }
  0x31   : > { %697 = vmatpush.msra.mxu2 %v574_v33  ;;  %v806_v33 = vsub.f32 %v12715_v22, %v805_v27  ;;  %732 = vmatpush.msra.mxu3 %v12539_v12  ;;  %v812_v11 = vsub.f32 %v12729_v26, %v811_v28  ;;  %v12818_v24 = vand.u32 4294901760, %v496_v4 }
  0x32   : > { %761 = vmatpush.msrb.mxu0 %v12712_v20  ;;  %796 = vmatpush.msrb.mxu1 %v795_v5  ;;  %v493_v5 = vld [vmem:[%s15976_s3 + $0x70] sm:$0xff] }
  0x33   : > { %701 = vmatpush.msra.mxu2 %v580_v36  ;;  %v807_v36 = vand.u32 4294901760, %v806_v33  ;;  %734 = vmatpush.msra.mxu3 %v12550_v16  ;;  %v813_v12 = vand.u32 4294901760, %v812_v11  ;;  %v824_v16 = vsub.f32 %v12761_v39, %v823_v41  ;;  %v1024_v11 = vand.u32 4294901760, %v12807_v21 }
  0x34   : > { %763 = vmatpush.msrb.mxu0 %v12726_v25  ;;  %802 = vmatpush.msrb.mxu1 %v801_v10  ;;  %v12824_v10 = vsub.f32 %v499_v8, %v12797_v17  ;;  %v12833_v35 = vand.u32 4294901760, %v493_v5  ;;  %v12314_v8 = vld [vmem:[%s15976_s3 + $0x150] sm:$0xff] }
  0x35   : > { %705 = vmatpush.msra.mxu2 %v586_v49  ;;  %736 = vmatpush.msra.mxu3 %v12576_v29  ;;  %v825_v46 = vand.u32 4294901760, %v824_v16  ;;  %v481_v16 = vld [vmem:[%s15976_s3 + $0x10] sm:$0xff] }
  0x36   : > { %765 = vmatpush.msrb.mxu0 %v12740_v31  ;;  %808 = vmatpush.msrb.mxu1 %v807_v36 }
  0x37   : > { %709 = vmatpush.msra.mxu2 %v592_v58  ;;  %738 = vmatpush.msra.mxu3 %v12650_v56 }
  0x38   : > { %767 = vmatpush.msrb.mxu0 %v12758_v38  ;;  %814 = vmatpush.msrb.mxu1 %v813_v12  ;;  %v1030_v12 = vand.u32 4294901760, %v12824_v10 }
  0x3a   : > { %820 = vmatpush.msrb.mxu1 %v819_v44 }
  0x3c   : > { %826 = vmatpush.msrb.mxu1 %v825_v46 }
  0x3e   : > { %832 = vmatpush.msrb.mxu1 %v831_v48 }
  0x94   : > { %v356_v29 = vpop.f32.mrf.mxu0 }
  0x97   : > { %v430_v53 = vpop.f32.mrf.mxu3 }
  0x99   : > { %v406_v51 = vpop.f32.mrf.mxu2 }
  0x9a   : > { %v382_v49 = vpop.f32.mrf.mxu1 }
  0x9b   : > { %v383_v52 = vadd.f32 %v382_v49, %v356_v29 }
  0x9c   : > { %v454_v55 = vpop.f32.mrf.mxu0 }
  0x9d   : > { %v407_v54 = vadd.f32 %v406_v51, %v383_v52  ;;  %v12295_v52 = vld [vmem:[%s15975_s2 + $0x8] sm:$0xff] }
  0x9f   : > { %v431_v57 = vadd.f32 %v430_v53, %v407_v54  ;;  %v1224_v54 = vsel %vm329_vm0, %v12295_v52, 0 }
  0xa1   : > { %v455_v58 = vadd.f32 %v454_v55, %v431_v57  ;;  %v12949_v57 = vand.u32 4294901760, %v1224_v54 }
  0xa2   : > { %v476_v59 = vpop.f32.mrf.mxu1 }
  0xa3   : > { %v477_v56 = vadd.f32 %v476_v59, %v455_v58  ;;  %v1244_v59 = vsub.f32 %v1224_v54, %v12949_v57 }
  0xa5   : > { %v505_v62 = vsel %vm503_vm1, %v477_v56, 0 }
  0xa6   : > { %v12785_v1 = vand.u32 4294901760, %v505_v62 }
  0xa8   : > { %v12793_v9 = vsub.f32 %v505_v62, %v12785_v1  ;;  %597 = vmatmul.f32.vlgmr.msrb.gmra.mxu3 %v12785_v1  ;;  %v12317_v62 = vld [vmem:[%s15976_s3 + $0x168] sm:$0xff] }
  0xa9   : > { %885 = vmatpush.msrb.mxu3 %v12660_v60 }
  0xaa   : > { %635 = vmatmul.f32.vlgmr.msra.gmra.mxu0 %v12793_v9  ;;  %v12804_v18 = vand.u32 4294901760, %v12793_v9 }
  0xab   : > { %887 = vmatpush.msrb.mxu3 %v12671_v0  ;;  %918 = vmatpush.msra.mxu0 %v787_v3  ;;  %v490_v3 = vld [vmem:[%s15976_s3 + $0x58] sm:$0xff] }
  0xac   : > { %666 = vmatmul.f32.vlgmr.msra.gmra.mxu1 %v12804_v18  ;;  %v534_v23 = vsub.f32 %v12793_v9, %v12804_v18  ;;  %v12843_v36 = vand.u32 4294901760, %v490_v3 }
  0xad   : > { %889 = vmatpush.msrb.mxu3 %v12680_v6  ;;  %922 = vmatpush.msra.mxu0 %v793_v13  ;;  %v12841_v13 = vsub.f32 %v496_v4, %v12818_v24 }
  0xae   : > { %961 = vmatpush.msra.mxu1 %v12660_v60  ;;  %v12830_v33 = vand.u32 4294901760, %v534_v23  ;;  %v487_v60 = vld [vmem:[%s15976_s3 + $0x40] sm:$0xff]  ;;  %v12871_v44 = vsub.f32 %v490_v3, %v12843_v36 }
  0xaf   : > { %891 = vmatpush.msrb.mxu3 %v12696_v14  ;;  %926 = vmatpush.msra.mxu0 %v799_v19  ;;  %v12858_v19 = vsub.f32 %v493_v5, %v12833_v35  ;;  %v12308_v5 = vld [vmem:[%s15976_s3 + $0x120] sm:$0xff] }
  0xb0   : > { %963 = vmatpush.msra.mxu1 %v12671_v0  ;;  %536 = vmatmul.f32.vlgmr.msrb.gmra.mxu2 %v12830_v33  ;;  %v1025_v0 = vsub.f32 %v12807_v21, %v1024_v11  ;;  %v1048_v48 = vand.u32 4294901760, %v12871_v44  ;;  %v13050_v3 = vand.u32 4294901760, %v12308_v5 }
  0xb1   : > { %740 = vmatmul.f32.vlgmr.msra.gmra.mxu3 %v12785_v1  ;;  %848 = vmatpush.msrb.mxu2 %v12669_v63  ;;  %v12865_v63 = vand.u32 4294901760, %v487_v60  ;;  %v1042_v47 = vand.u32 4294901760, %v12858_v19 }
  0xb2   : > { %893 = vmatpush.msrb.mxu3 %v12712_v20  ;;  %930 = vmatpush.msra.mxu0 %v805_v27  ;;  %v1036_v27 = vand.u32 4294901760, %v12841_v13  ;;  %v1026_v46 = vand.u32 4294901760, %v1025_v0  ;;  %v12302_v0 = vld [vmem:[%s15976_s3 + $0xf0] sm:$0xff] }
  0xb3   : > { %965 = vmatpush.msra.mxu1 %v12680_v6  ;;  %773 = vmatmul.f32.vlgmr.msrb.gmra.mxu0 %v12830_v33  ;;  %v1031_v6 = vsub.f32 %v12824_v10, %v1030_v12 }
  0xb4   : > { %851 = vmatpush.msrb.mxu2 %v12683_v7  ;;  %895 = vmatpush.msrb.mxu3 %v12726_v25  ;;  %v12882_v7 = vand.u32 4294901760, %v484_v40 }
  0xb5   : > { %934 = vmatpush.msra.mxu0 %v811_v28  ;;  %967 = vmatpush.msra.mxu1 %v12696_v14  ;;  %v12891_v14 = vsub.f32 %v487_v60, %v12865_v63  ;;  %v12893_v28 = vand.u32 4294901760, %v481_v16 }
  0xb6   : > { %834 = vmatmul.f32.vlgmr.msrb.gmra.mxu1 %v12785_v1  ;;  %854 = vmatpush.msrb.mxu2 %v12699_v15  ;;  %v1037_v15 = vsub.f32 %v12841_v13, %v1036_v27  ;;  %v12905_v29 = vsub.f32 %v484_v40, %v12882_v7 }
  0xb7   : > { %897 = vmatpush.msrb.mxu3 %v12740_v31  ;;  %938 = vmatpush.msra.mxu0 %v817_v34  ;;  %v1032_v34 = vand.u32 4294901760, %v1031_v6  ;;  %v12915_v49 = vsub.f32 %v481_v16, %v12893_v28  ;;  %v12299_v16 = vld [vmem:[%s15976_s3 + $0xd8] sm:$0xff] }
  0xb8   : > { %969 = vmatpush.msra.mxu1 %v12712_v20  ;;  %857 = vmatpush.msrb.mxu2 %v12715_v22  ;;  %v1043_v20 = vsub.f32 %v12858_v19, %v1042_v47  ;;  %v1054_v22 = vand.u32 4294901760, %v12891_v14  ;;  %v1060_v51 = vand.u32 4294901760, %v12905_v29 }
  0xb9   : > { %899 = vmatpush.msrb.mxu3 %v12758_v38  ;;  %942 = vmatpush.msra.mxu0 %v823_v41  ;;  %v1049_v41 = vsub.f32 %v12871_v44, %v1048_v48 }
  0xba   : > { %971 = vmatpush.msra.mxu1 %v12726_v25  ;;  %711 = vmatmul.f32.vlgmr.msra.gmra.mxu2 %v12785_v1  ;;  %v1038_v25 = vand.u32 4294901760, %v1037_v15 }
  0xbb   : > { %1027 = vmatpush.msra.mxu3 %v1026_v46  ;;  %860 = vmatpush.msrb.mxu2 %v12729_v26  ;;  %v1044_v26 = vand.u32 4294901760, %v1043_v20  ;;  %v1050_v53 = vand.u32 4294901760, %v1049_v41 }
  0xbc   : > { %903 = vmatmul.f32.vlgmr.msrb.gmra.mxu3 %v12804_v18  ;;  %946 = vmatpush.msra.mxu0 %v829_v45  ;;  %v1066_v45 = vand.u32 4294901760, %v12915_v49 }
  0xbd   : > { %973 = vmatpush.msra.mxu1 %v12740_v31  ;;  %1033 = vmatpush.msra.mxu3 %v1032_v34  ;;  %v1055_v31 = vsub.f32 %v12891_v14, %v1054_v22 }
  0xbe   : > { %1085 = vmatpush.msrb.mxu0 %v12807_v21  ;;  %863 = vmatpush.msrb.mxu2 %v12743_v32  ;;  %v1061_v32 = vsub.f32 %v12905_v29, %v1060_v51  ;;  %v1067_v55 = vsub.f32 %v12915_v49, %v1066_v45 }
  0xbf   : > { %948 = vmatmul.f32.vlgmr.msra.gmra.mxu0 %v12785_v1  ;;  %975 = vmatpush.msra.mxu1 %v12758_v38  ;;  %v1056_v38 = vand.u32 4294901760, %v1055_v31  ;;  %v12318_v31 = vld [vmem:[%s15976_s3 + $0x170] sm:$0xff] }
  0xc0   : > { %1039 = vmatpush.msra.mxu3 %v1038_v25  ;;  %1088 = vmatpush.msrb.mxu0 %v12824_v10  ;;  %v1068_v58 = vand.u32 4294901760, %v1067_v55  ;;  %v13138_v54 = vand.u32 4294901760, %v12318_v31 }
  0xc1   : > { %1122 = vmatpush.msrb.mxu1 %v12787_v2  ;;  %866 = vmatpush.msrb.mxu2 %v12761_v39  ;;  %v1062_v39 = vand.u32 4294901760, %v1061_v32 }
  0xc2   : > { %977 = vmatmul.f32.vlgmr.msra.gmra.mxu1 %v12785_v1  ;;  %1045 = vmatpush.msra.mxu3 %v1044_v26 }
  0xc3   : > { %1091 = vmatpush.msrb.mxu0 %v12841_v13  ;;  %1124 = vmatpush.msrb.mxu1 %v12797_v17 }
  0xc4   : > { %869 = vmatpush.msrb.mxu2 %v12770_v43  ;;  %1051 = vmatpush.msra.mxu3 %v1050_v53  ;;  %v1245_v43 = vand.u32 4294901760, %v1244_v59 }
  0xc5   : > { %1094 = vmatpush.msrb.mxu0 %v12858_v19  ;;  %1126 = vmatpush.msrb.mxu1 %v12818_v24 }
  0xc6   : > { %990 = vmatpush.msra.mxu2 %v12787_v2  ;;  %1057 = vmatpush.msra.mxu3 %v1056_v38  ;;  %v1246_v56 = vsub.f32 %v1244_v59, %v1245_v43 }
  0xc7   : > { %872 = vmatmul.f32.vlgmr.msrb.gmra.mxu2 %v12793_v9  ;;  %1097 = vmatpush.msrb.mxu0 %v12871_v44 }
  0xc8   : > { %992 = vmatpush.msra.mxu2 %v12797_v17  ;;  %1128 = vmatpush.msrb.mxu1 %v12833_v35  ;;  %v1247_v61 = vand.u32 4294901760, %v1246_v56 }
  0xc9   : > { %1063 = vmatpush.msra.mxu3 %v1062_v39  ;;  %1100 = vmatpush.msrb.mxu0 %v12891_v14 }
  0xca   : > { %994 = vmatpush.msra.mxu2 %v12818_v24  ;;  %1130 = vmatpush.msrb.mxu1 %v12843_v36 }
  0xcb   : > { %1069 = vmatpush.msra.mxu3 %v1068_v58  ;;  %1103 = vmatpush.msrb.mxu0 %v12905_v29  ;;  %v13154_v58 = vsub.f32 %v12318_v31, %v13138_v54 }
  0xcc   : > { %996 = vmatpush.msra.mxu2 %v12833_v35  ;;  %1132 = vmatpush.msrb.mxu1 %v12865_v63 }
  0xcd   : > { %1071 = vmatmul.f32.vlgmr.msra.gmra.mxu3 %v12785_v1  ;;  %1106 = vmatpush.msrb.mxu0 %v12915_v49 }
  0xce   : > { %998 = vmatpush.msra.mxu2 %v12843_v36  ;;  %1198 = vmatpush.msrb.mxu3 %v12787_v2  ;;  %v13015_v2 = vand.u32 4294901760, %v12317_v62 }
  0xcf   : > { %1134 = vmatpush.msrb.mxu1 %v12882_v7  ;;  %1109 = vmatmul.f32.vlgmr.msrb.gmra.mxu0 %v12793_v9 }
  0xd0   : > { %1200 = vmatpush.msrb.mxu3 %v12797_v17  ;;  %1000 = vmatpush.msra.mxu2 %v12865_v63  ;;  %v13021_v9 = vsub.f32 %v12317_v62, %v13015_v2  ;;  %v13023_v17 = vand.u32 4294901760, %v12314_v8 }
  0xd1   : > { %1136 = vmatpush.msrb.mxu1 %v12893_v28  ;;  %1242 = vmatpush.msra.mxu0 %v12578_v30 }
  0xd2   : > { %1140 = vmatmul.f32.vlgmr.msrb.gmra.mxu1 %v12804_v18  ;;  %1202 = vmatpush.msrb.mxu3 %v12818_v24  ;;  %v1443_v4 = vand.u32 4294901760, %v13021_v9  ;;  %v13032_v18 = vsub.f32 %v12314_v8, %v13023_v17 }
  0xd3   : > { %1002 = vmatpush.msra.mxu2 %v12882_v7  ;;  %1272 = vmatpush.msra.mxu1 %v12618_v50 }
  0xd4   : > { %1204 = vmatpush.msrb.mxu3 %v12833_v35  ;;  %1295 = vmatpush.msrb.mxu0 %v12592_v37  ;;  %v1444_v23 = vsub.f32 %v13021_v9, %v1443_v4  ;;  %v1449_v24 = vand.u32 4294901760, %v13032_v18 }
  0xd5   : > { %1004 = vmatpush.msra.mxu2 %v12893_v28  ;;  %1318 = vmatpush.msrb.mxu1 %v12578_v30 }
  0xd6   : > { %1010 = vmatmul.f32.vlgmr.msra.gmra.mxu2 %v12830_v33  ;;  %1206 = vmatpush.msrb.mxu3 %v12843_v36  ;;  %v12305_v33 = vld [vmem:[%s15976_s3 + $0x108] sm:$0xff]  ;;  %v1450_v35 = vsub.f32 %v13032_v18, %v1449_v24  ;;  %v13062_v36 = vsub.f32 %v12308_v5, %v13050_v3 }
  0xd7   : > { %1155 = vmatpush.msrb.mxu2 %v1024_v11  ;;  %1248 = vmatmul.f32.vlgmr.msra.gmra.mxu0 %v1247_v61  ;;  %v1445_v11 = vand.u32 4294901760, %v1444_v23  ;;  %v1680_v61 = vand.u32 4294901760, %v13154_v58 }
  0xd8   : > { %1208 = vmatpush.msrb.mxu3 %v12865_v63  ;;  %1409 = vmatpush.msra.mxu0 %v13015_v2  ;;  %v1451_v19 = vand.u32 4294901760, %v1450_v35  ;;  %v1461_v63 = vand.u32 4294901760, %v13062_v36 }
  0xd9   : > { %1159 = vmatpush.msrb.mxu2 %v1030_v12  ;;  %v13068_v12 = vand.u32 4294901760, %v12305_v33 }
  0xda   : > { %1210 = vmatpush.msrb.mxu3 %v12882_v7  ;;  %1274 = vmatmul.f32.vlgmr.msra.gmra.mxu1 %v12949_v57  ;;  %v1462_v7 = vsub.f32 %v13062_v36, %v1461_v63 }
  0xdb   : > { %1163 = vmatpush.msrb.mxu2 %v1036_v27  ;;  %1411 = vmatpush.msra.mxu0 %v13023_v17  ;;  %v13079_v27 = vand.u32 4294901760, %v12302_v0  ;;  %v13082_v44 = vsub.f32 %v12305_v33, %v13068_v12 }
  0xdc   : > { %1212 = vmatpush.msrb.mxu3 %v12893_v28  ;;  %1446 = vmatpush.msra.mxu1 %v1445_v11  ;;  %v12296_v28 = vld [vmem:[%s15976_s3 + $0xc0] sm:$0xff] }
  0xdd   : > { %1167 = vmatpush.msrb.mxu2 %v1042_v47  ;;  %1214 = vmatmul.f32.vlgmr.msrb.gmra.mxu3 %v12785_v1  ;;  %v13093_v46 = vsub.f32 %v12302_v0, %v13079_v27  ;;  %v13095_v47 = vand.u32 4294901760, %v12299_v16  ;;  %v1467_v14 = vand.u32 4294901760, %v13082_v44 }
  0xde   : > { %1366 = vmatpush.msra.mxu3 %v12578_v30  ;;  %1452 = vmatpush.msra.mxu1 %v1451_v19 }
  0xdf   : > { %1171 = vmatpush.msrb.mxu2 %v1048_v48  ;;  %1298 = vmatmul.f32.vlgmr.msrb.gmra.mxu0 %v1244_v59  ;;  %v1463_v48 = vand.u32 4294901760, %v1462_v7  ;;  %v1473_v34 = vand.u32 4294901760, %v13093_v46  ;;  %v13107_v29 = vsub.f32 %v12299_v16, %v13095_v47  ;;  %v1468_v20 = vsub.f32 %v13082_v44, %v1467_v14 }
  0xe0   : > { %1541 = vmatpush.msrb.mxu3 %v13015_v2 }
  0xe1   : > { %1175 = vmatpush.msrb.mxu2 %v1054_v22  ;;  %v13114_v22 = vand.u32 4294901760, %v12296_v28  ;;  %v1474_v49 = vsub.f32 %v13093_v46, %v1473_v34  ;;  %v1479_v25 = vand.u32 4294901760, %v13107_v29  ;;  %v1469_v41 = vand.u32 4294901760, %v1468_v20 }
  0xe2   : > { %1322 = vmatmul.f32.vlgmr.msrb.gmra.mxu1 %v1245_v43  ;;  %1543 = vmatpush.msrb.mxu3 %v13023_v17  ;;  %v12312_v43 = vld [vmem:[%s15976_s3 + $0x140] sm:$0xff] }
  0xe3   : > { %1179 = vmatpush.msrb.mxu2 %v1060_v51  ;;  %v13123_v51 = vsub.f32 %v12296_v28, %v13114_v22  ;;  %v1475_v52 = vand.u32 4294901760, %v1474_v49  ;;  %v1480_v26 = vsub.f32 %v13107_v29, %v1479_v25  ;;  %v13165_v62 = vand.u32 4294901760, %v12312_v43 }
  0xe5   : > { %1183 = vmatpush.msrb.mxu2 %v1066_v45  ;;  %1368 = vmatmul.f32.vlgmr.msra.gmra.mxu3 %v12949_v57  ;;  %v1485_v53 = vand.u32 4294901760, %v13123_v51  ;;  %v1481_v55 = vand.u32 4294901760, %v1480_v26  ;;  %v13186_v23 = vsub.f32 %v12312_v43, %v13165_v62 }
  0xe6   : > { %1185 = vmatmul.f32.vlgmr.msrb.gmra.mxu2 %v12785_v1  ;;  %v12311_v1 = vld [vmem:[%s15976_s3 + $0x138] sm:$0xff] }
  0xe7   : > { %1344 = vmatpush.msra.mxu2 %v12601_v42  ;;  %v13035_v21 = vand.u32 4294901760, %v12311_v1  ;;  %v1486_v39 = vsub.f32 %v13123_v51, %v1485_v53 }
  0xe9   : > { %1504 = vmatpush.msrb.mxu2 %v13021_v9  ;;  %v13047_v10 = vsub.f32 %v12311_v1, %v13035_v21  ;;  %1545 = vmatpush.msrb.mxu3 %v13035_v21  ;;  %v1487_v56 = vand.u32 4294901760, %v1486_v39  ;;  %v12309_v1 = vld [vmem:[%s15976_s3 + $0x128] sm:$0xff] }
  0xea   : > { %1413 = vmatpush.msra.mxu0 %v13035_v21  ;;  %v13182_v5 = vand.u32 4294901760, %v12309_v1 }
  0xeb   : > { %1507 = vmatpush.msrb.mxu2 %v13032_v18  ;;  %v1455_v13 = vand.u32 4294901760, %v13047_v10  ;;  %1547 = vmatpush.msrb.mxu3 %v13050_v3 }
  0xec   : > { %1415 = vmatpush.msra.mxu0 %v13050_v3  ;;  %v13202_v35 = vsub.f32 %v12309_v1, %v13182_v5 }
  0xed   : > { %1510 = vmatpush.msrb.mxu2 %v13047_v10  ;;  %v1456_v40 = vsub.f32 %v13047_v10, %v1455_v13  ;;  %1549 = vmatpush.msrb.mxu3 %v13068_v12 }
  0xee   : > { %1346 = vmatmul.f32.vlgmr.msra.gmra.mxu2 %v12949_v57  ;;  %1417 = vmatpush.msra.mxu0 %v13068_v12  ;;  %v12315_v57 = vld [vmem:[%s15976_s3 + $0x158] sm:$0xff]  ;;  %v1698_v16 = vand.u32 4294901760, %v13202_v35 }
  0xef   : > { %1513 = vmatpush.msrb.mxu2 %v13062_v36  ;;  %v1457_v6 = vand.u32 4294901760, %v1456_v40  ;;  %1551 = vmatpush.msrb.mxu3 %v13079_v27  ;;  %v13156_v59 = vand.u32 4294901760, %v12315_v57 }
  0xf0   : > { %1419 = vmatpush.msra.mxu0 %v13079_v27 }
  0xf1   : > { %1516 = vmatpush.msrb.mxu2 %v13082_v44  ;;  %1458 = vmatpush.msra.mxu1 %v1457_v6  ;;  %v13168_v8 = vsub.f32 %v12315_v57, %v13156_v59  ;;  %v12300_v6 = vld [vmem:[%s15976_s3 + $0xe0] sm:$0xff] }
  0xf2   : > { %1553 = vmatpush.msrb.mxu3 %v13095_v47  ;;  %1421 = vmatpush.msra.mxu0 %v13095_v47 }
  0xf3   : > { %1519 = vmatpush.msrb.mxu2 %v13093_v46  ;;  %1464 = vmatpush.msra.mxu1 %v1463_v48  ;;  %v1686_v18 = vand.u32 4294901760, %v13168_v8  ;;  %v1699_v48 = vsub.f32 %v13202_v35, %v1698_v16 }
  0xf4   : > { %1555 = vmatpush.msrb.mxu3 %v13114_v22  ;;  %1423 = vmatpush.msra.mxu0 %v13114_v22 }
  0xf5   : > { %1522 = vmatpush.msrb.mxu2 %v13107_v29  ;;  %1470 = vmatpush.msra.mxu1 %v1469_v41  ;;  %v1687_v33 = vsub.f32 %v13168_v8, %v1686_v18  ;;  %v1700_v49 = vand.u32 4294901760, %v1699_v48 }
  0xf6   : > { %1574 = vmatpush.msrb.mxu0 %v1443_v4  ;;  %v1681_v4 = vsub.f32 %v13154_v58, %v1680_v61 }
  0xf7   : > { %1525 = vmatpush.msrb.mxu2 %v13123_v51  ;;  %1476 = vmatpush.msra.mxu1 %v1475_v52  ;;  %v1688_v0 = vand.u32 4294901760, %v1687_v33 }
  0xf8   : > { %1578 = vmatpush.msrb.mxu0 %v1449_v24  ;;  %v12306_v24 = vld [vmem:[%s15976_s3 + $0x110] sm:$0xff]  ;;  %v1682_v10 = vand.u32 4294901760, %v1681_v4 }
  0xf9   : > { %1646 = vmatpush.msra.mxu2 %v13138_v54  ;;  %1482 = vmatpush.msra.mxu1 %v1481_v55  ;;  %v13197_v11 = vand.u32 4294901760, %v12306_v24 }
  0xfa   : > { %1582 = vmatpush.msrb.mxu0 %v1455_v13  ;;  %v12303_v13 = vld [vmem:[%s15976_s3 + $0xf8] sm:$0xff]  ;;  %1683 = vmatpush.msra.mxu3 %v1682_v10 }
  0xfb   : > { %1648 = vmatpush.msra.mxu2 %v13156_v59  ;;  %1488 = vmatpush.msra.mxu1 %v1487_v56  ;;  %v13212_v19 = vand.u32 4294901760, %v12303_v13 }
  0xfc   : > { %1586 = vmatpush.msrb.mxu0 %v1461_v63  ;;  %1689 = vmatpush.msra.mxu3 %v1688_v0 }
  0xfd   : > { %1650 = vmatpush.msra.mxu2 %v13165_v62  ;;  %1617 = vmatpush.msrb.mxu1 %v13015_v2  ;;  %v1692_v2 = vand.u32 4294901760, %v13186_v23 }
  0xfe   : > { %1590 = vmatpush.msrb.mxu0 %v1467_v14  ;;  %v13233_v14 = vand.u32 4294901760, %v12300_v6 }
  0xff   : > { %1652 = vmatpush.msra.mxu2 %v13182_v5  ;;  %1619 = vmatpush.msrb.mxu1 %v13023_v17  ;;  %v13215_v17 = vsub.f32 %v12306_v24, %v13197_v11  ;;  %v1693_v44 = vsub.f32 %v13186_v23, %v1692_v2 }
 0x100   : > { %1594 = vmatpush.msrb.mxu0 %v1473_v34 }
 0x101   : > { %1654 = vmatpush.msra.mxu2 %v13197_v11  ;;  %1621 = vmatpush.msrb.mxu1 %v13035_v21  ;;  %v1704_v7 = vand.u32 4294901760, %v13215_v17  ;;  %v13236_v21 = vsub.f32 %v12303_v13, %v13212_v19  ;;  %v1694_v28 = vand.u32 4294901760, %v1693_v44 }
 0x102   : > { %1598 = vmatpush.msrb.mxu0 %v1479_v25  ;;  %v13258_v25 = vsub.f32 %v12300_v6, %v13233_v14 }
 0x103   : > { %1656 = vmatpush.msra.mxu2 %v13212_v19  ;;  %1623 = vmatpush.msrb.mxu1 %v13050_v3  ;;  %v1705_v46 = vsub.f32 %v13215_v17, %v1704_v7  ;;  %v1710_v34 = vand.u32 4294901760, %v13236_v21  ;;  %v12297_v3 = vld [vmem:[%s15976_s3 + $0xc8] sm:$0xff] }
 0x104   : > { %1695 = vmatpush.msra.mxu3 %v1694_v28  ;;  %v13255_v29 = vand.u32 4294901760, %v12297_v3  ;;  %1602 = vmatpush.msrb.mxu0 %v1485_v53 }
 0x105   : > { %1658 = vmatpush.msra.mxu2 %v13233_v14  ;;  %1625 = vmatpush.msrb.mxu1 %v13068_v12  ;;  %v1706_v41 = vand.u32 4294901760, %v1705_v46  ;;  %v1711_v52 = vsub.f32 %v13236_v21, %v1710_v34  ;;  %v1716_v12 = vand.u32 4294901760, %v13258_v25 }
 0x106   : > { %1701 = vmatpush.msra.mxu3 %v1700_v49  ;;  %v13268_v26 = vsub.f32 %v12297_v3, %v13255_v29 }
 0x107   : > { %1627 = vmatpush.msrb.mxu1 %v13079_v27  ;;  %v1712_v55 = vand.u32 4294901760, %v1711_v52  ;;  %1660 = vmatpush.msra.mxu2 %v13255_v29  ;;  %v1717_v51 = vsub.f32 %v13258_v25, %v1716_v12 }
 0x108   : > { %1707 = vmatpush.msra.mxu3 %v1706_v41  ;;  %v1722_v27 = vand.u32 4294901760, %v13268_v26  ;;  %v12319_v41 = vld [vmem:[%s15976_s3 + $0x178] sm:$0xff] }
 0x109   : > { %1629 = vmatpush.msrb.mxu1 %v13095_v47  ;;  %v1718_v39 = vand.u32 4294901760, %v1717_v51  ;;  %v13302_v51 = vand.u32 4294901760, %v12319_v41 }
 0x10a   : > { %1713 = vmatpush.msra.mxu3 %v1712_v55  ;;  %v1723_v43 = vsub.f32 %v13268_v26, %v1722_v27 }
 0x10b   : > { %1631 = vmatpush.msrb.mxu1 %v13114_v22 }
 0x10c   : > { %1719 = vmatpush.msra.mxu3 %v1718_v39  ;;  %v1724_v56 = vand.u32 4294901760, %v1723_v43  ;;  %v12316_v39 = vld [vmem:[%s15976_s3 + $0x160] sm:$0xff] }
 0x10e   : > { %1725 = vmatpush.msra.mxu3 %v1724_v56  ;;  %v13312_v56 = vand.u32 4294901760, %v12316_v39 }
 0x127   : > { %v13066_v60 = vpop.f32.mrf.mxu0 }
 0x129   : > { %v13103_v15 = vpop.f32.mrf.mxu1 }
 0x12b   : > { %v13140_v32 = vpop.f32.mrf.mxu3 }
 0x130   : > { %v13134_v45 = vpop.f32.mrf.mxu0 }
 0x133   : > { %v13142_v38 = vpop.f32.mrf.mxu2  ;;  %v13170_v9 = vpop.f32.mrf.mxu1 }
 0x134   : > { %v13217_v40 = vpop.f32.mrf.mxu3 }
 0x13c   : > { %v13209_v36 = vpop.f32.mrf.mxu0 }
 0x13d   : > { %16004 = vst [vmem:[#allocation2_spill] sm:$0xff] %v13209_v36  ;;  %v13219_v63 = vpop.f32.mrf.mxu2  ;;  %v12351_v36 = vld [vmem:[%s15976_s3 + $0x268] sm:$0xff] }
 0x13f   : > { %v13252_v20 = vpop.f32.mrf.mxu1  ;;  %v13278_v53 = vpop.f32.mrf.mxu3 }
 0x140   : > { %16005 = vst [vmem:[#allocation3_spill] sm:$0xff] %v13252_v20 }
 0x14a   : > { %v13280_v57 = vpop.f32.mrf.mxu2 }
 0x14c   : > { %v13270_v31 = vpop.f32.mrf.mxu0 }
 0x14d   : > { %16006 = vst [vmem:[#allocation4_spill] sm:$0xff] %v13270_v31 }
 0x14f   : > { %v13286_v47 = vpop.f32.mrf.mxu1 }
 0x150   : > { %16007 = vst [vmem:[#allocation5_spill] sm:$0xff] %v13286_v47  ;;  %v13288_v4 = vpop.f32.mrf.mxu3 }
 0x151   : > { %16008 = vst [vmem:[#allocation6_spill] sm:$0xff] %v13288_v4  ;;  %v12326_v4 = vld [vmem:[%s15976_s3 + $0x1a8] sm:$0xff] }
 0x154   : > { %v1249_v1 = vpop.f32.mrf.mxu0 }
 0x157   : > { %v1275_v10 = vpop.f32.mrf.mxu1 }
 0x158   : > { %v1276_v33 = vadd.f32 %v1275_v10, %v1249_v1  ;;  %v12313_v1 = vld [vmem:[%s15976_s3 + $0x148] sm:$0xff] }
 0x159   : > { %v13290_v24 = vpop.f32.mrf.mxu2 }
 0x15a   : > { %16009 = vst [vmem:[#allocation7_spill] sm:$0xff] %v13290_v24  ;;  %v13912_v24 = vand.u32 4294901760, %v12326_v4 }
 0x15c   : > { %v1299_v13 = vpop.f32.mrf.mxu0 }
 0x15d   : > { %v1300_v44 = vadd.f32 %v1299_v13, %v1276_v33  ;;  %v13322_v33 = vsub.f32 %v12319_v41, %v13302_v51  ;;  %v12310_v13 = vld [vmem:[%s15976_s3 + $0x130] sm:$0xff] }
 0x15f   : > { %v1323_v6 = vpop.f32.mrf.mxu1 }
 0x160   : > { %v13292_v22 = vpop.f32.mrf.mxu3  ;;  %v1324_v28 = vadd.f32 %v1323_v6, %v1300_v44  ;;  %v13333_v6 = vand.u32 4294901760, %v12313_v1 }
 0x161   : > { %16010 = vst [vmem:[#allocation8_spill] sm:$0xff] %v13292_v22 }
 0x168   : > { %v1369_v46 = vpop.f32.mrf.mxu3 }
 0x169   : > { %v13294_v0 = vpop.f32.mrf.mxu2 }
 0x16a   : > { %16011 = vst [vmem:[#allocation9_spill] sm:$0xff] %v13294_v0 }
 0x171   : > { %v1347_v48 = vpop.f32.mrf.mxu2 }
 0x172   : > { %v1348_v3 = vadd.f32 %v1347_v48, %v1324_v28  ;;  %v13339_v28 = vsub.f32 %v12316_v39, %v13312_v56 }
 0x174   : > { %v1370_v49 = vadd.f32 %v1369_v46, %v1348_v3  ;;  %v1917_v46 = vand.u32 4294901760, %v13322_v33  ;;  %v13348_v3 = vand.u32 4294901760, %v12310_v13  ;;  %v1923_v41 = vand.u32 4294901760, %v13339_v28 }
 0x176   : > { %v1398_v52 = vsel %vm503_vm1, %v1370_v49, 0 }
 0x177   : > { %v13300_v55 = vand.u32 4294901760, %v1398_v52 }
 0x179   : > { %v13308_v43 = vsub.f32 %v1398_v52, %v13300_v55  ;;  %1490 = vmatmul.f32.vlgmr.msra.gmra.mxu1 %v13300_v55  ;;  %v12301_v52 = vld [vmem:[%s15976_s3 + $0xe8] sm:$0xff] }
 0x17a   : > { %1778 = vmatpush.msra.mxu1 %v13138_v54 }
 0x17b   : > { %1528 = vmatmul.f32.vlgmr.msrb.gmra.mxu2 %v13308_v43  ;;  %v13319_v10 = vand.u32 4294901760, %v13308_v43 }
 0x17c   : > { %1780 = vmatpush.msra.mxu1 %v13156_v59  ;;  %1811 = vmatpush.msrb.mxu2 %v1680_v61  ;;  %v12307_v61 = vld [vmem:[%s15976_s3 + $0x118] sm:$0xff] }
 0x17d   : > { %1559 = vmatmul.f32.vlgmr.msrb.gmra.mxu3 %v13319_v10  ;;  %v1427_v44 = vsub.f32 %v13308_v43, %v13319_v10  ;;  %v13358_v49 = vand.u32 4294901760, %v12307_v61 }
 0x17e   : > { %1782 = vmatpush.msra.mxu1 %v13165_v62  ;;  %1815 = vmatpush.msrb.mxu2 %v1686_v18  ;;  %v13356_v18 = vsub.f32 %v12313_v1, %v13333_v6  ;;  %v12298_v1 = vld [vmem:[%s15976_s3 + $0xd0] sm:$0xff] }
 0x17f   : > { %1854 = vmatpush.msrb.mxu3 %v13138_v54  ;;  %v13345_v48 = vand.u32 4294901760, %v1427_v44  ;;  %v12304_v54 = vld [vmem:[%s15976_s3 + $0x100] sm:$0xff]  ;;  %v13386_v39 = vsub.f32 %v12307_v61, %v13358_v49 }
 0x180   : > { %1784 = vmatpush.msra.mxu1 %v13182_v5  ;;  %1819 = vmatpush.msrb.mxu2 %v1692_v2  ;;  %v13373_v2 = vsub.f32 %v12310_v13, %v13348_v3 }
 0x181   : > { %1856 = vmatpush.msrb.mxu3 %v13156_v59  ;;  %1429 = vmatmul.f32.vlgmr.msra.gmra.mxu0 %v13345_v48  ;;  %v1918_v59 = vsub.f32 %v13322_v33, %v1917_v46  ;;  %v1941_v61 = vand.u32 4294901760, %v13386_v39 }
 0x182   : > { %1633 = vmatmul.f32.vlgmr.msrb.gmra.mxu1 %v13300_v55  ;;  %1741 = vmatpush.msra.mxu0 %v13154_v58  ;;  %v13380_v58 = vand.u32 4294901760, %v12304_v54  ;;  %v1935_v44 = vand.u32 4294901760, %v13373_v2 }
 0x183   : > { %1786 = vmatpush.msra.mxu1 %v13197_v11  ;;  %1823 = vmatpush.msrb.mxu2 %v1698_v16  ;;  %v1929_v16 = vand.u32 4294901760, %v13356_v18  ;;  %v1919_v13 = vand.u32 4294901760, %v1918_v59 }
 0x184   : > { %1858 = vmatpush.msrb.mxu3 %v13165_v62  ;;  %1666 = vmatmul.f32.vlgmr.msra.gmra.mxu2 %v13345_v48  ;;  %v1924_v62 = vsub.f32 %v13339_v28, %v1923_v41 }
 0x185   : > { %1744 = vmatpush.msra.mxu0 %v13168_v8  ;;  %1788 = vmatpush.msra.mxu1 %v13212_v19  ;;  %v13397_v8 = vand.u32 4294901760, %v12301_v52 }
 0x186   : > { %1827 = vmatpush.msrb.mxu2 %v1704_v7  ;;  %1860 = vmatpush.msrb.mxu3 %v13182_v5  ;;  %v13406_v5 = vsub.f32 %v12304_v54, %v13380_v58  ;;  %v13408_v7 = vand.u32 4294901760, %v12298_v1 }
 0x187   : > { %1727 = vmatmul.f32.vlgmr.msra.gmra.mxu3 %v13300_v55  ;;  %1747 = vmatpush.msra.mxu0 %v13186_v23  ;;  %v1930_v23 = vsub.f32 %v13356_v18, %v1929_v16  ;;  %v13420_v54 = vsub.f32 %v12301_v52, %v13397_v8 }
 0x188   : > { %1790 = vmatpush.msra.mxu1 %v13233_v14  ;;  %1831 = vmatpush.msrb.mxu2 %v1710_v34  ;;  %v1925_v34 = vand.u32 4294901760, %v1924_v62  ;;  %v13430_v59 = vsub.f32 %v12298_v1, %v13408_v7  ;;  %v12320_v1 = vld [vmem:[%s15975_s2 + $0x10] sm:$0xff] }
 0x189   : > { %1862 = vmatpush.msrb.mxu3 %v13197_v11  ;;  %1750 = vmatpush.msra.mxu0 %v13202_v35  ;;  %v1936_v11 = vsub.f32 %v13373_v2, %v1935_v44  ;;  %v1947_v35 = vand.u32 4294901760, %v13406_v5  ;;  %v1953_v52 = vand.u32 4294901760, %v13420_v54 }
 0x18a   : > { %1792 = vmatpush.msra.mxu1 %v13255_v29  ;;  %1835 = vmatpush.msrb.mxu2 %v1716_v12  ;;  %v1942_v12 = vsub.f32 %v13386_v39, %v1941_v61 }
 0x18b   : > { %1864 = vmatpush.msrb.mxu3 %v13212_v19  ;;  %1604 = vmatmul.f32.vlgmr.msrb.gmra.mxu0 %v13300_v55  ;;  %v1931_v19 = vand.u32 4294901760, %v1930_v23 }
 0x18c   : > { %1920 = vmatpush.msrb.mxu1 %v1919_v13  ;;  %1753 = vmatpush.msra.mxu0 %v13215_v17  ;;  %v1937_v17 = vand.u32 4294901760, %v1936_v11  ;;  %v1943_v62 = vand.u32 4294901760, %v1942_v12  ;;  %v2117_v13 = vsel %vm329_vm0, %v12320_v1, 0 }
 0x18d   : > { %1796 = vmatmul.f32.vlgmr.msra.gmra.mxu1 %v13319_v10  ;;  %1839 = vmatpush.msrb.mxu2 %v1722_v27  ;;  %v1959_v27 = vand.u32 4294901760, %v13430_v59 }
 0x18e   : > { %1866 = vmatpush.msrb.mxu3 %v13233_v14  ;;  %1926 = vmatpush.msrb.mxu1 %v1925_v34  ;;  %v1948_v14 = vsub.f32 %v13406_v5, %v1947_v35  ;;  %v13464_v34 = vand.u32 4294901760, %v2117_v13 }
 0x18f   : > { %1978 = vmatpush.msra.mxu2 %v13322_v33  ;;  %1756 = vmatpush.msra.mxu0 %v13236_v21  ;;  %v1954_v21 = vsub.f32 %v13420_v54, %v1953_v52  ;;  %v1960_v23 = vsub.f32 %v13430_v59, %v1959_v27 }
 0x190   : > { %1841 = vmatmul.f32.vlgmr.msrb.gmra.mxu2 %v13300_v55  ;;  %1868 = vmatpush.msrb.mxu3 %v13255_v29  ;;  %v1949_v29 = vand.u32 4294901760, %v1948_v14 }
 0x191   : > { %1932 = vmatpush.msrb.mxu1 %v1931_v19  ;;  %1981 = vmatpush.msra.mxu2 %v13339_v28  ;;  %v1961_v11 = vand.u32 4294901760, %v1960_v23  ;;  %v2137_v19 = vsub.f32 %v2117_v13, %v13464_v34 }
 0x192   : > { %2015 = vmatpush.msra.mxu3 %v13302_v51  ;;  %1759 = vmatpush.msra.mxu0 %v13258_v25  ;;  %v1955_v25 = vand.u32 4294901760, %v1954_v21 }
 0x193   : > { %1870 = vmatmul.f32.vlgmr.msrb.gmra.mxu3 %v13300_v55  ;;  %1938 = vmatpush.msrb.mxu1 %v1937_v17  ;;  %v12324_v17 = vld [vmem:[%s15976_s3 + $0x198] sm:$0xff] }
 0x194   : > { %1984 = vmatpush.msra.mxu2 %v13356_v18  ;;  %2017 = vmatpush.msra.mxu3 %v13312_v56  ;;  %v13610_v13 = vand.u32 4294901760, %v12324_v17 }
 0x195   : > { %1762 = vmatpush.msra.mxu0 %v13268_v26  ;;  %1944 = vmatpush.msrb.mxu1 %v1943_v62  ;;  %v2138_v26 = vand.u32 4294901760, %v2137_v19 }
 0x196   : > { %1987 = vmatpush.msra.mxu2 %v13373_v2  ;;  %2019 = vmatpush.msra.mxu3 %v13333_v6 }
 0x197   : > { %1883 = vmatpush.msrb.mxu0 %v13302_v51  ;;  %1950 = vmatpush.msrb.mxu1 %v1949_v29  ;;  %v2139_v12 = vsub.f32 %v2137_v19, %v2138_v26  ;;  %v12321_v29 = vld [vmem:[%s15976_s3 + $0x180] sm:$0xff] }
 0x198   : > { %1765 = vmatmul.f32.vlgmr.msra.gmra.mxu0 %v13308_v43  ;;  %1990 = vmatpush.msra.mxu2 %v13386_v39 }
 0x199   : > { %1885 = vmatpush.msrb.mxu0 %v13312_v56  ;;  %2021 = vmatpush.msra.mxu3 %v13348_v3 }
 0x19a   : > { %1956 = vmatpush.msrb.mxu1 %v1955_v25  ;;  %1993 = vmatpush.msra.mxu2 %v13406_v5 }
 0x19b   : > { %1887 = vmatpush.msrb.mxu0 %v13333_v6  ;;  %2023 = vmatpush.msra.mxu3 %v13358_v49 }
 0x19c   : > { %1962 = vmatpush.msrb.mxu1 %v1961_v11  ;;  %1996 = vmatpush.msra.mxu2 %v13420_v54  ;;  %v13622_v11 = vsub.f32 %v12324_v17, %v13610_v13 }
 0x19d   : > { %1889 = vmatpush.msrb.mxu0 %v13348_v3  ;;  %2025 = vmatpush.msra.mxu3 %v13380_v58 }
 0x19e   : > { %1964 = vmatmul.f32.vlgmr.msrb.gmra.mxu1 %v13300_v55  ;;  %1999 = vmatpush.msra.mxu2 %v13430_v59 }
 0x19f   : > { %1891 = vmatpush.msrb.mxu0 %v13358_v49  ;;  %2091 = vmatpush.msra.mxu1 %v13302_v51  ;;  %v2140_v51 = vand.u32 4294901760, %v2139_v12 }
 0x1a0   : > { %2027 = vmatpush.msra.mxu3 %v13397_v8  ;;  %2002 = vmatmul.f32.vlgmr.msra.gmra.mxu2 %v13308_v43  ;;  %v12342_v43 = vld [vmem:[%s15976_s3 + $0x228] sm:$0xff] }
 0x1a1   : > { %2093 = vmatpush.msra.mxu1 %v13312_v56  ;;  %1893 = vmatpush.msrb.mxu0 %v13380_v58  ;;  %v13530_v56 = vand.u32 4294901760, %v12342_v43 }
 0x1a2   : > { %2029 = vmatpush.msra.mxu3 %v13408_v7  ;;  %2135 = vmatpush.msrb.mxu2 %v12578_v30 }
 0x1a3   : > { %2033 = vmatmul.f32.vlgmr.msra.gmra.mxu3 %v13319_v10  ;;  %2095 = vmatpush.msra.mxu1 %v13333_v6  ;;  %v12339_v10 = vld [vmem:[%s15976_s3 + $0x210] sm:$0xff]  ;;  %v13536_v33 = vsub.f32 %v12342_v43, %v13530_v56 }
 0x1a4   : > { %1895 = vmatpush.msrb.mxu0 %v13397_v8  ;;  %2165 = vmatpush.msrb.mxu3 %v12618_v50  ;;  %v13538_v6 = vand.u32 4294901760, %v12339_v10 }
 0x1a5   : > { %2097 = vmatpush.msra.mxu1 %v13348_v3  ;;  %2188 = vmatpush.msra.mxu2 %v12592_v37  ;;  %v2336_v28 = vand.u32 4294901760, %v13536_v33  ;;  %v12333_v3 = vld [vmem:[%s15976_s3 + $0x1e0] sm:$0xff] }
 0x1a6   : > { %1897 = vmatpush.msrb.mxu0 %v13408_v7  ;;  %2211 = vmatpush.msra.mxu3 %v12578_v30  ;;  %v13565_v2 = vand.u32 4294901760, %v12333_v3 }
 0x1a7   : > { %1903 = vmatmul.f32.vlgmr.msrb.gmra.mxu0 %v13345_v48  ;;  %2099 = vmatpush.msra.mxu1 %v13358_v49  ;;  %v13547_v48 = vsub.f32 %v12339_v10, %v13538_v6  ;;  %v2337_v18 = vsub.f32 %v13536_v33, %v2336_v28 }
 0x1a8   : > { %2048 = vmatpush.msra.mxu0 %v1917_v46  ;;  %2141 = vmatmul.f32.vlgmr.msrb.gmra.mxu2 %v2140_v51  ;;  %v2372_v51 = vand.u32 4294901760, %v13622_v11 }
 0x1a9   : > { %2101 = vmatpush.msra.mxu1 %v13380_v58  ;;  %2302 = vmatpush.msrb.mxu2 %v13530_v56  ;;  %v2342_v49 = vand.u32 4294901760, %v13547_v48  ;;  %v12330_v58 = vld [vmem:[%s15976_s3 + $0x1c8] sm:$0xff] }
 0x1aa   : > { %2052 = vmatpush.msra.mxu0 %v1923_v41  ;;  %v13581_v5 = vand.u32 4294901760, %v12330_v58 }
 0x1ab   : > { %2103 = vmatpush.msra.mxu1 %v13397_v8  ;;  %2167 = vmatmul.f32.vlgmr.msrb.gmra.mxu3 %v13464_v34  ;;  %v2343_v39 = vsub.f32 %v13547_v48, %v2342_v49 }
 0x1ac   : > { %2056 = vmatpush.msra.mxu0 %v1929_v16  ;;  %2304 = vmatpush.msrb.mxu2 %v13538_v6  ;;  %v2338_v16 = vand.u32 4294901760, %v2337_v18  ;;  %v13597_v1 = vsub.f32 %v12330_v58, %v13581_v5  ;;  %v12343_v18 = vld [vmem:[%s15976_s3 + $0x230] sm:$0xff] }
 0x1ad   : > { %2105 = vmatpush.msra.mxu1 %v13408_v7  ;;  %v12327_v7 = vld [vmem:[%s15976_s3 + $0x1b0] sm:$0xff] }
 0x1ae   : > { %2060 = vmatpush.msra.mxu0 %v1935_v44  ;;  %2107 = vmatmul.f32.vlgmr.msra.gmra.mxu1 %v13300_v55  ;;  %v13577_v44 = vsub.f32 %v12333_v3, %v13565_v2  ;;  %v13592_v59 = vand.u32 4294901760, %v12327_v7  ;;  %v2360_v21 = vand.u32 4294901760, %v13597_v1  ;;  %v2373_v3 = vsub.f32 %v13622_v11, %v2372_v51 }
 0x1af   : > { %2259 = vmatpush.msrb.mxu1 %v12578_v30  ;;  %2339 = vmatpush.msrb.mxu3 %v2338_v16 }
 0x1b0   : > { %2064 = vmatpush.msra.mxu0 %v1941_v61  ;;  %2191 = vmatmul.f32.vlgmr.msra.gmra.mxu2 %v2137_v19  ;;  %v2344_v61 = vand.u32 4294901760, %v2343_v39  ;;  %v13608_v62 = vsub.f32 %v12327_v7, %v13592_v59  ;;  %v2361_v19 = vsub.f32 %v13597_v1, %v2360_v21  ;;  %v13653_v39 = vand.u32 4294901760, %v12343_v18 }
 0x1b1   : > { %2434 = vmatpush.msra.mxu1 %v13530_v56 }
 0x1b2   : > { %2068 = vmatpush.msra.mxu0 %v1947_v35  ;;  %v2354_v35 = vand.u32 4294901760, %v13577_v44  ;;  %2345 = vmatpush.msrb.mxu3 %v2344_v61  ;;  %v2366_v25 = vand.u32 4294901760, %v13608_v62  ;;  %v2362_v43 = vand.u32 4294901760, %v2361_v19  ;;  %v2374_v61 = vand.u32 4294901760, %v2373_v3 }
 0x1b3   : > { %2215 = vmatmul.f32.vlgmr.msra.gmra.mxu3 %v2138_v26  ;;  %2436 = vmatpush.msra.mxu1 %v13538_v6  ;;  %v13629_v26 = vand.u32 4294901760, %v12321_v29 }
 0x1b4   : > { %2072 = vmatpush.msra.mxu0 %v1953_v52  ;;  %v2367_v12 = vsub.f32 %v13608_v62, %v2366_v25 }
 0x1b5   : > { %v13638_v10 = vsub.f32 %v12321_v29, %v13629_v26 }
 0x1b6   : > { %2076 = vmatpush.msra.mxu0 %v1959_v27  ;;  %2261 = vmatmul.f32.vlgmr.msrb.gmra.mxu1 %v13464_v34  ;;  %v2355_v27 = vsub.f32 %v13577_v44, %v2354_v35 }
 0x1b7   : > { %2078 = vmatmul.f32.vlgmr.msra.gmra.mxu0 %v13300_v55  ;;  %v12336_v55 = vld [vmem:[%s15976_s3 + $0x1f8] sm:$0xff]  ;;  %v2378_v16 = vand.u32 4294901760, %v13638_v10 }
 0x1b8   : > { %2237 = vmatpush.msrb.mxu0 %v12601_v42  ;;  %v13550_v46 = vand.u32 4294901760, %v12336_v55 }
 0x1ba   : > { %2397 = vmatpush.msra.mxu0 %v13536_v33  ;;  %v13562_v41 = vsub.f32 %v12336_v55, %v13550_v46  ;;  %2438 = vmatpush.msra.mxu1 %v13550_v46  ;;  %v2368_v55 = vand.u32 4294901760, %v2367_v12 }
 0x1bb   : > { %2306 = vmatpush.msrb.mxu2 %v13550_v46 }
 0x1bc   : > { %2400 = vmatpush.msra.mxu0 %v13547_v48  ;;  %v2348_v8 = vand.u32 4294901760, %v13562_v41  ;;  %2440 = vmatpush.msra.mxu1 %v13565_v2 }
 0x1bd   : > { %2308 = vmatpush.msrb.mxu2 %v13565_v2 }
 0x1be   : > { %2403 = vmatpush.msra.mxu0 %v13562_v41  ;;  %v2349_v54 = vsub.f32 %v13562_v41, %v2348_v8  ;;  %2442 = vmatpush.msra.mxu1 %v13581_v5  ;;  %v12331_v41 = vld [vmem:[%s15976_s3 + $0x1d0] sm:$0xff] }
 0x1bf   : > { %2239 = vmatmul.f32.vlgmr.msrb.gmra.mxu0 %v13464_v34  ;;  %2310 = vmatpush.msrb.mxu2 %v13581_v5  ;;  %v2356_v34 = vand.u32 4294901760, %v2355_v27  ;;  %v13669_v27 = vsub.f32 %v12343_v18, %v13653_v39 }
 0x1c0   : > { %2406 = vmatpush.msra.mxu0 %v13577_v44  ;;  %v2350_v14 = vand.u32 4294901760, %v2349_v54  ;;  %2444 = vmatpush.msra.mxu1 %v13592_v59  ;;  %v12340_v54 = vld [vmem:[%s15976_s3 + $0x218] sm:$0xff] }
 0x1c1   : > { %2312 = vmatpush.msrb.mxu2 %v13592_v59  ;;  %v13671_v29 = vand.u32 4294901760, %v12340_v54  ;;  %v12328_v44 = vld [vmem:[%s15976_s3 + $0x1b8] sm:$0xff] }
 0x1c2   : > { %2409 = vmatpush.msra.mxu0 %v13597_v1  ;;  %2351 = vmatpush.msrb.mxu3 %v2350_v14  ;;  %v2379_v14 = vsub.f32 %v13638_v10, %v2378_v16 }
 0x1c3   : > { %2446 = vmatpush.msra.mxu1 %v13610_v13  ;;  %2314 = vmatpush.msrb.mxu2 %v13610_v13  ;;  %v13683_v12 = vsub.f32 %v12340_v54, %v13671_v29  ;;  %v13712_v54 = vand.u32 4294901760, %v12331_v41 }
 0x1c4   : > { %2412 = vmatpush.msra.mxu0 %v13608_v62  ;;  %2357 = vmatpush.msrb.mxu3 %v2356_v34  ;;  %v12337_v34 = vld [vmem:[%s15976_s3 + $0x200] sm:$0xff]  ;;  %v2380_v33 = vand.u32 4294901760, %v2379_v14 }
 0x1c5   : > { %2448 = vmatpush.msra.mxu1 %v13629_v26  ;;  %2316 = vmatpush.msrb.mxu2 %v13629_v26  ;;  %v13680_v19 = vand.u32 4294901760, %v12337_v34 }
 0x1c6   : > { %2415 = vmatpush.msra.mxu0 %v13622_v11  ;;  %2363 = vmatpush.msrb.mxu3 %v2362_v43 }
 0x1c7   : > { %2467 = vmatpush.msra.mxu2 %v2336_v28  ;;  %v15988_v28 = vand.u32 4294901760, %v13669_v27  ;;  %v13701_v18 = vsub.f32 %v12337_v34, %v13680_v19 }
 0x1c8   : > { %2418 = vmatpush.msra.mxu0 %v13638_v10  ;;  %2369 = vmatpush.msrb.mxu3 %v2368_v55  ;;  %v12334_v55 = vld [vmem:[%s15976_s3 + $0x1e8] sm:$0xff] }
 0x1c9   : > { %2471 = vmatpush.msra.mxu2 %v2342_v49  ;;  %v2574_v48 = vsub.f32 %v13669_v27, %v15988_v28  ;;  %v15987_v49 = vand.u32 4294901760, %v13683_v12  ;;  %v13697_v3 = vand.u32 4294901760, %v12334_v55 }
 0x1ca   : > { %2539 = vmatpush.msrb.mxu0 %v13653_v39  ;;  %2375 = vmatpush.msrb.mxu3 %v2374_v61 }
 0x1cb   : > { %2475 = vmatpush.msra.mxu2 %v2348_v8  ;;  %v2575_v8 = vand.u32 4294901760, %v2574_v48  ;;  %v2580_v61 = vsub.f32 %v13683_v12, %v15987_v49  ;;  %v13717_v14 = vsub.f32 %v12334_v55, %v13697_v3  ;;  %v12325_v48 = vld [vmem:[%s15976_s3 + $0x1a0] sm:$0xff] }
 0x1cc   : > { %2541 = vmatpush.msrb.mxu0 %v13671_v29  ;;  %2381 = vmatpush.msrb.mxu3 %v2380_v33  ;;  %v13727_v33 = vand.u32 4294901760, %v12328_v44 }
 0x1cd   : > { %2479 = vmatpush.msra.mxu2 %v2354_v35  ;;  %2576 = vmatpush.msrb.mxu1 %v2575_v8  ;;  %v2581_v34 = vand.u32 4294901760, %v2580_v61 }
 0x1ce   : > { %2543 = vmatpush.msrb.mxu0 %v13680_v19  ;;  %2510 = vmatpush.msra.mxu3 %v13530_v56  ;;  %v15982_v56 = vand.u32 4294901760, %v13701_v18  ;;  %v13751_v61 = vsub.f32 %v12328_v44, %v13727_v33 }
 0x1cf   : > { %2483 = vmatpush.msra.mxu2 %v2360_v21  ;;  %v15984_v21 = vand.u32 4294901760, %v13717_v14  ;;  %2582 = vmatpush.msrb.mxu1 %v2581_v34 }
 0x1d0   : > { %2545 = vmatpush.msrb.mxu0 %v13697_v3  ;;  %2512 = vmatpush.msra.mxu3 %v13538_v6  ;;  %v13730_v6 = vsub.f32 %v12331_v41, %v13712_v54  ;;  %v2586_v1 = vsub.f32 %v13701_v18, %v15982_v56  ;;  %v13748_v41 = vand.u32 4294901760, %v12325_v48  ;;  %v15986_v34 = vand.u32 4294901760, %v13751_v61 }
 0x1d1   : > { %2487 = vmatpush.msra.mxu2 %v2366_v25  ;;  %v2592_v62 = vsub.f32 %v13717_v14, %v15984_v21 }
 0x1d2   : > { %2547 = vmatpush.msrb.mxu0 %v13712_v54  ;;  %2514 = vmatpush.msra.mxu3 %v13550_v46  ;;  %v15983_v46 = vand.u32 4294901760, %v13730_v6  ;;  %v2587_v56 = vand.u32 4294901760, %v2586_v1  ;;  %v2604_v21 = vsub.f32 %v13751_v61, %v15986_v34 }
 0x1d3   : > { %2491 = vmatpush.msra.mxu2 %v2372_v51  ;;  %v2593_v1 = vand.u32 4294901760, %v2592_v62  ;;  %v13773_v51 = vsub.f32 %v12325_v48, %v13748_v41 }
 0x1d4   : > { %2549 = vmatpush.msrb.mxu0 %v13727_v33  ;;  %2516 = vmatpush.msra.mxu3 %v13565_v2  ;;  %v2598_v25 = vsub.f32 %v13730_v6, %v15983_v46  ;;  %v12322_v2 = vld [vmem:[%s15976_s3 + $0x188] sm:$0xff]  ;;  %v2605_v62 = vand.u32 4294901760, %v2604_v21 }
 0x1d5   : > { %2588 = vmatpush.msrb.mxu1 %v2587_v56  ;;  %v13770_v11 = vand.u32 4294901760, %v12322_v2  ;;  %2495 = vmatpush.msra.mxu2 %v2378_v16 }
 0x1d6   : > { %2551 = vmatpush.msrb.mxu0 %v13748_v41  ;;  %2518 = vmatpush.msra.mxu3 %v13581_v5  ;;  %v2599_v46 = vand.u32 4294901760, %v2598_v25  ;;  %v15985_v5 = vand.u32 4294901760, %v13773_v51 }
 0x1d7   : > { %2594 = vmatpush.msrb.mxu1 %v2593_v1  ;;  %v13783_v56 = vsub.f32 %v12322_v2, %v13770_v11 }
 0x1d8   : > { %2520 = vmatpush.msra.mxu3 %v13592_v59  ;;  %2553 = vmatpush.msrb.mxu0 %v13770_v11  ;;  %v2610_v48 = vsub.f32 %v13773_v51, %v15985_v5 }
 0x1d9   : > { %2600 = vmatpush.msrb.mxu1 %v2599_v46  ;;  %v15989_v10 = vand.u32 4294901760, %v13783_v56 }
 0x1da   : > { %2522 = vmatpush.msra.mxu3 %v13610_v13  ;;  %v2611_v21 = vand.u32 4294901760, %v2610_v48 }
 0x1db   : > { %2606 = vmatpush.msrb.mxu1 %v2605_v62  ;;  %v2616_v13 = vsub.f32 %v13783_v56, %v15989_v10 }
 0x1dc   : > { %2524 = vmatpush.msra.mxu3 %v13629_v26 }
 0x1dd   : > { %2612 = vmatpush.msrb.mxu1 %v2611_v21  ;;  %v2617_v2 = vand.u32 4294901760, %v2616_v13 }
 0x1df   : > { %2618 = vmatpush.msrb.mxu1 %v2617_v2  ;;  %v12344_v2 = vld [vmem:[%s15976_s3 + $0x238] sm:$0xff] }
 0x1f6   : > { %v13649_v58 = vpop.f32.mrf.mxu1 }
 0x1fe   : > { %v13594_v52 = vpop.f32.mrf.mxu2  ;;  %v13655_v7 = vpop.f32.mrf.mxu0 }
 0x1ff   : > { %v13724_v35 = vpop.f32.mrf.mxu1 }
 0x200   : > { %v13618_v23 = vpop.f32.mrf.mxu3 }
 0x207   : > { %v13662_v17 = vpop.f32.mrf.mxu2 }
 0x208   : > { %v13732_v55 = vpop.f32.mrf.mxu0 }
 0x20a   : > { %v13685_v43 = vpop.f32.mrf.mxu3  ;;  %v13791_v16 = vpop.f32.mrf.mxu1 }
 0x20b   : > { %16014 = vst [vmem:[#allocation12_spill] sm:$0xff] %v13791_v16  ;;  %v14427_v16 = vand.u32 4294901760, %v12351_v36 }
 0x213   : > { %v13744_v8 = vpop.f32.mrf.mxu2 }
 0x214   : > { %16012 = vst [vmem:[#allocation10_spill] sm:$0xff] %v13744_v8 }
 0x215   : > { %v13795_v25 = vpop.f32.mrf.mxu0 }
 0x216   : > { %v13767_v44 = vpop.f32.mrf.mxu3 }
 0x217   : > { %16013 = vst [vmem:[#allocation11_spill] sm:$0xff] %v13767_v44  ;;  %v16027_v44 = vand.u32 4294901760, %v13751_v61 }
 0x21b   : > { %v13803_v1 = vpop.f32.mrf.mxu1 }
 0x21c   : > { %16017 = vst [vmem:[#allocation15_spill] sm:$0xff] %v13803_v1 }
 0x223   : > { %v13793_v59 = vpop.f32.mrf.mxu2 }
 0x224   : > { %16015 = vst [vmem:[#allocation13_spill] sm:$0xff] %v13793_v59  ;;  %v13805_v34 = vpop.f32.mrf.mxu0 }
 0x225   : > { %16018 = vst [vmem:[#allocation16_spill] sm:$0xff] %v13805_v34  ;;  %v16023_v34 = vand.u32 4294901760, %v13701_v18 }
 0x226   : > { %v13801_v46 = vpop.f32.mrf.mxu3 }
 0x227   : > { %16016 = vst [vmem:[#allocation14_spill] sm:$0xff] %v13801_v46 }
 0x22b   : > { %v2142_v5 = vpop.f32.mrf.mxu2  ;;  %v13807_v28 = vpop.f32.mrf.mxu1 }
 0x22c   : > { %16019 = vst [vmem:[#allocation17_spill] sm:$0xff] %v13807_v28  ;;  %v13817_v28 = vand.u32 4294901760, %v12344_v2 }
 0x22e   : > { %v2168_v49 = vpop.f32.mrf.mxu3 }
 0x22f   : > { %v2169_v48 = vadd.f32 %v2168_v49, %v2142_v5  ;;  %v12341_v49 = vld [vmem:[%s15976_s3 + $0x220] sm:$0xff] }
 0x233   : > { %v2192_v62 = vpop.f32.mrf.mxu2  ;;  %v2262_v46 = vpop.f32.mrf.mxu1 }
 0x234   : > { %v13809_v26 = vpop.f32.mrf.mxu0  ;;  %v2193_v22 = vadd.f32 %v2192_v62, %v2169_v48 }
 0x235   : > { %16020 = vst [vmem:[#allocation18_spill] sm:$0xff] %v13809_v26 }
 0x236   : > { %v2216_v0 = vpop.f32.mrf.mxu3 }
 0x237   : > { %v2217_v10 = vadd.f32 %v2216_v0, %v2193_v22  ;;  %v12338_v0 = vld [vmem:[%s15976_s3 + $0x208] sm:$0xff] }
 0x238   : > { %v13848_v48 = vand.u32 4294901760, %v12338_v0 }
 0x23c   : > { %v2240_v47 = vpop.f32.mrf.mxu0 }
 0x23d   : > { %v2241_v21 = vadd.f32 %v2240_v47, %v2217_v10  ;;  %v13827_v47 = vand.u32 4294901760, %v12341_v49  ;;  %v13837_v10 = vsub.f32 %v12344_v2, %v13817_v28  ;;  %v12332_v2 = vld [vmem:[%s15976_s3 + $0x1d8] sm:$0xff] }
 0x23f   : > { %v2263_v13 = vadd.f32 %v2262_v46, %v2241_v21  ;;  %v12335_v46 = vld [vmem:[%s15976_s3 + $0x1f0] sm:$0xff]  ;;  %v16022_v21 = vand.u32 4294901760, %v13683_v12  ;;  %v15990_v26 = vand.u32 4294901760, %v13837_v10 }
 0x240   : > { %v13863_v1 = vand.u32 4294901760, %v12335_v46 }
 0x241   : > { %v2291_v59 = vsel %vm503_vm1, %v2263_v13, 0  ;;  %v13854_v13 = vsub.f32 %v12341_v49, %v13827_v47  ;;  %v13871_v49 = vsub.f32 %v12338_v0, %v13848_v48 }
 0x242   : > { %v13815_v31 = vand.u32 4294901760, %v2291_v59  ;;  %v13888_v0 = vsub.f32 %v12335_v46, %v13863_v1  ;;  %v12323_v46 = vld [vmem:[%s15976_s3 + $0x190] sm:$0xff] }
 0x244   : > { %v13823_v22 = vsub.f32 %v2291_v59, %v13815_v31  ;;  %2383 = vmatmul.f32.vlgmr.msrb.gmra.mxu3 %v13815_v31  ;;  %v16021_v59 = vand.u32 4294901760, %v13669_v27 }
 0x245   : > { %2671 = vmatpush.msrb.mxu3 %v13653_v39 }
 0x246   : > { %2421 = vmatmul.f32.vlgmr.msra.gmra.mxu0 %v13823_v22  ;;  %v13834_v5 = vand.u32 4294901760, %v13823_v22 }
 0x247   : > { %2673 = vmatpush.msrb.mxu3 %v13671_v29  ;;  %2704 = vmatpush.msra.mxu0 %v16021_v59 }
 0x248   : > { %2452 = vmatmul.f32.vlgmr.msra.gmra.mxu1 %v13834_v5  ;;  %v2320_v62 = vsub.f32 %v13823_v22, %v13834_v5 }
 0x249   : > { %2675 = vmatpush.msrb.mxu3 %v13680_v19  ;;  %2708 = vmatpush.msra.mxu0 %v16022_v21  ;;  %v13873_v21 = vand.u32 4294901760, %v12332_v2 }
 0x24a   : > { %2747 = vmatpush.msra.mxu1 %v13653_v39  ;;  %v13860_v59 = vand.u32 4294901760, %v2320_v62  ;;  %v12329_v39 = vld [vmem:[%s15976_s3 + $0x1c0] sm:$0xff]  ;;  %v16025_v62 = vand.u32 4294901760, %v13730_v6 }
 0x24b   : > { %2677 = vmatpush.msrb.mxu3 %v13697_v3  ;;  %2712 = vmatpush.msra.mxu0 %v16023_v34  ;;  %v2811_v34 = vsub.f32 %v13837_v10, %v15990_v26  ;;  %v13901_v26 = vsub.f32 %v12332_v2, %v13873_v21 }
 0x24c   : > { %2749 = vmatpush.msra.mxu1 %v13671_v29  ;;  %2322 = vmatmul.f32.vlgmr.msrb.gmra.mxu2 %v13860_v59  ;;  %v16024_v29 = vand.u32 4294901760, %v13717_v14 }
 0x24d   : > { %2526 = vmatmul.f32.vlgmr.msra.gmra.mxu3 %v13815_v31  ;;  %2634 = vmatpush.msrb.mxu2 %v13669_v27  ;;  %v13895_v27 = vand.u32 4294901760, %v12329_v39  ;;  %v2812_v2 = vand.u32 4294901760, %v2811_v34 }
 0x24e   : > { %2679 = vmatpush.msrb.mxu3 %v13712_v54  ;;  %2716 = vmatpush.msra.mxu0 %v16024_v29  ;;  %v16029_v29 = vand.u32 4294901760, %v13773_v51 }
 0x24f   : > { %2751 = vmatpush.msra.mxu1 %v13680_v19  ;;  %2559 = vmatmul.f32.vlgmr.msrb.gmra.mxu0 %v13860_v59  ;;  %v16026_v19 = vand.u32 4294901760, %v13854_v13 }
 0x250   : > { %2637 = vmatpush.msrb.mxu2 %v13683_v12  ;;  %2681 = vmatpush.msrb.mxu3 %v13727_v33 }
 0x251   : > { %2720 = vmatpush.msra.mxu0 %v16025_v62  ;;  %2753 = vmatpush.msra.mxu1 %v13697_v3  ;;  %v2817_v12 = vsub.f32 %v13854_v13, %v16026_v19  ;;  %v13921_v3 = vsub.f32 %v12329_v39, %v13895_v27  ;;  %v13923_v62 = vand.u32 4294901760, %v12323_v46  ;;  %v16028_v19 = vand.u32 4294901760, %v13871_v49 }
 0x252   : > { %2620 = vmatmul.f32.vlgmr.msrb.gmra.mxu1 %v13815_v31  ;;  %2640 = vmatpush.msrb.mxu2 %v13701_v18  ;;  %v13935_v39 = vsub.f32 %v12326_v4, %v13912_v24  ;;  %v16031_v4 = vand.u32 4294901760, %v13783_v56 }
 0x253   : > { %2683 = vmatpush.msrb.mxu3 %v13748_v41  ;;  %2724 = vmatpush.msra.mxu0 %v16027_v44  ;;  %v2823_v18 = vsub.f32 %v13871_v49, %v16028_v19  ;;  %v2818_v44 = vand.u32 4294901760, %v2817_v12  ;;  %v2840_v19 = vand.u32 4294901760, %v13921_v3  ;;  %v13945_v34 = vsub.f32 %v12323_v46, %v13923_v62  ;;  %v12345_v46 = vld [vmem:[%s15975_s2 + $0x18] sm:$0xff] }
 0x254   : > { %2755 = vmatpush.msra.mxu1 %v13712_v54  ;;  %2643 = vmatpush.msrb.mxu2 %v13717_v14  ;;  %v16030_v54 = vand.u32 4294901760, %v13888_v0 }
 0x255   : > { %2685 = vmatpush.msrb.mxu3 %v13770_v11  ;;  %2728 = vmatpush.msra.mxu0 %v16029_v29  ;;  %v16032_v29 = vand.u32 4294901760, %v13901_v26 }
 0x256   : > { %2757 = vmatpush.msra.mxu1 %v13727_v33  ;;  %v2829_v14 = vsub.f32 %v13888_v0, %v16030_v54  ;;  %2497 = vmatmul.f32.vlgmr.msra.gmra.mxu2 %v13815_v31  ;;  %v2824_v33 = vand.u32 4294901760, %v2823_v18  ;;  %v2852_v18 = vand.u32 4294901760, %v13945_v34  ;;  %v3010_v54 = vsel %vm329_vm0, %v12345_v46, 0 }
 0x257   : > { %2813 = vmatpush.msra.mxu3 %v2812_v2  ;;  %2646 = vmatpush.msrb.mxu2 %v13730_v6  ;;  %v2835_v12 = vsub.f32 %v13901_v26, %v16032_v29  ;;  %v2846_v2 = vand.u32 4294901760, %v13935_v39 }
 0x258   : > { %2689 = vmatmul.f32.vlgmr.msrb.gmra.mxu3 %v13834_v5  ;;  %2732 = vmatpush.msra.mxu0 %v16031_v4  ;;  %v2830_v6 = vand.u32 4294901760, %v2829_v14  ;;  %v2853_v14 = vsub.f32 %v13945_v34, %v2852_v18  ;;  %v13979_v4 = vand.u32 4294901760, %v3010_v54 }
 0x259   : > { %2759 = vmatpush.msra.mxu1 %v13748_v41  ;;  %2819 = vmatpush.msra.mxu3 %v2818_v44  ;;  %v2841_v41 = vsub.f32 %v13921_v3, %v2840_v19  ;;  %v2836_v44 = vand.u32 4294901760, %v2835_v12 }
 0x25a   : > { %2871 = vmatpush.msrb.mxu0 %v13837_v10  ;;  %2649 = vmatpush.msrb.mxu2 %v13751_v61  ;;  %v2847_v61 = vsub.f32 %v13935_v39, %v2846_v2  ;;  %v3030_v29 = vsub.f32 %v3010_v54, %v13979_v4 }
 0x25b   : > { %2734 = vmatmul.f32.vlgmr.msra.gmra.mxu0 %v13815_v31  ;;  %2761 = vmatpush.msra.mxu1 %v13770_v11  ;;  %v2842_v11 = vand.u32 4294901760, %v2841_v41 }
 0x25c   : > { %2825 = vmatpush.msra.mxu3 %v2824_v33  ;;  %2874 = vmatpush.msrb.mxu0 %v13854_v13  ;;  %v2854_v33 = vand.u32 4294901760, %v2853_v14 }
 0x25d   : > { %2908 = vmatpush.msrb.mxu1 %v13817_v28  ;;  %2652 = vmatpush.msrb.mxu2 %v13773_v51  ;;  %v2848_v51 = vand.u32 4294901760, %v2847_v61 }
 0x25e   : > { %2763 = vmatmul.f32.vlgmr.msra.gmra.mxu1 %v13815_v31  ;;  %2831 = vmatpush.msra.mxu3 %v2830_v6  ;;  %v12352_v6 = vld [vmem:[%s15976_s3 + $0x270] sm:$0xff] }
 0x25f   : > { %2877 = vmatpush.msrb.mxu0 %v13871_v49  ;;  %2910 = vmatpush.msrb.mxu1 %v13827_v47  ;;  %v14109_v54 = vand.u32 4294901760, %v12352_v6 }
 0x260   : > { %2655 = vmatpush.msrb.mxu2 %v13783_v56  ;;  %2837 = vmatpush.msra.mxu3 %v2836_v44  ;;  %v3031_v56 = vand.u32 4294901760, %v3030_v29 }
 0x261   : > { %2880 = vmatpush.msrb.mxu0 %v13888_v0  ;;  %2912 = vmatpush.msrb.mxu1 %v13848_v48 }
 0x262   : > { %2776 = vmatpush.msra.mxu2 %v13817_v28  ;;  %2843 = vmatpush.msra.mxu3 %v2842_v11  ;;  %v3032_v12 = vsub.f32 %v3030_v29, %v3031_v56  ;;  %v12349_v11 = vld [vmem:[%s15976_s3 + $0x258] sm:$0xff] }
 0x263   : > { %2658 = vmatmul.f32.vlgmr.msrb.gmra.mxu2 %v13823_v22  ;;  %2883 = vmatpush.msrb.mxu0 %v13901_v26 }
 0x264   : > { %2778 = vmatpush.msra.mxu2 %v13827_v47  ;;  %2914 = vmatpush.msrb.mxu1 %v13863_v1 }
 0x265   : > { %2849 = vmatpush.msra.mxu3 %v2848_v51  ;;  %2886 = vmatpush.msrb.mxu0 %v13921_v3  ;;  %v12355_v3 = vld [vmem:[%s15976_s3 + $0x288] sm:$0xff]  ;;  %v14123_v51 = vsub.f32 %v12352_v6, %v14109_v54 }
 0x266   : > { %2780 = vmatpush.msra.mxu2 %v13848_v48  ;;  %2916 = vmatpush.msrb.mxu1 %v13873_v21  ;;  %v14098_v46 = vand.u32 4294901760, %v12355_v3 }
 0x267   : > { %2855 = vmatpush.msra.mxu3 %v2854_v33  ;;  %2889 = vmatpush.msrb.mxu0 %v13935_v39  ;;  %v14125_v33 = vand.u32 4294901760, %v12349_v11 }
 0x268   : > { %2782 = vmatpush.msra.mxu2 %v13863_v1  ;;  %2918 = vmatpush.msrb.mxu1 %v13895_v27  ;;  %v14112_v61 = vsub.f32 %v12355_v3, %v14098_v46  ;;  %v12368_v3 = vld [vmem:[%s15976_s3 + $0x2f0] sm:$0xff] }
 0x269   : > { %2857 = vmatmul.f32.vlgmr.msra.gmra.mxu3 %v13815_v31  ;;  %2892 = vmatpush.msrb.mxu0 %v13945_v34  ;;  %v14168_v6 = vand.u32 4294901760, %v12368_v3 }
 0x26a   : > { %2784 = vmatpush.msra.mxu2 %v13873_v21  ;;  %2984 = vmatpush.msrb.mxu3 %v13817_v28  ;;  %v3033_v28 = vand.u32 4294901760, %v3032_v12 }
 0x26b   : > { %2920 = vmatpush.msrb.mxu1 %v13912_v24  ;;  %2895 = vmatmul.f32.vlgmr.msrb.gmra.mxu0 %v13823_v22  ;;  %v16033_v22 = vand.u32 4294901760, %v13837_v10 }
 0x26c   : > { %2986 = vmatpush.msrb.mxu3 %v13827_v47  ;;  %2786 = vmatpush.msra.mxu2 %v13895_v27  ;;  %v16037_v47 = vand.u32 4294901760, %v13901_v26  ;;  %v12364_v26 = vld [vmem:[%s15976_s3 + $0x2d0] sm:$0xff] }
 0x26d   : > { %2922 = vmatpush.msrb.mxu1 %v13923_v62  ;;  %3028 = vmatpush.msra.mxu0 %v12578_v30  ;;  %v14053_v10 = vand.u32 4294901760, %v12364_v26 }
 0x26e   : > { %2926 = vmatmul.f32.vlgmr.msrb.gmra.mxu1 %v13834_v5  ;;  %2988 = vmatpush.msrb.mxu3 %v13848_v48 }
 0x26f   : > { %2788 = vmatpush.msra.mxu2 %v13912_v24  ;;  %3058 = vmatpush.msra.mxu1 %v12618_v50  ;;  %v16034_v50 = vand.u32 4294901760, %v13854_v13  ;;  %v14062_v48 = vsub.f32 %v12364_v26, %v14053_v10 }
 0x270   : > { %2990 = vmatpush.msrb.mxu3 %v13863_v1  ;;  %3081 = vmatpush.msrb.mxu0 %v12592_v37  ;;  %v16035_v37 = vand.u32 4294901760, %v13871_v49  ;;  %v16036_v1 = vand.u32 4294901760, %v13888_v0 }
 0x271   : > { %2790 = vmatpush.msra.mxu2 %v13923_v62  ;;  %3104 = vmatpush.msrb.mxu1 %v12578_v30 }
 0x272   : > { %2796 = vmatmul.f32.vlgmr.msra.gmra.mxu2 %v13860_v59  ;;  %2992 = vmatpush.msrb.mxu3 %v13873_v21  ;;  %v12358_v59 = vld [vmem:[%s15976_s3 + $0x2a0] sm:$0xff]  ;;  %v3235_v21 = vand.u32 4294901760, %v14062_v48 }
 0x273   : > { %2941 = vmatpush.msrb.mxu2 %v16033_v22  ;;  %3034 = vmatmul.f32.vlgmr.msra.gmra.mxu0 %v3033_v28  ;;  %v3259_v22 = vand.u32 4294901760, %v14123_v51 }
 0x274   : > { %2994 = vmatpush.msrb.mxu3 %v13895_v27  ;;  %v14080_v27 = vand.u32 4294901760, %v12358_v59  ;;  %v3236_v34 = vsub.f32 %v14062_v48, %v3235_v21 }
 0x275   : > { %2945 = vmatpush.msrb.mxu2 %v16034_v50  ;;  %v14137_v50 = vsub.f32 %v12349_v11, %v14125_v33 }
 0x276   : > { %2996 = vmatpush.msrb.mxu3 %v13912_v24  ;;  %3060 = vmatmul.f32.vlgmr.msra.gmra.mxu1 %v13979_v4  ;;  %v3237_v41 = vand.u32 4294901760, %v3236_v34 }
 0x277   : > { %2949 = vmatpush.msrb.mxu2 %v16035_v37 }
 0x278   : > { %2998 = vmatpush.msrb.mxu3 %v13923_v62 }
 0x279   : > { %2953 = vmatpush.msrb.mxu2 %v16036_v1  ;;  %3000 = vmatmul.f32.vlgmr.msrb.gmra.mxu3 %v13815_v31 }
 0x27a   : > { %3152 = vmatpush.msra.mxu3 %v12578_v30  ;;  %v12367_v30 = vld [vmem:[%s15976_s3 + $0x2e8] sm:$0xff] }
 0x27b   : > { %2957 = vmatpush.msrb.mxu2 %v16037_v47  ;;  %3084 = vmatmul.f32.vlgmr.msrb.gmra.mxu0 %v3030_v29  ;;  %v14045_v24 = vand.u32 4294901760, %v12367_v30  ;;  %v3253_v29 = vand.u32 4294901760, %v14112_v61  ;;  %v3260_v47 = vsub.f32 %v14123_v51, %v3259_v22 }
 0x27d   : > { %2961 = vmatpush.msrb.mxu2 %v2840_v19  ;;  %v14051_v5 = vsub.f32 %v12367_v30, %v14045_v24  ;;  %3327 = vmatpush.msrb.mxu3 %v14045_v24  ;;  %v14092_v19 = vsub.f32 %v12358_v59, %v14080_v27  ;;  %v3254_v37 = vsub.f32 %v14112_v61, %v3253_v29  ;;  %v3265_v30 = vand.u32 4294901760, %v14137_v50 }
 0x27e   : > { %3108 = vmatmul.f32.vlgmr.msrb.gmra.mxu1 %v3031_v56  ;;  %3195 = vmatpush.msra.mxu0 %v14045_v24  ;;  %v12346_v56 = vld [vmem:[%s15976_s3 + $0x240] sm:$0xff]  ;;  %v3261_v59 = vand.u32 4294901760, %v3260_v47 }
 0x27f   : > { %2965 = vmatpush.msrb.mxu2 %v2846_v2  ;;  %3329 = vmatpush.msrb.mxu3 %v14053_v10  ;;  %v3247_v44 = vand.u32 4294901760, %v14092_v19  ;;  %v14144_v1 = vand.u32 4294901760, %v12346_v56  ;;  %v3255_v26 = vand.u32 4294901760, %v3254_v37  ;;  %v12362_v37 = vld [vmem:[%s15976_s3 + $0x2c0] sm:$0xff] }
 0x280   : > { %3197 = vmatpush.msra.mxu0 %v14053_v10  ;;  %v14195_v47 = vand.u32 4294901760, %v12362_v37 }
 0x281   : > { %2969 = vmatpush.msrb.mxu2 %v2852_v18  ;;  %3154 = vmatmul.f32.vlgmr.msra.gmra.mxu3 %v13979_v4 }
 0x282   : > { %2971 = vmatmul.f32.vlgmr.msrb.gmra.mxu2 %v13815_v31  ;;  %v3229_v31 = vand.u32 4294901760, %v14051_v5 }
 0x283   : > { %3130 = vmatpush.msra.mxu2 %v12601_v42  ;;  %v12361_v42 = vld [vmem:[%s15976_s3 + $0x2b8] sm:$0xff] }
 0x284   : > { %v14065_v13 = vand.u32 4294901760, %v12361_v42  ;;  %v3230_v49 = vsub.f32 %v14051_v5, %v3229_v31 }
 0x285   : > { %3290 = vmatpush.msrb.mxu2 %v14051_v5 }
 0x286   : > { %v14077_v0 = vsub.f32 %v12361_v42, %v14065_v13  ;;  %3331 = vmatpush.msrb.mxu3 %v14065_v13  ;;  %3199 = vmatpush.msra.mxu0 %v14065_v13  ;;  %v3231_v62 = vand.u32 4294901760, %v3230_v49  ;;  %v14153_v42 = vsub.f32 %v12346_v56, %v14144_v1  ;;  %v3266_v49 = vsub.f32 %v14137_v50, %v3265_v30 }
 0x287   : > { %3293 = vmatpush.msrb.mxu2 %v14062_v48  ;;  %v14184_v56 = vsub.f32 %v12368_v3, %v14168_v6 }
 0x288   : > { %v3241_v39 = vand.u32 4294901760, %v14077_v0  ;;  %3333 = vmatpush.msrb.mxu3 %v14080_v27  ;;  %3201 = vmatpush.msra.mxu0 %v14080_v27  ;;  %v3271_v34 = vand.u32 4294901760, %v14153_v42  ;;  %v3267_v11 = vand.u32 4294901760, %v3266_v49  ;;  %v12359_v49 = vld [vmem:[%s15976_s3 + $0x2a8] sm:$0xff] }
 0x289   : > { %3296 = vmatpush.msrb.mxu2 %v14077_v0  ;;  %3232 = vmatpush.msra.mxu1 %v3231_v62  ;;  %v14212_v3 = vand.u32 4294901760, %v12359_v49 }
 0x28a   : > { %3132 = vmatmul.f32.vlgmr.msra.gmra.mxu2 %v13979_v4  ;;  %v3242_v18 = vsub.f32 %v14077_v0, %v3241_v39  ;;  %3335 = vmatpush.msrb.mxu3 %v14098_v46  ;;  %v3248_v4 = vsub.f32 %v14092_v19, %v3247_v44  ;;  %v12356_v0 = vld [vmem:[%s15976_s3 + $0x290] sm:$0xff] }
 0x28b   : > { %3299 = vmatpush.msrb.mxu2 %v14092_v19  ;;  %3203 = vmatpush.msra.mxu0 %v14098_v46  ;;  %v12353_v19 = vld [vmem:[%s15976_s3 + $0x278] sm:$0xff] }
 0x28c   : > { %3238 = vmatpush.msra.mxu1 %v3237_v41  ;;  %v3243_v14 = vand.u32 4294901760, %v3242_v18  ;;  %3337 = vmatpush.msrb.mxu3 %v14109_v54  ;;  %v3249_v28 = vand.u32 4294901760, %v3248_v4  ;;  %v3272_v4 = vsub.f32 %v14153_v42, %v3271_v34 }
 0x28d   : > { %3302 = vmatpush.msrb.mxu2 %v14112_v61  ;;  %3205 = vmatpush.msra.mxu0 %v14109_v54 }
 0x28e   : > { %3244 = vmatpush.msra.mxu1 %v3243_v14  ;;  %3339 = vmatpush.msrb.mxu3 %v14125_v33  ;;  %v12365_v14 = vld [vmem:[%s15976_s3 + $0x2d8] sm:$0xff]  ;;  %v3273_v5 = vand.u32 4294901760, %v3272_v4  ;;  %v14227_v4 = vand.u32 4294901760, %v12356_v0 }
 0x28f   : > { %3305 = vmatpush.msrb.mxu2 %v14123_v51  ;;  %3207 = vmatpush.msra.mxu0 %v14125_v33 }
 0x290   : > { %3250 = vmatpush.msra.mxu1 %v3249_v28  ;;  %3341 = vmatpush.msrb.mxu3 %v14144_v1  ;;  %v14186_v28 = vand.u32 4294901760, %v12365_v14 }
 0x291   : > { %3308 = vmatpush.msrb.mxu2 %v14137_v50  ;;  %3209 = vmatpush.msra.mxu0 %v14144_v1 }
 0x292   : > { %3256 = vmatpush.msra.mxu1 %v3255_v26  ;;  %v14198_v26 = vsub.f32 %v12365_v14, %v14186_v28 }
 0x293   : > { %3311 = vmatpush.msrb.mxu2 %v14153_v42  ;;  %3360 = vmatpush.msrb.mxu0 %v3229_v31  ;;  %v15993_v31 = vand.u32 4294901760, %v14184_v56 }
 0x294   : > { %3262 = vmatpush.msra.mxu1 %v3261_v59 }
 0x295   : > { %3432 = vmatpush.msra.mxu2 %v14168_v6  ;;  %3364 = vmatpush.msrb.mxu0 %v3235_v21  ;;  %v3467_v48 = vsub.f32 %v14184_v56, %v15993_v31  ;;  %v15991_v21 = vand.u32 4294901760, %v14198_v26 }
 0x296   : > { %3268 = vmatpush.msra.mxu1 %v3267_v11  ;;  %v14216_v11 = vsub.f32 %v12362_v37, %v14195_v47  ;;  %v14232_v37 = vsub.f32 %v12359_v49, %v14212_v3 }
 0x297   : > { %3434 = vmatpush.msra.mxu2 %v14186_v28  ;;  %3368 = vmatpush.msrb.mxu0 %v3241_v39  ;;  %v3468_v39 = vand.u32 4294901760, %v3467_v48  ;;  %v3473_v14 = vsub.f32 %v14198_v26, %v15991_v21  ;;  %v14242_v48 = vand.u32 4294901760, %v12353_v19 }
 0x298   : > { %3274 = vmatpush.msra.mxu1 %v3273_v5 }
 0x299   : > { %3436 = vmatpush.msra.mxu2 %v14195_v47  ;;  %3372 = vmatpush.msrb.mxu0 %v3247_v44  ;;  %v3474_v5 = vand.u32 4294901760, %v3473_v14 }
 0x29a   : > { %3403 = vmatpush.msrb.mxu1 %v14045_v24  ;;  %v15992_v24 = vand.u32 4294901760, %v14216_v11  ;;  %3469 = vmatpush.msra.mxu3 %v3468_v39  ;;  %v12350_v39 = vld [vmem:[%s15976_s3 + $0x260] sm:$0xff] }
 0x29b   : > { %3438 = vmatpush.msra.mxu2 %v14212_v3  ;;  %3376 = vmatpush.msrb.mxu0 %v3253_v29  ;;  %v15997_v29 = vand.u32 4294901760, %v14232_v37  ;;  %v14263_v14 = vand.u32 4294901760, %v12350_v39 }
 0x29c   : > { %3405 = vmatpush.msrb.mxu1 %v14053_v10  ;;  %v14245_v10 = vsub.f32 %v12356_v0, %v14227_v4  ;;  %v3479_v61 = vsub.f32 %v14216_v11, %v15992_v24  ;;  %3475 = vmatpush.msra.mxu3 %v3474_v5 }
 0x29d   : > { %3440 = vmatpush.msra.mxu2 %v14227_v4  ;;  %3380 = vmatpush.msrb.mxu0 %v3259_v22  ;;  %v3485_v31 = vsub.f32 %v14232_v37, %v15997_v29 }
 0x29e   : > { %3407 = vmatpush.msrb.mxu1 %v14065_v13  ;;  %v15994_v0 = vand.u32 4294901760, %v14245_v10  ;;  %v14266_v13 = vsub.f32 %v12353_v19, %v14242_v48  ;;  %v3480_v24 = vand.u32 4294901760, %v3479_v61 }
 0x29f   : > { %3442 = vmatpush.msra.mxu2 %v14242_v48  ;;  %3384 = vmatpush.msrb.mxu0 %v3265_v30  ;;  %v3486_v5 = vand.u32 4294901760, %v3485_v31  ;;  %v14288_v30 = vsub.f32 %v12350_v39, %v14263_v14 }
 0x2a0   : > { %3409 = vmatpush.msrb.mxu1 %v14080_v27  ;;  %v3491_v51 = vsub.f32 %v14245_v10, %v15994_v0  ;;  %v15996_v22 = vand.u32 4294901760, %v14266_v13  ;;  %v12347_v27 = vld [vmem:[%s15976_s3 + $0x248] sm:$0xff]  ;;  %3481 = vmatpush.msra.mxu3 %v3480_v24 }
 0x2a1   : > { %3444 = vmatpush.msra.mxu2 %v14263_v14  ;;  %v14285_v50 = vand.u32 4294901760, %v12347_v27  ;;  %3388 = vmatpush.msrb.mxu0 %v3271_v34 }
 0x2a2   : > { %3411 = vmatpush.msrb.mxu1 %v14098_v46  ;;  %v3492_v61 = vand.u32 4294901760, %v3491_v51  ;;  %v3497_v0 = vsub.f32 %v14266_v13, %v15996_v22  ;;  %3487 = vmatpush.msra.mxu3 %v3486_v5  ;;  %v15995_v46 = vand.u32 4294901760, %v14288_v30 }
 0x2a3   : > { %v14298_v31 = vsub.f32 %v12347_v27, %v14285_v50  ;;  %3446 = vmatpush.msra.mxu2 %v14285_v50 }
 0x2a4   : > { %3413 = vmatpush.msrb.mxu1 %v14109_v54  ;;  %v3498_v39 = vand.u32 4294901760, %v3497_v0  ;;  %3493 = vmatpush.msra.mxu3 %v3492_v61  ;;  %v3503_v42 = vsub.f32 %v14288_v30, %v15995_v46 }
 0x2a5   : > { %v15998_v54 = vand.u32 4294901760, %v14298_v31 }
 0x2a6   : > { %3415 = vmatpush.msrb.mxu1 %v14125_v33  ;;  %3499 = vmatpush.msra.mxu3 %v3498_v39  ;;  %v3504_v27 = vand.u32 4294901760, %v3503_v42 }
 0x2a7   : > { %v3509_v0 = vsub.f32 %v14298_v31, %v15998_v54 }
 0x2a8   : > { %3417 = vmatpush.msrb.mxu1 %v14144_v1  ;;  %3505 = vmatpush.msra.mxu3 %v3504_v27 }
 0x2a9   : > { %v3510_v5 = vand.u32 4294901760, %v3509_v0 }
 0x2ab   : > { %3511 = vmatpush.msra.mxu3 %v3510_v5  ;;  %v12369_v5 = vld [vmem:[%s15976_s3 + $0x2f8] sm:$0xff] }
 0x2c3   : > { %v14096_v2 = vpop.f32.mrf.mxu0 }
 0x2c5   : > { %v14133_v12 = vpop.f32.mrf.mxu1 }
 0x2c7   : > { %v14170_v41 = vpop.f32.mrf.mxu3 }
 0x2cc   : > { %v14164_v62 = vpop.f32.mrf.mxu0 }
 0x2cf   : > { %v14172_v18 = vpop.f32.mrf.mxu2  ;;  %v14200_v59 = vpop.f32.mrf.mxu1 }
 0x2d0   : > { %v14247_v49 = vpop.f32.mrf.mxu3 }
 0x2d8   : > { %v14239_v44 = vpop.f32.mrf.mxu0 }
 0x2d9   : > { %16038 = vst [vmem:[#allocation19_spill] sm:$0xff] %v14239_v44  ;;  %v14249_v21 = vpop.f32.mrf.mxu2 }
 0x2db   : > { %v14282_v19 = vpop.f32.mrf.mxu1  ;;  %v14308_v34 = vpop.f32.mrf.mxu3 }
 0x2dc   : > { %16039 = vst [vmem:[#allocation20_spill] sm:$0xff] %v14282_v19 }
 0x2dd   : > { %16041 = vst [vmem:[#allocation22_spill] sm:$0xff] %v14308_v34  ;;  %v16050_v34 = vand.u32 4294901760, %v14216_v11 }
 0x2e6   : > { %v14310_v51 = vpop.f32.mrf.mxu2 }
 0x2e7   : > { %16042 = vst [vmem:[#allocation23_spill] sm:$0xff] %v14310_v51  ;;  %v16054_v51 = vand.u32 4294901760, %v14266_v13 }
 0x2e8   : > { %v14300_v24 = vpop.f32.mrf.mxu0 }
 0x2e9   : > { %16040 = vst [vmem:[#allocation21_spill] sm:$0xff] %v14300_v24 }
 0x2eb   : > { %v14316_v33 = vpop.f32.mrf.mxu1 }
 0x2ec   : > { %16043 = vst [vmem:[#allocation24_spill] sm:$0xff] %v14316_v33  ;;  %v14318_v46 = vpop.f32.mrf.mxu3 }
 0x2ed   : > { %16044 = vst [vmem:[#allocation25_spill] sm:$0xff] %v14318_v46 }
 0x2f0   : > { %v3035_v61 = vpop.f32.mrf.mxu0 }
 0x2f3   : > { %v3061_v29 = vpop.f32.mrf.mxu1 }
 0x2f4   : > { %v3062_v24 = vadd.f32 %v3061_v29, %v3035_v61  ;;  %v14332_v29 = vand.u32 4294901760, %v12369_v5  ;;  %v12360_v61 = vld [vmem:[%s15976_s3 + $0x2b0] sm:$0xff] }
 0x2f5   : > { %v14320_v22 = vpop.f32.mrf.mxu2  ;;  %v14378_v8 = vand.u32 4294901760, %v12360_v61 }
 0x2f6   : > { %16045 = vst [vmem:[#allocation26_spill] sm:$0xff] %v14320_v22 }
 0x2f8   : > { %v3085_v19 = vpop.f32.mrf.mxu0 }
 0x2f9   : > { %v3086_v42 = vadd.f32 %v3085_v19, %v3062_v24  ;;  %v12366_v19 = vld [vmem:[%s15976_s3 + $0x2e0] sm:$0xff]  ;;  %v12363_v24 = vld [vmem:[%s15976_s3 + $0x2c8] sm:$0xff] }
 0x2fb   : > { %v3109_v44 = vpop.f32.mrf.mxu1 }
 0x2fc   : > { %v14322_v1 = vpop.f32.mrf.mxu3  ;;  %v3110_v54 = vadd.f32 %v3109_v44, %v3086_v42 }
 0x2fd   : > { %16046 = vst [vmem:[#allocation27_spill] sm:$0xff] %v14322_v1 }
 0x304   : > { %v3155_v33 = vpop.f32.mrf.mxu3 }
 0x305   : > { %v14324_v39 = vpop.f32.mrf.mxu2 }
 0x306   : > { %16047 = vst [vmem:[#allocation28_spill] sm:$0xff] %v14324_v39 }
 0x30d   : > { %v3133_v20 = vpop.f32.mrf.mxu2 }
 0x30e   : > { %v3134_v27 = vadd.f32 %v3133_v20, %v3110_v54  ;;  %v14342_v20 = vand.u32 4294901760, %v12366_v19 }
 0x310   : > { %v3156_v0 = vadd.f32 %v3155_v33, %v3134_v27  ;;  %v14352_v33 = vsub.f32 %v12369_v5, %v14332_v29  ;;  %v14363_v27 = vand.u32 4294901760, %v12363_v24  ;;  %v14369_v5 = vsub.f32 %v12366_v19, %v14342_v20 }
 0x312   : > { %v3184_v46 = vsel %vm503_vm1, %v3156_v0, 0  ;;  %v16049_v0 = vand.u32 4294901760, %v14198_v26  ;;  %v15999_v39 = vand.u32 4294901760, %v14352_v33  ;;  %v14386_v19 = vsub.f32 %v12363_v24, %v14363_v27 }
 0x313   : > { %v14330_v22 = vand.u32 4294901760, %v3184_v46  ;;  %v14403_v24 = vsub.f32 %v12360_v61, %v14378_v8  ;;  %v12348_v61 = vld [vmem:[%s15976_s3 + $0x250] sm:$0xff] }
 0x315   : > { %v14338_v44 = vsub.f32 %v3184_v46, %v14330_v22  ;;  %3276 = vmatmul.f32.vlgmr.msra.gmra.mxu1 %v14330_v22  ;;  %v16048_v46 = vand.u32 4294901760, %v14184_v56 }
 0x316   : > { %3564 = vmatpush.msra.mxu1 %v14168_v6 }
 0x317   : > { %3314 = vmatmul.f32.vlgmr.msrb.gmra.mxu2 %v14338_v44  ;;  %v14349_v54 = vand.u32 4294901760, %v14338_v44 }
 0x318   : > { %3566 = vmatpush.msra.mxu1 %v14186_v28  ;;  %3597 = vmatpush.msrb.mxu2 %v16048_v46  ;;  %v12357_v46 = vld [vmem:[%s15976_s3 + $0x298] sm:$0xff] }
 0x319   : > { %3345 = vmatmul.f32.vlgmr.msrb.gmra.mxu3 %v14349_v54  ;;  %v3213_v42 = vsub.f32 %v14338_v44, %v14349_v54 }
 0x31a   : > { %3568 = vmatpush.msra.mxu1 %v14195_v47  ;;  %3601 = vmatpush.msrb.mxu2 %v16049_v0  ;;  %v14388_v0 = vand.u32 4294901760, %v12357_v46 }
 0x31b   : > { %3640 = vmatpush.msrb.mxu3 %v14168_v6  ;;  %v14375_v1 = vand.u32 4294901760, %v3213_v42  ;;  %v12354_v6 = vld [vmem:[%s15976_s3 + $0x280] sm:$0xff]  ;;  %v16052_v42 = vand.u32 4294901760, %v14245_v10 }
 0x31c   : > { %3570 = vmatpush.msra.mxu1 %v14212_v3  ;;  %3605 = vmatpush.msrb.mxu2 %v16050_v34  ;;  %v3704_v34 = vsub.f32 %v14352_v33, %v15999_v39  ;;  %v14416_v39 = vsub.f32 %v12357_v46, %v14388_v0 }
 0x31d   : > { %3642 = vmatpush.msrb.mxu3 %v14186_v28  ;;  %3215 = vmatmul.f32.vlgmr.msra.gmra.mxu0 %v14375_v1  ;;  %v16051_v28 = vand.u32 4294901760, %v14232_v37 }
 0x31e   : > { %3419 = vmatmul.f32.vlgmr.msrb.gmra.mxu1 %v14330_v22  ;;  %3527 = vmatpush.msra.mxu0 %v14184_v56  ;;  %v14410_v56 = vand.u32 4294901760, %v12354_v6  ;;  %v3705_v46 = vand.u32 4294901760, %v3704_v34 }
 0x31f   : > { %3572 = vmatpush.msra.mxu1 %v14227_v4  ;;  %3609 = vmatpush.msrb.mxu2 %v16051_v28  ;;  %v16056_v28 = vand.u32 4294901760, %v14288_v30 }
 0x320   : > { %3644 = vmatpush.msrb.mxu3 %v14195_v47  ;;  %3452 = vmatmul.f32.vlgmr.msra.gmra.mxu2 %v14375_v1  ;;  %v16053_v47 = vand.u32 4294901760, %v14369_v5 }
 0x321   : > { %3530 = vmatpush.msra.mxu0 %v14198_v26  ;;  %3574 = vmatpush.msra.mxu1 %v14242_v48 }
 0x322   : > { %3613 = vmatpush.msrb.mxu2 %v16052_v42  ;;  %3646 = vmatpush.msrb.mxu3 %v14212_v3  ;;  %v3710_v26 = vsub.f32 %v14369_v5, %v16053_v47  ;;  %v14436_v3 = vsub.f32 %v12354_v6, %v14410_v56  ;;  %v14438_v42 = vand.u32 4294901760, %v12348_v61  ;;  %v16055_v47 = vand.u32 4294901760, %v14386_v19 }
 0x323   : > { %3513 = vmatmul.f32.vlgmr.msra.gmra.mxu3 %v14330_v22  ;;  %3533 = vmatpush.msra.mxu0 %v14216_v11  ;;  %v14450_v6 = vsub.f32 %v12351_v36, %v14427_v16  ;;  %v16058_v36 = vand.u32 4294901760, %v14298_v31 }
 0x324   : > { %3576 = vmatpush.msra.mxu1 %v14263_v14  ;;  %3617 = vmatpush.msrb.mxu2 %v16054_v51  ;;  %v3716_v11 = vsub.f32 %v14386_v19, %v16055_v47  ;;  %v3711_v51 = vand.u32 4294901760, %v3710_v26  ;;  %v3733_v47 = vand.u32 4294901760, %v14436_v3  ;;  %v14460_v34 = vsub.f32 %v12348_v61, %v14438_v42 }
 0x325   : > { %3648 = vmatpush.msrb.mxu3 %v14227_v4  ;;  %3536 = vmatpush.msra.mxu0 %v14232_v37  ;;  %v16057_v4 = vand.u32 4294901760, %v14403_v24 }
 0x326   : > { %3578 = vmatpush.msra.mxu1 %v14285_v50  ;;  %3621 = vmatpush.msrb.mxu2 %v16056_v28  ;;  %v16059_v28 = vand.u32 4294901760, %v14416_v39 }
 0x327   : > { %3650 = vmatpush.msrb.mxu3 %v14242_v48  ;;  %v3722_v37 = vsub.f32 %v14403_v24, %v16057_v4  ;;  %3390 = vmatmul.f32.vlgmr.msrb.gmra.mxu0 %v14330_v22  ;;  %v3717_v48 = vand.u32 4294901760, %v3716_v11  ;;  %v3745_v11 = vand.u32 4294901760, %v14460_v34 }
 0x328   : > { %3706 = vmatpush.msrb.mxu1 %v3705_v46  ;;  %3539 = vmatpush.msra.mxu0 %v14245_v10  ;;  %v3728_v26 = vsub.f32 %v14416_v39, %v16059_v28  ;;  %v3739_v46 = vand.u32 4294901760, %v14450_v6  ;;  %v3734_v10 = vsub.f32 %v14436_v3, %v3733_v47 }
 0x329   : > { %3582 = vmatmul.f32.vlgmr.msra.gmra.mxu1 %v14349_v54  ;;  %3625 = vmatpush.msrb.mxu2 %v16058_v36  ;;  %v3723_v61 = vand.u32 4294901760, %v3722_v37 }
 0x32a   : > { %3652 = vmatpush.msrb.mxu3 %v14263_v14  ;;  %3712 = vmatpush.msrb.mxu1 %v3711_v51  ;;  %v3729_v14 = vand.u32 4294901760, %v3728_v26  ;;  %v3746_v51 = vsub.f32 %v14460_v34, %v3745_v11 }
 0x32b   : > { %3764 = vmatpush.msra.mxu2 %v14352_v33  ;;  %3542 = vmatpush.msra.mxu0 %v14266_v13  ;;  %v3740_v13 = vsub.f32 %v14450_v6, %v3739_v46 }
 0x32c   : > { %3627 = vmatmul.f32.vlgmr.msrb.gmra.mxu2 %v14330_v22  ;;  %3654 = vmatpush.msrb.mxu3 %v14285_v50  ;;  %v3735_v50 = vand.u32 4294901760, %v3734_v10  ;;  %v3747_v4 = vand.u32 4294901760, %v3746_v51  ;;  %v16071_v10 = vld [vmem:[#allocation19_spill] sm:$0xff] }
 0x32d   : > { %3718 = vmatpush.msrb.mxu1 %v3717_v48  ;;  %3767 = vmatpush.msra.mxu2 %v14369_v5  ;;  %v16072_v51 = vld [vmem:[#allocation11_spill] sm:$0xff] }
 0x32e   : > { %3801 = vmatpush.msra.mxu3 %v14332_v29  ;;  %3545 = vmatpush.msra.mxu0 %v14288_v30  ;;  %v3741_v30 = vand.u32 4294901760, %v3740_v13  ;;  %v326_v13 = vld [vmem:[%s14555_s14 + $0x8] sm:$0xff] }
 0x32f   : > { %3656 = vmatmul.f32.vlgmr.msrb.gmra.mxu3 %v14330_v22  ;;  %3724 = vmatpush.msrb.mxu1 %v3723_v61 }
 0x330   : > { %3770 = vmatpush.msra.mxu2 %v14386_v19  ;;  %3803 = vmatpush.msra.mxu3 %v14342_v20 }
 0x331   : > { %3548 = vmatpush.msra.mxu0 %v14298_v31  ;;  %3730 = vmatpush.msrb.mxu1 %v3729_v14  ;;  %v16060_v31 = vand.u32 4294901760, %v14352_v33 }
 0x332   : > { %3773 = vmatpush.msra.mxu2 %v14403_v24  ;;  %3805 = vmatpush.msra.mxu3 %v14363_v27 }
 0x333   : > { %3669 = vmatpush.msrb.mxu0 %v14332_v29  ;;  %3736 = vmatpush.msrb.mxu1 %v3735_v50 }
 0x334   : > { %3551 = vmatmul.f32.vlgmr.msra.gmra.mxu0 %v14338_v44  ;;  %3776 = vmatpush.msra.mxu2 %v14416_v39  ;;  %v2385_v39 = vadd.f32 %v14170_v41, %v14172_v18 }
 0x335   : > { %3671 = vmatpush.msrb.mxu0 %v14342_v20  ;;  %3807 = vmatpush.msra.mxu3 %v14378_v8 }
 0x336   : > { %3742 = vmatpush.msrb.mxu1 %v3741_v30  ;;  %3779 = vmatpush.msra.mxu2 %v14436_v3 }
 0x337   : > { %3673 = vmatpush.msrb.mxu0 %v14363_v27  ;;  %3809 = vmatpush.msra.mxu3 %v14388_v0 }
 0x338   : > { %3748 = vmatpush.msrb.mxu1 %v3747_v4  ;;  %3782 = vmatpush.msra.mxu2 %v14450_v6 }
 0x339   : > { %3675 = vmatpush.msrb.mxu0 %v14378_v8  ;;  %3811 = vmatpush.msra.mxu3 %v14410_v56 }
 0x33a   : > { %3750 = vmatmul.f32.vlgmr.msrb.gmra.mxu1 %v14330_v22  ;;  %3785 = vmatpush.msra.mxu2 %v14460_v34  ;;  %v16065_v34 = vld [vmem:[#allocation23_spill] sm:$0xff] }
 0x33b   : > { %3677 = vmatpush.msrb.mxu0 %v14388_v0  ;;  %3877 = vmatpush.msra.mxu1 %v14332_v29  ;;  %v16061_v29 = vand.u32 4294901760, %v14369_v5  ;;  %v2423_v5 = vadd.f32 %v14096_v2, %v2385_v39  ;;  %v325_v2 = vld [vmem:[%s14555_s14] sm:$0xff] }
 0x33c   : > { %3813 = vmatpush.msra.mxu3 %v14427_v16  ;;  %3788 = vmatmul.f32.vlgmr.msra.gmra.mxu2 %v14338_v44  ;;  %v16062_v44 = vand.u32 4294901760, %v14386_v19 }
 0x33d   : > { %3879 = vmatpush.msra.mxu1 %v14342_v20  ;;  %3679 = vmatpush.msrb.mxu0 %v14410_v56  ;;  %v1492_v20 = vadd.f32 %v13649_v58, %v13655_v7 }
 0x33e   : > { %3815 = vmatpush.msra.mxu3 %v14438_v42 }
 0x33f   : > { %3819 = vmatmul.f32.vlgmr.msra.gmra.mxu3 %v14349_v54  ;;  %3881 = vmatpush.msra.mxu1 %v14363_v27  ;;  %v1530_v33 = vadd.f32 %v13594_v52, %v1492_v20 }
 0x340   : > { %3681 = vmatpush.msrb.mxu0 %v14427_v16 }
 0x341   : > { %3883 = vmatpush.msra.mxu1 %v14378_v8  ;;  %v16063_v8 = vand.u32 4294901760, %v14403_v24 }
 0x342   : > { %3683 = vmatpush.msrb.mxu0 %v14438_v42 }
 0x343   : > { %3689 = vmatmul.f32.vlgmr.msrb.gmra.mxu0 %v14375_v1  ;;  %3885 = vmatpush.msra.mxu1 %v14388_v0  ;;  %v16064_v1 = vmov %v16059_v28  ;;  %v16068_v28 = vld [vmem:[#allocation22_spill] sm:$0xff] }
 0x344   : > { %3834 = vmatpush.msra.mxu0 %v16060_v31 }
 0x345   : > { %3887 = vmatpush.msra.mxu1 %v14410_v56 }
 0x346   : > { %3838 = vmatpush.msra.mxu0 %v16061_v29 }
 0x347   : > { %3889 = vmatpush.msra.mxu1 %v14427_v16  ;;  %v599_v16 = vadd.f32 %v13140_v32, %v13142_v38  ;;  %v1561_v32 = vadd.f32 %v13618_v23, %v1530_v33  ;;  %v836_v23 = vadd.f32 %v13170_v9, %v13134_v45 }
 0x348   : > { %3842 = vmatpush.msra.mxu0 %v16062_v44 }
 0x349   : > { %3891 = vmatpush.msra.mxu1 %v14438_v42  ;;  %v637_v54 = vadd.f32 %v13066_v60, %v599_v16  ;;  %v1606_v60 = vadd.f32 %v13732_v55, %v1561_v32  ;;  %v874_v24 = vadd.f32 %v13280_v57, %v836_v23  ;;  %v1729_v55 = vadd.f32 %v13685_v43, %v13662_v17  ;;  %v16066_v43 = vld [vmem:[#allocation12_spill] sm:$0xff]  ;;  %v16081_v23 = vld [vmem:[#allocation13_spill] sm:$0xff] }
 0x34a   : > { %3846 = vmatpush.msra.mxu0 %v16063_v8  ;;  %3893 = vmatmul.f32.vlgmr.msra.gmra.mxu1 %v14330_v22  ;;  %v16073_v8 = vld [vmem:[#allocation20_spill] sm:$0xff] }
 0x34b   : > { %v668_v27 = vadd.f32 %v13103_v15, %v637_v54  ;;  %v2454_v15 = vadd.f32 %v14133_v12, %v2423_v5  ;;  %v1635_v41 = vadd.f32 %v13724_v35, %v1606_v60  ;;  %v905_v35 = vadd.f32 %v13278_v53, %v874_v24  ;;  %v16069_v53 = vld [vmem:[#allocation10_spill] sm:$0xff]  ;;  %v16076_v32 = vld [vmem:[#allocation16_spill] sm:$0xff] }
 0x34c   : > { %3850 = vmatpush.msra.mxu0 %v16064_v1 }
 0x34d   : > { %v713_v0 = vadd.f32 %v13219_v63, %v668_v27  ;;  %v2499_v7 = vadd.f32 %v14249_v21, %v2454_v15  ;;  %v2622_v21 = vadd.f32 %v14200_v59, %v14164_v62  ;;  %v16078_v15 = vld [vmem:[#allocation4_spill] sm:$0xff] }
 0x34e   : > { %3854 = vmatpush.msra.mxu0 %v3733_v47 }
 0x34f   : > { %v742_v58 = vadd.f32 %v13217_v40, %v713_v0  ;;  %v2528_v12 = vadd.f32 %v14247_v49, %v2499_v7  ;;  %v1767_v40 = vadd.f32 %v13795_v25, %v1729_v55  ;;  %v2660_v6 = vadd.f32 %v16065_v34, %v2622_v21  ;;  %v16067_v25 = vld [vmem:[#allocation2_spill] sm:$0xff]  ;;  %v16080_v7 = vld [vmem:[#allocation25_spill] sm:$0xff]  ;;  %v16087_v34 = vld [vmem:[#allocation24_spill] sm:$0xff] }
 0x350   : > { %3858 = vmatpush.msra.mxu0 %v3739_v46  ;;  %v950_v48 = vadd.f32 %v16067_v25, %v905_v35  ;;  %v16070_v46 = vld [vmem:[#allocation3_spill] sm:$0xff]  ;;  %v16083_v55 = vld [vmem:[#allocation21_spill] sm:$0xff]  ;;  %v16085_v21 = vld [vmem:[#allocation14_spill] sm:$0xff] }
 0x351   : > { %v1218_v56 = vadd.f32 %v742_v58, %v325_v2  ;;  %v1798_v47 = vadd.f32 %v16066_v43, %v1767_v40  ;;  %v2691_v62 = vadd.f32 %v16068_v28, %v2660_v6  ;;  %v16079_v58 = vld [vmem:[#allocation26_spill] sm:$0xff]  ;;  %v16089_v43 = vld [vmem:[#allocation28_spill] sm:$0xff] }
 0x352   : > { %3862 = vmatpush.msra.mxu0 %v3745_v11  ;;  %v979_v61 = vadd.f32 %v16070_v46, %v950_v48  ;;  %v327_v25 = vld [vmem:[%s14555_s14 + $0x10] sm:$0xff]  ;;  %v16090_v48 = vld [vmem:[#allocation17_spill] sm:$0xff]  ;;  %s12451_s14 = smov 111  }
 0x353   : > { %3864 = vmatmul.f32.vlgmr.msra.gmra.mxu0 %v14330_v22  ;;  %v2111_v45 = vadd.f32 %v1635_v41, %v1218_v56  ;;  %v1843_v26 = vadd.f32 %v16069_v53, %v1798_v47  ;;  %v2736_v11 = vadd.f32 %v16071_v10, %v2691_v62  ;;  %v16091_v53 = vld [vmem:[#allocation27_spill] sm:$0xff] }
 0x354   : > { %v1219_v29 = vadd.f32 %v979_v61, %v326_v13 }
 0x355   : > { %v3004_v37 = vadd.f32 %v2528_v12, %v2111_v45  ;;  %v1872_v30 = vadd.f32 %v16072_v51, %v1843_v26  ;;  %v2765_v1 = vadd.f32 %v16073_v8, %v2736_v11 }
 0x357   : > { %v2112_v20 = vadd.f32 %v1872_v30, %v1219_v29  ;;  %v12370_v30 = vld [vmem:[%s15977_s4 + $0x8] sm:$0xff] }
 0x359   : > { %v3005_v33 = vadd.f32 %v2765_v1, %v2112_v20 }
 0x392   : > { %v3277_v22 = vpop.f32.mrf.mxu1 }
 0x39a   : > { %v3216_v19 = vpop.f32.mrf.mxu0  ;;  %v3315_v52 = vpop.f32.mrf.mxu2 }
 0x39b   : > { %v3278_v38 = vadd.f32 %v3277_v22, %v3216_v19  ;;  %v3420_v57 = vpop.f32.mrf.mxu1  ;;  %v16074_v19 = vld [vmem:[#allocation7_spill] sm:$0xff]  ;;  %v16075_v22 = vld [vmem:[#allocation6_spill] sm:$0xff] }
 0x39c   : > { %v3346_v18 = vpop.f32.mrf.mxu3  ;;  %v1073_v0 = vadd.f32 %v16075_v22, %v16074_v19 }
 0x39d   : > { %v3316_v63 = vadd.f32 %v3315_v52, %v3278_v38  ;;  %v16077_v38 = vld [vmem:[#allocation15_spill] sm:$0xff] }
 0x39e   : > { %v1966_v60 = vadd.f32 %v16077_v38, %v16076_v32  ;;  %v1111_v52 = vadd.f32 %v16078_v15, %v1073_v0 }
 0x39f   : > { %v3347_v3 = vadd.f32 %v3346_v18, %v3316_v63  ;;  %v2859_v63 = vadd.f32 %v16080_v7, %v16079_v58  ;;  %v16082_v18 = vld [vmem:[#allocation5_spill] sm:$0xff] }
 0x3a0   : > { %v2004_v2 = vadd.f32 %v16081_v23, %v1966_v60  ;;  %v1142_v24 = vadd.f32 %v16082_v18, %v1111_v52 }
 0x3a1   : > { %v2897_v56 = vadd.f32 %v16083_v55, %v2859_v63 }
 0x3a3   : > { %v3453_v36 = vpop.f32.mrf.mxu2  ;;  %v2928_v6 = vadd.f32 %v16087_v34, %v2897_v56 }
 0x3a4   : > { %v3391_v42 = vpop.f32.mrf.mxu0 }
 0x3a5   : > { %v3392_v9 = vadd.f32 %v3391_v42, %v3347_v3  ;;  %v16084_v3 = vld [vmem:[#allocation9_spill] sm:$0xff]  ;;  %v2035_v42 = vadd.f32 %v16085_v21, %v2004_v2  ;;  %v2973_v47 = vadd.f32 %v16089_v43, %v2928_v6  ;;  %v3900_v2 = vld [vmem:[%s15977_s4] sm:$0xff] }
 0x3a6   : > { %v3514_v59 = vpop.f32.mrf.mxu3  ;;  %v3583_v31 = vpop.f32.mrf.mxu1  ;;  %v1187_v40 = vadd.f32 %v16084_v3, %v1142_v24  ;;  %v4357_v55 = vsel %vm329_vm0, %v3900_v2, 0 }
 0x3a7   : > { %v3421_v17 = vadd.f32 %v3420_v57, %v3392_v9  ;;  %v3515_v14 = vadd.f32 %v3514_v59, %v3453_v36  ;;  %v16086_v9 = vld [vmem:[#allocation18_spill] sm:$0xff]  ;;  %v3002_v26 = vadd.f32 %v16091_v53, %v2973_v47 }
 0x3a8   : > { %v2080_v35 = vadd.f32 %v16086_v9, %v2035_v42  ;;  %v14685_v42 = vand.u32 4294901760, %v4357_v55 }
 0x3a9   : > { %v14575_v49 = vadd.f32 %v3421_v17, %v3004_v37  ;;  %v16088_v37 = vld [vmem:[#allocation8_spill] sm:$0xff] }
 0x3aa   : > { %v1216_v17 = vadd.f32 %v16088_v37, %v1187_v40  ;;  %v2109_v28 = vadd.f32 %v16090_v48, %v2080_v35 }
 0x3ab   : > { %3903 = vrot.lane.b32.xlu0 %v14575_v49, %s12436_s15  ;;  %v4374_v23 = vand.u32 4294901760, %v14575_v49 }
 0x3ac   : > { %v1220_v59 = vadd.f32 %v1216_v17, %v327_v25 }
 0x3ad   : > { %v4401_v3 = vsub.f32 %v14575_v49, %v4374_v23 }
 0x3ae   : > { %v2113_v10 = vadd.f32 %v2109_v28, %v1220_v59 }
 0x3af   : > { %v3628_v16 = vpop.f32.mrf.mxu2  ;;  %v4402_v9 = vand.u32 4294901760, %v4401_v3 }
 0x3b0   : > { %v3006_v13 = vadd.f32 %v3002_v26, %v2113_v10 }
 0x3b1   : > { %v3552_v50 = vpop.f32.mrf.mxu0 }
 0x3b2   : > { %v3553_v4 = vadd.f32 %v3552_v50, %v3515_v14  ;;  %v3657_v39 = vpop.f32.mrf.mxu3 }
 0x3b4   : > { %v3584_v44 = vadd.f32 %v3583_v31, %v3553_v4  ;;  %v3916_v4 = vsel %vm329_vm0, %v12370_v30, 0 }
 0x3b5   : > { %v14648_v31 = vand.u32 4294901760, %v3916_v4 }
 0x3b6   : > { %v3629_v54 = vadd.f32 %v3628_v16, %v3584_v44  ;;  %v3909_v44 = vlaneseq }
 0x3b7   : > { %v3751_v12 = vpop.f32.mrf.mxu1  ;;  %v14651_v29 = vsub.f32 %v3916_v4, %v14648_v31 }
 0x3b8   : > { %v3658_v27 = vadd.f32 %v3657_v39, %v3629_v54  ;;  %v14656_v16 = vand.u32 127, %v3909_v44 }
 0x3b9   : > { %v14654_v1 = vand.u32 4294901760, %v14651_v29 }
 0x3ba   : > { %v14587_v5 = vadd.f32 %v3658_v27, %v3005_v33  ;;  %16092 = vst [vmem:[#allocation23_spill] sm:$0xff] %v14656_v16  ;;  %vm3911_vm2 = vcmp.lt.s32.totalorder %v14656_v16, 127  ;;  %vm4805_vm3 = vcmp.lt.s32.totalorder %v14656_v16, 126  ;;  %vm5261_vm4 = vcmp.lt.s32.totalorder %v14656_v16, 110 }
 0x3bb   : > { %v3938_v20 = vsub.f32 %v14651_v29, %v14654_v1  ;;  %vm5717_vm5 = vcmp.lt.s32.totalorder %v14656_v16, 109  ;;  %vm6173_vm6 = vcmp.lt.s32.totalorder %v14656_v16, 108  ;;  %vm6629_vm7 = vcmp.lt.s32.totalorder %v14656_v16, 92 }
 0x3bc   : > { %4801 = vrot.lane.b32.xlu2 %v14587_v5, %s12437_s16  ;;  %3905 = vrot.lane.b32.xlu0 %v14587_v5, %s12436_s15  ;;  %v14678_v24 = vand.u32 4294901760, %v14587_v5  ;;  %vm7085_vm8 = vcmp.lt.s32.totalorder %v14656_v16, 91  ;;  %vm7541_vm9 = vcmp.lt.s32.totalorder %v14656_v16, 90 }
 0x3bd   : > { %v3939_v33 = vand.u32 4294901760, %v3938_v20 }
 0x3be   : > { %v4547_v21 = vsub.f32 %v14587_v5, %v14678_v24 }
 0x3bf   : > { %v3789_v57 = vpop.f32.mrf.mxu2 }
 0x3c0   : > { %v3690_v41 = vpop.f32.mrf.mxu0  ;;  %v4548_v35 = vand.u32 4294901760, %v4547_v21 }
 0x3c1   : > { %v3752_v45 = vadd.f32 %v3751_v12, %v3690_v41 }
 0x3c2   : > { %v3820_v62 = vpop.f32.mrf.mxu3  ;;  %v4549_v34 = vsub.f32 %v4547_v21, %v4548_v35 }
 0x3c3   : > { %v3790_v36 = vadd.f32 %v3789_v57, %v3752_v45 }
 0x3c4   : > { %5255 = vrot.lane.b32.xlu0 %v14575_v49, %s12438_s17  ;;  %v4550_v37 = vand.u32 4294901760, %v4549_v34 }
 0x3c5   : > { %v3821_v46 = vadd.f32 %v3820_v62, %v3790_v36 }
 0x3c7   : > { %v3894_v14 = vpop.f32.mrf.mxu1 }
 0x3cc   : > { %5711 = vrot.lane.b32.xlu0 %v14575_v49, %s12439_s18 }
 0x3d0   : > { %v3865_v61 = vpop.f32.mrf.mxu0 }
 0x3d1   : > { %v3866_v11 = vadd.f32 %v3865_v61, %v3821_v46  ;;  %v12371_v46 = vld [vmem:[%s15977_s4 + $0x10] sm:$0xff] }
 0x3d3   : > { %v3895_v50 = vadd.f32 %v3894_v14, %v3866_v11  ;;  %v4810_v11 = vsel %vm329_vm0, %v12371_v46, 0 }
 0x3d4   : > { %6167 = vrot.lane.b32.xlu0 %v14575_v49, %s12440_s19 }
 0x3d5   : > { %v14617_v51 = vadd.f32 %v3895_v50, %v3006_v13  ;;  %v14721_v13 = vand.u32 4294901760, %v4810_v11 }
 0x3d7   : > { %3907 = vrot.lane.b32.xlu1 %v14617_v51, %s12436_s15  ;;  %4803 = vrot.lane.b32.xlu2 %v14617_v51, %s12437_s16  ;;  %v4666_v48 = vand.u32 4294901760, %v14617_v51  ;;  %v14729_v4 = vsub.f32 %v4810_v11, %v14721_v13 }
 0x3d9   : > { %v4693_v62 = vsub.f32 %v14617_v51, %v4666_v48  ;;  %v14735_v44 = vand.u32 4294901760, %v14729_v4 }
 0x3db   : > { %v4694_v53 = vand.u32 4294901760, %v4693_v62  ;;  %v4832_v20 = vsub.f32 %v14729_v4, %v14735_v44 }
 0x3dc   : > { %6623 = vrot.lane.b32.xlu0 %v14575_v49, %s12441_s20 }
 0x3dd   : > { %v4695_v61 = vsub.f32 %v4693_v62, %v4694_v53 }
 0x3df   : > { %5259 = vrot.lane.b32.xlu2 %v14617_v51, %s12438_s17  ;;  %4799 = vrot.lane.b32.xlu1 %v14575_v49, %s12437_s16  ;;  %v4696_v14 = vand.u32 4294901760, %v4695_v61 }
 0x3e4   : > { %7079 = vrot.lane.b32.xlu0 %v14575_v49, %s12442_s21 }
 0x3e7   : > { %5715 = vrot.lane.b32.xlu2 %v14617_v51, %s12439_s18  ;;  %5257 = vrot.lane.b32.xlu1 %v14587_v5, %s12438_s17 }
 0x3ec   : > { %7535 = vrot.lane.b32.xlu0 %v14575_v49, %s12443_s22  ;;  %v14690_v49 = vsub.f32 %v4357_v55, %v14685_v42 }
 0x3ee   : > { %v14694_v6 = vand.u32 4294901760, %v14690_v49 }
 0x3ef   : > { %6171 = vrot.lane.b32.xlu2 %v14617_v51, %s12440_s19  ;;  %5713 = vrot.lane.b32.xlu1 %v14587_v5, %s12439_s18 }
 0x3f0   : > { %v4379_v17 = vsub.f32 %v14690_v49, %v14694_v6 }
 0x3f2   : > { %v4380_v36 = vand.u32 4294901760, %v4379_v17 }
 0x3f7   : > { %6627 = vrot.lane.b32.xlu2 %v14617_v51, %s12441_s20  ;;  %6169 = vrot.lane.b32.xlu1 %v14587_v5, %s12440_s19 }
 0x3ff   : > { %7083 = vrot.lane.b32.xlu2 %v14617_v51, %s12442_s21  ;;  %6625 = vrot.lane.b32.xlu1 %v14587_v5, %s12441_s20 }
 0x407   : > { %7539 = vrot.lane.b32.xlu2 %v14617_v51, %s12443_s22  ;;  %7081 = vrot.lane.b32.xlu1 %v14587_v5, %s12442_s21 }
 0x40f   : > { %7537 = vrot.lane.b32.xlu1 %v14587_v5, %s12443_s22  ;;  %v4403_v5 = vsub.f32 %v4401_v3, %v4402_v9 }
 0x411   : > { %v4404_v57 = vand.u32 4294901760, %v4403_v5 }
 0x416   : > { %v4802_v47 = vpop.permute.xlu2 %4801 }
 0x41d   : > { %v3904_v8 = vpop.permute.xlu0 %3903 }
 0x42e   : > { %v3906_v54 = vpop.permute.xlu0 %3905 }
 0x42f   : > { %v3913_v39 = vsel %vm3911_vm2, %v3904_v8, %v3906_v54 }
 0x430   : > { %v3933_v27 = vand.u32 4294901760, %v3913_v39 }
 0x431   : > { %v4804_v50 = vpop.permute.xlu2 %4803 }
 0x432   : > { %v3960_v19 = vsub.f32 %v3913_v39, %v3933_v27  ;;  %3934 = vmatpush.msrb.mxu2 %v3933_v27  ;;  %4058 = vmatpush.msrb.mxu1 %v3933_v27  ;;  %v4806_v30 = vsel %vm4805_vm3, %v4802_v47, %v4804_v50 }
 0x433   : > { %3940 = vmatmul.f32.vlgmr.msrb.gmra.mxu2 %v3939_v33  ;;  %4060 = vmatmul.f32.vlgmr.msrb.gmra.mxu1 %v14648_v31 }
 0x434   : > { %v3961_v22 = vand.u32 4294901760, %v3960_v19  ;;  %3987 = vmatpush.msra.mxu2 %v3960_v19 }
 0x436   : > { %v3962_v0 = vsub.f32 %v3960_v19, %v3961_v22  ;;  %4036 = vmatpush.msrb.mxu0 %v3961_v22 }
 0x437   : > { %4038 = vmatmul.f32.vlgmr.msrb.gmra.mxu0 %v14648_v31 }
 0x438   : > { %v3963_v32 = vand.u32 4294901760, %v3962_v0 }
 0x43a   : > { %3964 = vmatpush.msrb.mxu3 %v3963_v32 }
 0x43b   : > { %3990 = vmatmul.f32.vlgmr.msra.gmra.mxu2 %v14651_v29  ;;  %3966 = vmatmul.f32.vlgmr.msrb.gmra.mxu3 %v14648_v31 }
 0x43c   : > { %4010 = vmatpush.msra.mxu3 %v3933_v27 }
 0x443   : > { %4014 = vmatmul.f32.vlgmr.msra.gmra.mxu3 %v14654_v1 }
 0x449   : > { %v3908_v38 = vpop.permute.xlu1 %3907 }
 0x44a   : > { %v3912_v60 = vsel %vm3911_vm2, %v3906_v54, %v3908_v38  ;;  %v3914_v15 = vsel %vm3911_vm2, %v3908_v38, %v3904_v8 }
 0x44b   : > { %v4079_v52 = vand.u32 4294901760, %v3912_v60  ;;  %v4225_v58 = vand.u32 4294901760, %v3914_v15 }
 0x44d   : > { %v4106_v7 = vsub.f32 %v3912_v60, %v4079_v52  ;;  %v4252_v63 = vsub.f32 %v3914_v15, %v4225_v58  ;;  %4080 = vmatpush.msrb.mxu2 %v4079_v52  ;;  %4156 = vmatpush.msra.mxu1 %v4079_v52  ;;  %v5256_v60 = vpop.permute.xlu0 %5255 }
 0x44e   : > { %4086 = vmatmul.f32.vlgmr.msrb.gmra.mxu2 %v3939_v33  ;;  %4160 = vmatmul.f32.vlgmr.msra.gmra.mxu1 %v14654_v1 }
 0x44f   : > { %v4107_v41 = vand.u32 4294901760, %v4106_v7  ;;  %v4253_v18 = vand.u32 4294901760, %v4252_v63  ;;  %4133 = vmatpush.msra.mxu0 %v4106_v7 }
 0x450   : > { %4136 = vmatmul.f32.vlgmr.msra.gmra.mxu0 %v14651_v29 }
 0x451   : > { %v4108_v56 = vsub.f32 %v4106_v7, %v4107_v41  ;;  %v4254_v12 = vsub.f32 %v4252_v63, %v4253_v18  ;;  %4226 = vmatpush.msrb.mxu0 %v4225_v58  ;;  %4182 = vmatpush.msra.mxu2 %v4107_v41  ;;  %v4800_v43 = vpop.permute.xlu1 %4799 }
 0x452   : > { %v4807_v25 = vsel %vm4805_vm3, %v4800_v43, %v4802_v47 }
 0x453   : > { %4328 = vmatpush.msra.mxu0 %v4253_v18  ;;  %4279 = vmatpush.msrb.mxu2 %v4252_v63  ;;  %v4109_v40 = vand.u32 4294901760, %v4108_v56  ;;  %v4255_v45 = vand.u32 4294901760, %v4254_v12  ;;  %v4827_v28 = vand.u32 4294901760, %v4807_v25  ;;  %v12372_v63 = vld [vmem:[%s15977_s4 + $0x18] sm:$0xff] }
 0x454   : > { %v5266_v2 = vsel %vm329_vm0, %v12372_v63, 0 }
 0x455   : > { %4110 = vmatpush.msrb.mxu3 %v4109_v40  ;;  %4256 = vmatpush.msrb.mxu1 %v4255_v45  ;;  %v4854_v59 = vsub.f32 %v4807_v25, %v4827_v28  ;;  %v5712_v5 = vpop.permute.xlu0 %5711  ;;  %v12373_v25 = vld [vmem:[%s15977_s4 + $0x20] sm:$0xff] }
 0x456   : > { %4112 = vmatmul.f32.vlgmr.msrb.gmra.mxu3 %v14648_v31  ;;  %4184 = vmatmul.f32.vlgmr.msra.gmra.mxu2 %v14648_v31 }
 0x457   : > { %4204 = vmatpush.msra.mxu3 %v4079_v52  ;;  %4258 = vmatmul.f32.vlgmr.msrb.gmra.mxu1 %v14648_v31  ;;  %v4855_v26 = vand.u32 4294901760, %v4854_v59  ;;  %v5260_v52 = vpop.permute.xlu2 %5259 }
 0x458   : > { %4375 = vmatpush.msra.mxu2 %v4374_v23  ;;  %4350 = vmatpush.msra.mxu1 %v4225_v58 }
 0x459   : > { %4302 = vmatpush.msrb.mxu3 %v4225_v58  ;;  %4232 = vmatmul.f32.vlgmr.msrb.gmra.mxu0 %v3939_v33  ;;  %v4856_v10 = vsub.f32 %v4854_v59, %v4855_v26  ;;  %v4833_v33 = vand.u32 4294901760, %v4832_v20  ;;  %v5258_v32 = vpop.permute.xlu1 %5257 }
 0x45a   : > { %4451 = vmatpush.msrb.mxu1 %v4374_v23  ;;  %4428 = vmatpush.msrb.mxu0 %v4401_v3  ;;  %v5263_v15 = vsel %vm5261_vm4, %v5256_v60, %v5258_v32  ;;  %v5262_v58 = vsel %vm5261_vm4, %v5258_v32, %v5260_v52 }
 0x45b   : > { %v4857_v51 = vand.u32 4294901760, %v4856_v10  ;;  %v5283_v7 = vand.u32 4294901760, %v5263_v15 }
 0x45d   : > { %v5310_v41 = vsub.f32 %v5263_v15, %v5283_v7 }
 0x45e   : > { %4206 = vmatmul.f32.vlgmr.msra.gmra.mxu3 %v14648_v31  ;;  %4282 = vmatmul.f32.vlgmr.msrb.gmra.mxu2 %v14651_v29  ;;  %v4973_v29 = vand.u32 4294901760, %v4806_v30 }
 0x45f   : > { %4405 = vmatpush.msra.mxu3 %v4404_v57  ;;  %4352 = vmatmul.f32.vlgmr.msra.gmra.mxu1 %v14648_v31  ;;  %v5311_v55 = vand.u32 4294901760, %v5310_v41  ;;  %v5716_v61 = vpop.permute.xlu2 %5715 }
 0x460   : > { %4477 = vmatpush.msrb.mxu2 %v4402_v9  ;;  %4551 = vmatpush.msra.mxu1 %v4550_v37 }
 0x461   : > { %4330 = vmatmul.f32.vlgmr.msra.gmra.mxu0 %v14648_v31  ;;  %v4808_v31 = vsel %vm4805_vm3, %v4804_v50, %v4800_v43  ;;  %v5312_v3 = vsub.f32 %v5310_v41, %v5311_v55  ;;  %v5720_v50 = vsel %vm5717_vm5, %v5716_v61, %v5712_v5 }
 0x462   : > { %4521 = vmatpush.msra.mxu0 %v14678_v24  ;;  %v5119_v8 = vand.u32 4294901760, %v4808_v31 }
 0x464   : > { %v5146_v54 = vsub.f32 %v4808_v31, %v5119_v8 }
 0x466   : > { %4306 = vmatmul.f32.vlgmr.msrb.gmra.mxu3 %v14654_v1  ;;  %4381 = vmatmul.f32.vlgmr.msra.gmra.mxu2 %v4380_v36  ;;  %v5000_v1 = vsub.f32 %v4806_v30, %v4973_v29  ;;  %v5147_v27 = vand.u32 4294901760, %v5146_v54 }
 0x467   : > { %4499 = vmatpush.msrb.mxu3 %v4374_v23  ;;  %4455 = vmatmul.f32.vlgmr.msrb.gmra.mxu1 %v14694_v6  ;;  %v5429_v23 = vand.u32 4294901760, %v5262_v58 }
 0x468   : > { %4574 = vmatpush.msra.mxu2 %v4547_v21  ;;  %4645 = vmatpush.msrb.mxu1 %v14678_v24  ;;  %v5001_v39 = vand.u32 4294901760, %v5000_v1  ;;  %v5148_v22 = vsub.f32 %v5146_v54, %v5147_v27 }
 0x469   : > { %4431 = vmatmul.f32.vlgmr.msrb.gmra.mxu0 %v14690_v49  ;;  %v5456_v18 = vsub.f32 %v5262_v58, %v5429_v23 }
 0x46a   : > { %4623 = vmatpush.msrb.mxu0 %v4548_v35  ;;  %v5002_v19 = vsub.f32 %v5000_v1, %v5001_v39  ;;  %v5149_v38 = vand.u32 4294901760, %v5148_v22  ;;  %v5714_v35 = vpop.permute.xlu1 %5713 }
 0x46b   : > { %v5457_v56 = vand.u32 4294901760, %v5456_v18  ;;  %v5718_v11 = vsel %vm5717_vm5, %v5714_v35, %v5716_v61 }
 0x46c   : > { %v5003_v0 = vand.u32 4294901760, %v5002_v19 }
 0x46d   : > { %v5458_v40 = vsub.f32 %v5456_v18, %v5457_v56 }
 0x46e   : > { %4407 = vmatmul.f32.vlgmr.msra.gmra.mxu3 %v14685_v42  ;;  %4479 = vmatmul.f32.vlgmr.msrb.gmra.mxu2 %v14685_v42 }
 0x46f   : > { %4597 = vmatpush.msra.mxu3 %v14678_v24  ;;  %4553 = vmatmul.f32.vlgmr.msra.gmra.mxu1 %v14685_v42  ;;  %v14760_v24 = vand.u32 4294901760, %v5266_v2  ;;  %v5459_v45 = vand.u32 4294901760, %v5458_v40 }
 0x470   : > { %4667 = vmatpush.msrb.mxu2 %v4666_v48  ;;  %4743 = vmatpush.msra.mxu1 %v4666_v48 }
 0x471   : > { %4527 = vmatmul.f32.vlgmr.msra.gmra.mxu0 %v4380_v36  ;;  %v14765_v12 = vsub.f32 %v5266_v2, %v14760_v24 }
 0x472   : > { %4720 = vmatpush.msra.mxu0 %v4693_v62  ;;  %v5722_v62 = vsel %vm329_vm0, %v12373_v25, 0  ;;  %v6170_v15 = vpop.permute.xlu1 %6169 }
 0x473   : > { %v14769_v21 = vand.u32 4294901760, %v14765_v12 }
 0x475   : > { %v5288_v9 = vsub.f32 %v14765_v12, %v14769_v21 }
 0x476   : > { %4501 = vmatmul.f32.vlgmr.msrb.gmra.mxu3 %v14685_v42  ;;  %4577 = vmatmul.f32.vlgmr.msra.gmra.mxu2 %v14690_v49 }
 0x477   : > { %4697 = vmatpush.msrb.mxu3 %v4696_v14  ;;  %4647 = vmatmul.f32.vlgmr.msrb.gmra.mxu1 %v14685_v42  ;;  %v5289_v34 = vand.u32 4294901760, %v5288_v9 }
 0x478   : > { %4769 = vmatpush.msra.mxu2 %v4694_v53  ;;  %4858 = vmatpush.msrb.mxu1 %v4857_v51  ;;  %v14813_v51 = vand.u32 4294901760, %v5718_v11 }
 0x479   : > { %4625 = vmatmul.f32.vlgmr.msrb.gmra.mxu0 %v14685_v42 }
 0x47a   : > { %4828 = vmatpush.msrb.mxu0 %v4827_v28 }
 0x47e   : > { %4601 = vmatmul.f32.vlgmr.msra.gmra.mxu3 %v14694_v6  ;;  %4673 = vmatmul.f32.vlgmr.msrb.gmra.mxu2 %v4380_v36 }
 0x47f   : > { %4791 = vmatpush.msra.mxu3 %v4666_v48  ;;  %4747 = vmatmul.f32.vlgmr.msra.gmra.mxu1 %v14694_v6  ;;  %v5719_v6 = vsel %vm5717_vm5, %v5712_v5, %v5714_v35 }
 0x480   : > { %4881 = vmatpush.msrb.mxu2 %v4854_v59  ;;  %4952 = vmatpush.msra.mxu1 %v4827_v28  ;;  %v14783_v37 = vand.u32 4294901760, %v5719_v6 }
 0x481   : > { %4723 = vmatmul.f32.vlgmr.msra.gmra.mxu0 %v14690_v49  ;;  %v5264_v49 = vsel %vm5261_vm4, %v5260_v52, %v5256_v60 }
 0x482   : > { %4930 = vmatpush.msra.mxu0 %v4855_v26  ;;  %v5575_v57 = vand.u32 4294901760, %v5264_v49  ;;  %v5766_v43 = vsub.f32 %v5719_v6, %v14783_v37  ;;  %v14796_v26 = vand.u32 4294901760, %v5722_v62 }
 0x484   : > { %v5602_v17 = vsub.f32 %v5264_v49, %v5575_v57  ;;  %v5767_v36 = vand.u32 4294901760, %v5766_v43  ;;  %v14806_v14 = vsub.f32 %v5722_v62, %v14796_v26 }
 0x486   : > { %4699 = vmatmul.f32.vlgmr.msrb.gmra.mxu3 %v14685_v42  ;;  %4771 = vmatmul.f32.vlgmr.msra.gmra.mxu2 %v14685_v42  ;;  %v5603_v47 = vand.u32 4294901760, %v5602_v17  ;;  %v14817_v30 = vand.u32 4294901760, %v14806_v14 }
 0x487   : > { %4904 = vmatpush.msrb.mxu3 %v4827_v28  ;;  %4860 = vmatmul.f32.vlgmr.msrb.gmra.mxu1 %v14721_v13  ;;  %v5768_v28 = vsub.f32 %v5766_v43, %v5767_v36 }
 0x488   : > { %4974 = vmatpush.msra.mxu2 %v4973_v29  ;;  %5050 = vmatpush.msrb.mxu1 %v4973_v29  ;;  %v5604_v48 = vsub.f32 %v5602_v17, %v5603_v47 }
 0x489   : > { %4834 = vmatmul.f32.vlgmr.msrb.gmra.mxu0 %v4833_v33  ;;  %v5769_v46 = vand.u32 4294901760, %v5768_v28 }
 0x48a   : > { %5027 = vmatpush.msrb.mxu0 %v5000_v1  ;;  %v5605_v59 = vand.u32 4294901760, %v5604_v48 }
 0x48e   : > { %4793 = vmatmul.f32.vlgmr.msra.gmra.mxu3 %v14685_v42  ;;  %4884 = vmatmul.f32.vlgmr.msrb.gmra.mxu2 %v14729_v4  ;;  %v5313_v42 = vand.u32 4294901760, %v5312_v3 }
 0x48f   : > { %5004 = vmatpush.msra.mxu3 %v5003_v0  ;;  %4954 = vmatmul.f32.vlgmr.msra.gmra.mxu1 %v14721_v13 }
 0x490   : > { %5076 = vmatpush.msrb.mxu2 %v5001_v39  ;;  %5150 = vmatpush.msra.mxu1 %v5149_v38 }
 0x491   : > { %4932 = vmatmul.f32.vlgmr.msra.gmra.mxu0 %v14721_v13 }
 0x492   : > { %5120 = vmatpush.msra.mxu0 %v5119_v8 }
 0x496   : > { %4908 = vmatmul.f32.vlgmr.msrb.gmra.mxu3 %v14735_v44  ;;  %4980 = vmatmul.f32.vlgmr.msra.gmra.mxu2 %v4833_v33 }
 0x497   : > { %5098 = vmatpush.msrb.mxu3 %v4973_v29  ;;  %5054 = vmatmul.f32.vlgmr.msrb.gmra.mxu1 %v14735_v44 }
 0x498   : > { %5173 = vmatpush.msra.mxu2 %v5146_v54  ;;  %5244 = vmatpush.msrb.mxu1 %v5119_v8 }
 0x499   : > { %5030 = vmatmul.f32.vlgmr.msrb.gmra.mxu0 %v14729_v4 }
 0x49a   : > { %5222 = vmatpush.msrb.mxu0 %v5147_v27 }
 0x49e   : > { %5006 = vmatmul.f32.vlgmr.msra.gmra.mxu3 %v14721_v13  ;;  %5078 = vmatmul.f32.vlgmr.msrb.gmra.mxu2 %v14721_v13 }
 0x49f   : > { %5196 = vmatpush.msra.mxu3 %v5119_v8  ;;  %5152 = vmatmul.f32.vlgmr.msra.gmra.mxu1 %v14721_v13  ;;  %v5744_v8 = vsub.f32 %v14806_v14, %v14817_v30 }
 0x4a0   : > { %5284 = vmatpush.msrb.mxu2 %v5283_v7  ;;  %5360 = vmatpush.msra.mxu1 %v5283_v7 }
 0x4a1   : > { %5126 = vmatmul.f32.vlgmr.msra.gmra.mxu0 %v4833_v33  ;;  %v14831_v33 = vand.u32 4294901760, %v5744_v8 }
 0x4a2   : > { %5337 = vmatpush.msra.mxu0 %v5310_v41 }
 0x4a6   : > { %5100 = vmatmul.f32.vlgmr.msrb.gmra.mxu3 %v14721_v13  ;;  %5176 = vmatmul.f32.vlgmr.msra.gmra.mxu2 %v14729_v4  ;;  %v14819_v4 = vand.u32 4294901760, %v5720_v50 }
 0x4a7   : > { %5314 = vmatpush.msrb.mxu3 %v5313_v42  ;;  %5246 = vmatmul.f32.vlgmr.msrb.gmra.mxu1 %v14721_v13 }
 0x4a8   : > { %5386 = vmatpush.msra.mxu2 %v5311_v55  ;;  %5460 = vmatpush.msrb.mxu1 %v5459_v45  ;;  %v14828_v1 = vsub.f32 %v5720_v50, %v14819_v4 }
 0x4a9   : > { %5224 = vmatmul.f32.vlgmr.msrb.gmra.mxu0 %v14721_v13 }
 0x4aa   : > { %5430 = vmatpush.msrb.mxu0 %v5429_v23  ;;  %v6059_v27 = vand.u32 4294901760, %v14828_v1 }
 0x4ac   : > { %v6060_v32 = vsub.f32 %v14828_v1, %v6059_v27 }
 0x4ae   : > { %5200 = vmatmul.f32.vlgmr.msra.gmra.mxu3 %v14735_v44  ;;  %5290 = vmatmul.f32.vlgmr.msrb.gmra.mxu2 %v5289_v34  ;;  %v5912_v44 = vsub.f32 %v5718_v11, %v14813_v51  ;;  %v6061_v58 = vand.u32 4294901760, %v6060_v32 }
 0x4af   : > { %5408 = vmatpush.msra.mxu3 %v5283_v7  ;;  %5364 = vmatmul.f32.vlgmr.msra.gmra.mxu1 %v14769_v21  ;;  %v14844_v7 = vpop.permute.xlu0 %6167 }
 0x4b0   : > { %5483 = vmatpush.msrb.mxu2 %v5456_v18  ;;  %5554 = vmatpush.msra.mxu1 %v5429_v23  ;;  %v14800_v10 = vpop.f32.mrf.mxu1  ;;  %v5913_v54 = vand.u32 4294901760, %v5912_v44  ;;  %v6175_v2 = vsel %vm6173_vm6, %v14844_v7, %v6170_v15 }
 0x4b1   : > { %5340 = vmatmul.f32.vlgmr.msra.gmra.mxu0 %v14765_v12 }
 0x4b2   : > { %5532 = vmatpush.msra.mxu0 %v5457_v56  ;;  %v5914_v19 = vsub.f32 %v5912_v44, %v5913_v54 }
 0x4b4   : > { %v14809_v13 = vpop.f32.mrf.mxu0  ;;  %v5915_v38 = vand.u32 4294901760, %v5914_v19 }
 0x4b6   : > { %5316 = vmatmul.f32.vlgmr.msrb.gmra.mxu3 %v14760_v24  ;;  %5388 = vmatmul.f32.vlgmr.msra.gmra.mxu2 %v14760_v24  ;;  %v3941_v53 = vpop.f32.mrf.mxu2 }
 0x4b7   : > { %5506 = vmatpush.msrb.mxu3 %v5429_v23  ;;  %5462 = vmatmul.f32.vlgmr.msrb.gmra.mxu1 %v14760_v24  ;;  %v14909_v32 = vpop.permute.xlu0 %6623 }
 0x4b8   : > { %5576 = vmatpush.msra.mxu2 %v5575_v57  ;;  %5652 = vmatpush.msrb.mxu1 %v5575_v57 }
 0x4b9   : > { %5436 = vmatmul.f32.vlgmr.msrb.gmra.mxu0 %v5289_v34 }
 0x4ba   : > { %5629 = vmatpush.msrb.mxu0 %v5602_v17 }
 0x4be   : > { %5410 = vmatmul.f32.vlgmr.msra.gmra.mxu3 %v14760_v24  ;;  %5486 = vmatmul.f32.vlgmr.msrb.gmra.mxu2 %v14765_v12  ;;  %v3967_v31 = vpop.f32.mrf.mxu3  ;;  %v3991_v29 = vpop.f32.mrf.mxu2 }
 0x4bf   : > { %5606 = vmatpush.msra.mxu3 %v5605_v59  ;;  %5556 = vmatmul.f32.vlgmr.msra.gmra.mxu1 %v14760_v24  ;;  %v3968_v63 = vadd.f32 %v3967_v31, %v3941_v53 }
 0x4c0   : > { %5678 = vmatpush.msrb.mxu2 %v5603_v47  ;;  %5770 = vmatpush.msra.mxu1 %v5769_v46 }
 0x4c1   : > { %5534 = vmatmul.f32.vlgmr.msra.gmra.mxu0 %v14760_v24  ;;  %v3992_v3 = vadd.f32 %v3991_v29, %v3968_v63 }
 0x4c2   : > { %5740 = vmatpush.msra.mxu0 %v14783_v37 }
 0x4c6   : > { %5510 = vmatmul.f32.vlgmr.msrb.gmra.mxu3 %v14769_v21  ;;  %5582 = vmatmul.f32.vlgmr.msra.gmra.mxu2 %v5289_v34  ;;  %v4015_v22 = vpop.f32.mrf.mxu3 }
 0x4c7   : > { %5700 = vmatpush.msrb.mxu3 %v5575_v57  ;;  %5656 = vmatmul.f32.vlgmr.msrb.gmra.mxu1 %v14769_v21  ;;  %v12374_v21 = vld [vmem:[%s15977_s4 + $0x28] sm:$0xff]  ;;  %v4016_v6 = vadd.f32 %v4015_v22, %v3992_v3 }
 0x4c8   : > { %5793 = vmatpush.msra.mxu2 %v5766_v43  ;;  %5864 = vmatpush.msrb.mxu1 %v14783_v37  ;;  %v6178_v5 = vsel %vm329_vm0, %v12374_v21, 0  ;;  %v12375_v21 = vld [vmem:[%s15977_s4 + $0x30] sm:$0xff] }
 0x4c9   : > { %5632 = vmatmul.f32.vlgmr.msrb.gmra.mxu0 %v14765_v12  ;;  %v14857_v12 = vand.u32 4294901760, %v6175_v2  ;;  %v4040_v48 = vadd.f32 %v14809_v13, %v4016_v6 }
 0x4ca   : > { %5842 = vmatpush.msrb.mxu0 %v5767_v36  ;;  %v14876_v36 = vand.u32 4294901760, %v6178_v5 }
 0x4cb   : > { %v4161_v20 = vpop.f32.mrf.mxu1  ;;  %v6222_v34 = vsub.f32 %v6175_v2, %v14857_v12  ;;  %v4062_v11 = vadd.f32 %v14800_v10, %v4040_v48 }
 0x4cc   : > { %v14884_v53 = vsub.f32 %v6178_v5, %v14876_v36 }
 0x4cd   : > { %v4137_v39 = vpop.f32.mrf.mxu0  ;;  %v6223_v25 = vand.u32 4294901760, %v6222_v34 }
 0x4ce   : > { %5608 = vmatmul.f32.vlgmr.msra.gmra.mxu3 %v14760_v24  ;;  %5680 = vmatmul.f32.vlgmr.msrb.gmra.mxu2 %v14760_v24  ;;  %v14895_v31 = vand.u32 4294901760, %v14884_v53 }
 0x4cf   : > { %5816 = vmatpush.msra.mxu3 %v14783_v37  ;;  %5772 = vmatmul.f32.vlgmr.msra.gmra.mxu1 %v14796_v26  ;;  %v6224_v46 = vsub.f32 %v6222_v34, %v6223_v25 }
 0x4d0   : > { %5886 = vmatpush.msrb.mxu2 %v14813_v51  ;;  %5962 = vmatpush.msra.mxu1 %v14813_v51 }
 0x4d1   : > { %v4087_v0 = vpop.f32.mrf.mxu2  ;;  %5746 = vmatmul.f32.vlgmr.msra.gmra.mxu0 %v14831_v33 }
 0x4d2   : > { %5939 = vmatpush.msra.mxu0 %v5912_v44  ;;  %v6225_v44 = vand.u32 4294901760, %v6224_v46 }
 0x4d4   : > { %v4259_v60 = vpop.f32.mrf.mxu1 }
 0x4d6   : > { %5702 = vmatmul.f32.vlgmr.msrb.gmra.mxu3 %v14760_v24  ;;  %v4233_v52 = vpop.f32.mrf.mxu0  ;;  %5796 = vmatmul.f32.vlgmr.msra.gmra.mxu2 %v14806_v14  ;;  %v14851_v24 = vpop.permute.xlu2 %6171 }
 0x4d7   : > { %5916 = vmatpush.msrb.mxu3 %v5915_v38  ;;  %5866 = vmatmul.f32.vlgmr.msrb.gmra.mxu1 %v14796_v26  ;;  %v6174_v55 = vsel %vm6173_vm6, %v6170_v15, %v14851_v24  ;;  %v4260_v9 = vadd.f32 %v4259_v60, %v4233_v52  ;;  %v6176_v19 = vsel %vm6173_vm6, %v14851_v24, %v14844_v7 }
 0x4d8   : > { %5988 = vmatpush.msra.mxu2 %v5913_v54  ;;  %6062 = vmatpush.msrb.mxu1 %v6061_v58  ;;  %v14863_v45 = vand.u32 4294901760, %v6174_v55  ;;  %v6200_v54 = vsub.f32 %v14884_v53, %v14895_v31  ;;  %v14919_v52 = vand.u32 4294901760, %v6176_v19 }
 0x4d9   : > { %v4113_v23 = vpop.f32.mrf.mxu3  ;;  %5844 = vmatmul.f32.vlgmr.msrb.gmra.mxu0 %v14796_v26  ;;  %v4185_v18 = vpop.f32.mrf.mxu2 }
 0x4da   : > { %v4114_v41 = vadd.f32 %v4113_v23, %v4087_v0  ;;  %6032 = vmatpush.msrb.mxu0 %v14819_v4  ;;  %v14874_v43 = vsub.f32 %v6174_v55, %v14863_v45  ;;  %v14913_v38 = vand.u32 4294901760, %v6200_v54  ;;  %v6514_v2 = vsub.f32 %v6176_v19, %v14919_v52 }
 0x4dc   : > { %v4138_v56 = vadd.f32 %v4137_v39, %v4114_v41  ;;  %v4353_v40 = vpop.f32.mrf.mxu1  ;;  %v6369_v62 = vand.u32 4294901760, %v14874_v43 }
 0x4de   : > { %v4162_v42 = vadd.f32 %v4161_v20, %v4138_v56  ;;  %5820 = vmatmul.f32.vlgmr.msra.gmra.mxu3 %v14817_v30  ;;  %v4331_v35 = vpop.f32.mrf.mxu0  ;;  %5892 = vmatmul.f32.vlgmr.msrb.gmra.mxu2 %v14831_v33  ;;  %v6515_v56 = vand.u32 4294901760, %v6514_v2  ;;  %v6628_v48 = vpop.permute.xlu2 %6627 }
 0x4df   : > { %6010 = vmatpush.msra.mxu3 %v14813_v51  ;;  %5966 = vmatmul.f32.vlgmr.msra.gmra.mxu1 %v14817_v30  ;;  %v6370_v51 = vsub.f32 %v14874_v43, %v6369_v62 }
 0x4e0   : > { %v4186_v49 = vadd.f32 %v4185_v18, %v4162_v42  ;;  %6085 = vmatpush.msrb.mxu2 %v14828_v1  ;;  %6156 = vmatpush.msra.mxu1 %v14819_v4  ;;  %v6516_v42 = vsub.f32 %v6514_v2, %v6515_v56 }
 0x4e1   : > { %v4207_v57 = vpop.f32.mrf.mxu3  ;;  %5942 = vmatmul.f32.vlgmr.msra.gmra.mxu0 %v14806_v14  ;;  %v4283_v17 = vpop.f32.mrf.mxu2  ;;  %v6371_v20 = vand.u32 4294901760, %v6370_v51 }
 0x4e2   : > { %v4208_v37 = vadd.f32 %v4207_v57, %v4186_v49  ;;  %6134 = vmatpush.msra.mxu0 %v6059_v27  ;;  %v4284_v47 = vadd.f32 %v4283_v17, %v4260_v9  ;;  %v6517_v57 = vand.u32 4294901760, %v6516_v42 }
 0x4e4   : > { %v4456_v28 = vpop.f32.mrf.mxu1 }
 0x4e6   : > { %5918 = vmatmul.f32.vlgmr.msrb.gmra.mxu3 %v14796_v26  ;;  %v4432_v59 = vpop.f32.mrf.mxu0  ;;  %5990 = vmatmul.f32.vlgmr.msra.gmra.mxu2 %v14796_v26 }
 0x4e7   : > { %6108 = vmatpush.msrb.mxu3 %v14819_v4  ;;  %6064 = vmatmul.f32.vlgmr.msrb.gmra.mxu1 %v14796_v26 }
 0x4e8   : > { %6196 = vmatpush.msra.mxu2 %v14857_v12  ;;  %6272 = vmatpush.msrb.mxu1 %v14857_v12 }
 0x4e9   : > { %v4307_v61 = vpop.f32.mrf.mxu3  ;;  %6038 = vmatmul.f32.vlgmr.msrb.gmra.mxu0 %v14831_v33  ;;  %v4382_v50 = vpop.f32.mrf.mxu2 }
 0x4ea   : > { %v4308_v13 = vadd.f32 %v4307_v61, %v4284_v47  ;;  %6249 = vmatpush.msrb.mxu0 %v6222_v34  ;;  %v4383_v4 = vadd.f32 %v4382_v50, %v4062_v11  ;;  %v14902_v33 = vpop.permute.xlu1 %6625  ;;  %v6634_v34 = vsel %vm329_vm0, %v12375_v21, 0  ;;  %v6632_v11 = vsel %vm6629_vm7, %v6628_v48, %v14909_v32 }
 0x4eb   : > { %v6631_v60 = vsel %vm6629_vm7, %v14909_v32, %v14902_v33 }
 0x4ec   : > { %v4332_v29 = vadd.f32 %v4331_v35, %v4308_v13  ;;  %v4554_v8 = vpop.f32.mrf.mxu1  ;;  %v14922_v7 = vand.u32 4294901760, %v6631_v60 }
 0x4ee   : > { %6012 = vmatmul.f32.vlgmr.msra.gmra.mxu3 %v14796_v26  ;;  %v4354_v1 = vadd.f32 %v4353_v40, %v4332_v29  ;;  %v4528_v10 = vpop.f32.mrf.mxu0  ;;  %6088 = vmatmul.f32.vlgmr.msrb.gmra.mxu2 %v14806_v14  ;;  %v14934_v24 = vsub.f32 %v6631_v60, %v14922_v7 }
 0x4ef   : > { %6226 = vmatpush.msra.mxu3 %v6225_v44  ;;  %v4529_v39 = vadd.f32 %v4528_v10, %v4208_v37  ;;  %6158 = vmatmul.f32.vlgmr.msra.gmra.mxu1 %v14796_v26  ;;  %v14975_v44 = vand.u32 4294901760, %v6632_v11 }
 0x4f0   : > { %6298 = vmatpush.msrb.mxu2 %v6223_v25  ;;  %6372 = vmatpush.msra.mxu1 %v6371_v20  ;;  %v6679_v3 = vand.u32 4294901760, %v14934_v24 }
 0x4f1   : > { %v4408_v27 = vpop.f32.mrf.mxu3  ;;  %v4555_v22 = vadd.f32 %v4554_v8, %v4529_v39  ;;  %6136 = vmatmul.f32.vlgmr.msra.gmra.mxu0 %v14796_v26  ;;  %v4480_v0 = vpop.f32.mrf.mxu2  ;;  %v14989_v19 = vsub.f32 %v6632_v11, %v14975_v44 }
 0x4f2   : > { %v4409_v14 = vadd.f32 %v4408_v27, %v4383_v4  ;;  %6342 = vmatpush.msra.mxu0 %v14863_v45  ;;  %v6680_v5 = vsub.f32 %v14934_v24, %v6679_v3 }
 0x4f3   : > { %v6971_v32 = vand.u32 4294901760, %v14989_v19 }
 0x4f4   : > { %v4433_v15 = vadd.f32 %v4432_v59, %v4409_v14  ;;  %v4648_v58 = vpop.f32.mrf.mxu1  ;;  %v6681_v47 = vand.u32 4294901760, %v6680_v5 }
 0x4f6   : > { %v4457_v26 = vadd.f32 %v4456_v28, %v4433_v15  ;;  %6112 = vmatmul.f32.vlgmr.msrb.gmra.mxu3 %v14817_v30  ;;  %6202 = vmatmul.f32.vlgmr.msra.gmra.mxu2 %v14913_v38  ;;  %v4626_v63 = vpop.f32.mrf.mxu0 }
 0x4f7   : > { %6320 = vmatpush.msrb.mxu3 %v14857_v12  ;;  %6276 = vmatmul.f32.vlgmr.msrb.gmra.mxu1 %v14895_v31 }
 0x4f8   : > { %v4481_v23 = vadd.f32 %v4480_v0, %v4457_v26  ;;  %6395 = vmatpush.msra.mxu2 %v14874_v43  ;;  %6466 = vmatpush.msrb.mxu1 %v14863_v45  ;;  %v14954_v43 = vand.u32 4294901760, %v6634_v34 }
 0x4f9   : > { %v4502_v41 = vpop.f32.mrf.mxu3  ;;  %6252 = vmatmul.f32.vlgmr.msrb.gmra.mxu0 %v14884_v53  ;;  %v4578_v18 = vpop.f32.mrf.mxu2 }
 0x4fa   : > { %v14931_v30 = vadd.f32 %v4502_v41, %v4481_v23  ;;  %6444 = vmatpush.msrb.mxu0 %v6369_v62  ;;  %v4579_v55 = vadd.f32 %v4578_v18, %v4555_v22  ;;  %v6630_v62 = vsel %vm6629_vm7, %v14902_v33, %v6628_v48  ;;  %v14963_v61 = vsub.f32 %v6634_v34, %v14954_v43 }
 0x4fb   : > { %v14969_v50 = vand.u32 4294901760, %v6630_v62 }
 0x4fc   : > { %v4748_v12 = vpop.f32.mrf.mxu1  ;;  %v14973_v29 = vand.u32 4294901760, %v14963_v61 }
 0x4fd   : > { %v6824_v20 = vsub.f32 %v6630_v62, %v14969_v50 }
 0x4fe   : > { %6228 = vmatmul.f32.vlgmr.msra.gmra.mxu3 %v14876_v36  ;;  %6300 = vmatmul.f32.vlgmr.msrb.gmra.mxu2 %v14876_v36  ;;  %v4724_v40 = vpop.f32.mrf.mxu0  ;;  %v6656_v27 = vsub.f32 %v14963_v61, %v14973_v29 }
 0x4ff   : > { %6418 = vmatpush.msra.mxu3 %v14863_v45  ;;  %6374 = vmatmul.f32.vlgmr.msra.gmra.mxu1 %v14876_v36  ;;  %v6825_v22 = vand.u32 4294901760, %v6824_v20 }
 0x500   : > { %6488 = vmatpush.msrb.mxu2 %v14919_v52  ;;  %6564 = vmatpush.msra.mxu1 %v14919_v52  ;;  %v14992_v0 = vand.u32 4294901760, %v6656_v27 }
 0x501   : > { %v4602_v9 = vpop.f32.mrf.mxu3  ;;  %6348 = vmatmul.f32.vlgmr.msra.gmra.mxu0 %v14913_v38  ;;  %v4674_v49 = vpop.f32.mrf.mxu2 }
 0x502   : > { %v4603_v35 = vadd.f32 %v4602_v9, %v4579_v55  ;;  %6541 = vmatpush.msra.mxu0 %v6514_v2  ;;  %v4675_v45 = vadd.f32 %v4674_v49, %v4354_v1  ;;  %v7082_v2 = vpop.permute.xlu1 %7081  ;;  %v15008_v55 = vpop.permute.xlu0 %7079 }
 0x504   : > { %v4627_v6 = vadd.f32 %v4626_v63, %v4603_v35  ;;  %v4861_v37 = vpop.f32.mrf.mxu1  ;;  %v12376_v35 = vld [vmem:[%s15977_s4 + $0x38] sm:$0xff] }
 0x506   : > { %v14951_v17 = vadd.f32 %v4648_v58, %v4627_v6  ;;  %6322 = vmatmul.f32.vlgmr.msrb.gmra.mxu3 %v14876_v36  ;;  %6398 = vmatmul.f32.vlgmr.msra.gmra.mxu2 %v14884_v53  ;;  %v4835_v25 = vpop.f32.mrf.mxu0  ;;  %v6972_v58 = vsub.f32 %v14989_v19, %v6971_v32 }
 0x507   : > { %6518 = vmatpush.msrb.mxu3 %v6517_v57  ;;  %6468 = vmatmul.f32.vlgmr.msrb.gmra.mxu1 %v14876_v36  ;;  %v4862_v8 = vadd.f32 %v4861_v37, %v4835_v25  ;;  %v7090_v57 = vsel %vm329_vm0, %v12376_v35, 0 }
 0x508   : > { %6590 = vmatpush.msra.mxu2 %v6515_v56  ;;  %6682 = vmatpush.msrb.mxu1 %v6681_v47  ;;  %v6973_v41 = vand.u32 4294901760, %v6972_v58 }
 0x509   : > { %v4700_v28 = vpop.f32.mrf.mxu3  ;;  %6446 = vmatmul.f32.vlgmr.msrb.gmra.mxu0 %v14876_v36  ;;  %v4772_v46 = vpop.f32.mrf.mxu2 }
 0x50a   : > { %v4701_v59 = vadd.f32 %v4700_v28, %v4675_v45  ;;  %6652 = vmatpush.msrb.mxu0 %v14922_v7 }
 0x50c   : > { %v4725_v13 = vadd.f32 %v4724_v40, %v4701_v59  ;;  %v4955_v51 = vpop.f32.mrf.mxu1  ;;  %v15015_v40 = vpop.permute.xlu2 %7083  ;;  %v15040_v59 = vand.u32 4294901760, %v7090_v57 }
 0x50e   : > { %v4749_v4 = vadd.f32 %v4748_v12, %v4725_v13  ;;  %6422 = vmatmul.f32.vlgmr.msra.gmra.mxu3 %v14895_v31  ;;  %6494 = vmatmul.f32.vlgmr.msrb.gmra.mxu2 %v14913_v38  ;;  %v4933_v1 = vpop.f32.mrf.mxu0  ;;  %v6826_v38 = vsub.f32 %v6824_v20, %v6825_v22 }
 0x50f   : > { %6612 = vmatpush.msra.mxu3 %v14919_v52  ;;  %6568 = vmatmul.f32.vlgmr.msra.gmra.mxu1 %v14895_v31 }
 0x510   : > { %v4773_v10 = vadd.f32 %v4772_v46, %v4749_v4  ;;  %6705 = vmatpush.msrb.mxu2 %v14934_v24  ;;  %6776 = vmatpush.msra.mxu1 %v14922_v7  ;;  %v6827_v63 = vand.u32 4294901760, %v6826_v38  ;;  %v15050_v4 = vsub.f32 %v7090_v57, %v15040_v59 }
 0x511   : > { %v4794_v54 = vpop.f32.mrf.mxu3  ;;  %6544 = vmatmul.f32.vlgmr.msra.gmra.mxu0 %v14884_v53  ;;  %v4885_v33 = vpop.f32.mrf.mxu2 }
 0x512   : > { %v14984_v39 = vadd.f32 %v4794_v54, %v4773_v10  ;;  %6754 = vmatpush.msra.mxu0 %v6679_v3  ;;  %v4886_v31 = vadd.f32 %v4885_v33, %v4862_v8 }
 0x514   : > { %v5055_v14 = vpop.f32.mrf.mxu1 }
 0x516   : > { %6520 = vmatmul.f32.vlgmr.msrb.gmra.mxu3 %v14876_v36  ;;  %6592 = vmatmul.f32.vlgmr.msra.gmra.mxu2 %v14876_v36  ;;  %v5031_v53 = vpop.f32.mrf.mxu0 }
 0x517   : > { %6728 = vmatpush.msrb.mxu3 %v14922_v7  ;;  %6684 = vmatmul.f32.vlgmr.msrb.gmra.mxu1 %v14954_v43 }
 0x518   : > { %6798 = vmatpush.msra.mxu2 %v14969_v50  ;;  %6874 = vmatpush.msrb.mxu1 %v14969_v50 }
 0x519   : > { %v4909_v60 = vpop.f32.mrf.mxu3  ;;  %6658 = vmatmul.f32.vlgmr.msrb.gmra.mxu0 %v14992_v0  ;;  %v4981_v52 = vpop.f32.mrf.mxu2 }
 0x51a   : > { %v4910_v15 = vadd.f32 %v4909_v60, %v4886_v31  ;;  %6851 = vmatpush.msrb.mxu0 %v6824_v20 }
 0x51c   : > { %v4934_v26 = vadd.f32 %v4933_v1, %v4910_v15  ;;  %v5153_v23 = vpop.f32.mrf.mxu1  ;;  %v15075_v15 = vpop.permute.xlu0 %7535 }
 0x51e   : > { %v4956_v7 = vadd.f32 %v4955_v51, %v4934_v26  ;;  %6614 = vmatmul.f32.vlgmr.msra.gmra.mxu3 %v14876_v36  ;;  %6708 = vmatmul.f32.vlgmr.msrb.gmra.mxu2 %v14963_v61  ;;  %v5127_v18 = vpop.f32.mrf.mxu0  ;;  %v7087_v36 = vsel %vm7085_vm8, %v15008_v55, %v7082_v2 }
 0x51f   : > { %6828 = vmatpush.msra.mxu3 %v6827_v63  ;;  %6778 = vmatmul.f32.vlgmr.msra.gmra.mxu1 %v14954_v43  ;;  %v15021_v42 = vand.u32 4294901760, %v7087_v36  ;;  %v5154_v45 = vadd.f32 %v5153_v23, %v5127_v18 }
 0x520   : > { %v15005_v24 = vadd.f32 %v4956_v7, %v14931_v30  ;;  %6900 = vmatpush.msrb.mxu2 %v6825_v22  ;;  %6974 = vmatpush.msra.mxu1 %v6973_v41  ;;  %v7086_v30 = vsel %vm7085_vm8, %v7082_v2, %v15015_v40 }
 0x521   : > { %v5007_v56 = vpop.f32.mrf.mxu3  ;;  %6756 = vmatmul.f32.vlgmr.msra.gmra.mxu0 %v14954_v43  ;;  %v5079_v3 = vpop.f32.mrf.mxu2  ;;  %v15027_v5 = vand.u32 4294901760, %v7086_v30  ;;  %v7134_v37 = vsub.f32 %v7087_v36, %v15021_v42 }
 0x522   : > { %v5008_v12 = vadd.f32 %v5007_v56, %v4981_v52  ;;  %6944 = vmatpush.msra.mxu0 %v14975_v44 }
 0x523   : > { %v15038_v28 = vsub.f32 %v7086_v30, %v15027_v5  ;;  %v7135_v11 = vand.u32 4294901760, %v7134_v37 }
 0x524   : > { %v5032_v21 = vadd.f32 %v5031_v53, %v5008_v12  ;;  %v5247_v9 = vpop.f32.mrf.mxu1 }
 0x526   : > { %v5056_v49 = vadd.f32 %v5055_v14, %v5032_v21  ;;  %6732 = vmatmul.f32.vlgmr.msrb.gmra.mxu3 %v14973_v29  ;;  %6804 = vmatmul.f32.vlgmr.msra.gmra.mxu2 %v14992_v0  ;;  %v5225_v34 = vpop.f32.mrf.mxu0 }
 0x527   : > { %6922 = vmatpush.msrb.mxu3 %v14969_v50  ;;  %6878 = vmatmul.f32.vlgmr.msrb.gmra.mxu1 %v14973_v29  ;;  %v7281_v50 = vand.u32 4294901760, %v15038_v28 }
 0x528   : > { %v5080_v6 = vadd.f32 %v5079_v3, %v5056_v49  ;;  %6997 = vmatpush.msra.mxu2 %v14989_v19  ;;  %7068 = vmatpush.msrb.mxu1 %v14975_v44 }
 0x529   : > { %v5101_v47 = vpop.f32.mrf.mxu3  ;;  %6854 = vmatmul.f32.vlgmr.msrb.gmra.mxu0 %v14963_v61  ;;  %v5177_v48 = vpop.f32.mrf.mxu2  ;;  %v7282_v20 = vsub.f32 %v15038_v28, %v7281_v50 }
 0x52a   : > { %v5102_v25 = vadd.f32 %v5101_v47, %v5080_v6  ;;  %7046 = vmatpush.msrb.mxu0 %v6971_v32  ;;  %v5178_v62 = vadd.f32 %v5177_v48, %v5154_v45  ;;  %v15068_v32 = vpop.permute.xlu1 %7537 }
 0x52b   : > { %v7283_v31 = vand.u32 4294901760, %v7282_v20  ;;  %v7543_v52 = vsel %vm7541_vm9, %v15075_v15, %v15068_v32 }
 0x52c   : > { %v15043_v46 = vadd.f32 %v5102_v25, %v14951_v17  ;;  %v5365_v13 = vpop.f32.mrf.mxu1  ;;  %v7136_v17 = vsub.f32 %v7134_v37, %v7135_v11  ;;  %v15088_v23 = vand.u32 4294901760, %v7543_v52 }
 0x52e   : > { %6830 = vmatmul.f32.vlgmr.msra.gmra.mxu3 %v14954_v43  ;;  %6902 = vmatmul.f32.vlgmr.msrb.gmra.mxu2 %v14954_v43  ;;  %v5341_v51 = vpop.f32.mrf.mxu0  ;;  %v7137_v33 = vand.u32 4294901760, %v7136_v17  ;;  %v7590_v36 = vsub.f32 %v7543_v52, %v15088_v23 }
 0x52f   : > { %7020 = vmatpush.msra.mxu3 %v14975_v44  ;;  %6976 = vmatmul.f32.vlgmr.msra.gmra.mxu1 %v14954_v43  ;;  %v15058_v44 = vand.u32 4294901760, %v15050_v4 }
 0x530   : > { %7108 = vmatpush.msrb.mxu2 %v15021_v42  ;;  %7184 = vmatpush.msra.mxu1 %v15021_v42  ;;  %v7591_v21 = vand.u32 4294901760, %v7590_v36 }
 0x531   : > { %v5201_v8 = vpop.f32.mrf.mxu3  ;;  %6950 = vmatmul.f32.vlgmr.msra.gmra.mxu0 %v14992_v0  ;;  %v5291_v10 = vpop.f32.mrf.mxu2  ;;  %v7112_v22 = vsub.f32 %v15050_v4, %v15058_v44 }
 0x532   : > { %v5202_v1 = vadd.f32 %v5201_v8, %v5178_v62  ;;  %7161 = vmatpush.msra.mxu0 %v7134_v37 }
 0x534   : > { %v5226_v54 = vadd.f32 %v5225_v34, %v5202_v1  ;;  %v5463_v27 = vpop.f32.mrf.mxu1 }
 0x536   : > { %v5248_v19 = vadd.f32 %v5247_v9, %v5226_v54  ;;  %6924 = vmatmul.f32.vlgmr.msrb.gmra.mxu3 %v14954_v43  ;;  %7000 = vmatmul.f32.vlgmr.msra.gmra.mxu2 %v14963_v61  ;;  %v5437_v14 = vpop.f32.mrf.mxu0  ;;  %v7088_v61 = vsel %vm7085_vm8, %v15015_v40, %v15008_v55 }
 0x537   : > { %7138 = vmatpush.msrb.mxu3 %v7137_v33  ;;  %7070 = vmatmul.f32.vlgmr.msrb.gmra.mxu1 %v14954_v43  ;;  %v15085_v26 = vand.u32 4294901760, %v7088_v61  ;;  %v5464_v7 = vadd.f32 %v5463_v27, %v5437_v14 }
 0x538   : > { %v15065_v0 = vadd.f32 %v5248_v19, %v14984_v39  ;;  %7210 = vmatpush.msra.mxu2 %v7135_v11  ;;  %7284 = vmatpush.msrb.mxu1 %v7283_v31  ;;  %v15079_v39 = vand.u32 4294901760, %v7112_v22  ;;  %v7540_v11 = vpop.permute.xlu2 %7539 }
 0x539   : > { %v5317_v53 = vpop.f32.mrf.mxu3  ;;  %7048 = vmatmul.f32.vlgmr.msrb.gmra.mxu0 %v14954_v43  ;;  %v5389_v60 = vpop.f32.mrf.mxu2  ;;  %v7426_v18 = vsub.f32 %v7088_v61, %v15085_v26 }
 0x53a   : > { %16093 = vst [vmem:[#allocation12_spill] sm:$0xff] %v15065_v0  ;;  %v5318_v38 = vadd.f32 %v5317_v53, %v5291_v10  ;;  %7254 = vmatpush.msrb.mxu0 %v15027_v5 }
 0x53b   : > { %v7427_v40 = vand.u32 4294901760, %v7426_v18 }
 0x53c   : > { %v5342_v58 = vadd.f32 %v5341_v51, %v5318_v38  ;;  %v5557_v63 = vpop.f32.mrf.mxu1 }
 0x53d   : > { %v7428_v9 = vsub.f32 %v7426_v18, %v7427_v40 }
 0x53e   : > { %v5366_v43 = vadd.f32 %v5365_v13, %v5342_v58  ;;  %7024 = vmatmul.f32.vlgmr.msra.gmra.mxu3 %v14973_v29  ;;  %7114 = vmatmul.f32.vlgmr.msrb.gmra.mxu2 %v15079_v39  ;;  %v5535_v2 = vpop.f32.mrf.mxu0 }
 0x53f   : > { %7232 = vmatpush.msra.mxu3 %v15021_v42  ;;  %7188 = vmatmul.f32.vlgmr.msra.gmra.mxu1 %v15058_v44  ;;  %v7429_v57 = vand.u32 4294901760, %v7428_v9 }
 0x540   : > { %v5390_v41 = vadd.f32 %v5389_v60, %v5366_v43  ;;  %7307 = vmatpush.msrb.mxu2 %v15038_v28  ;;  %7378 = vmatpush.msra.mxu1 %v15027_v5 }
 0x541   : > { %v5411_v55 = vpop.f32.mrf.mxu3  ;;  %7164 = vmatmul.f32.vlgmr.msra.gmra.mxu0 %v15050_v4  ;;  %v5487_v56 = vpop.f32.mrf.mxu2 }
 0x542   : > { %v5412_v29 = vadd.f32 %v5411_v55, %v5390_v41  ;;  %7356 = vmatpush.msra.mxu0 %v7281_v50  ;;  %v5488_v12 = vadd.f32 %v5487_v56, %v5464_v7  ;;  %v7542_v50 = vsel %vm7541_vm9, %v15068_v32, %v7540_v11 }
 0x543   : > { %v7709_v8 = vand.u32 4294901760, %v7542_v50 }
 0x544   : > { %v15099_v3 = vadd.f32 %v5412_v29, %v15005_v24  ;;  %v15101_v30 = vpop.f32.mrf.mxu1  ;;  %v12377_v24 = vld [vmem:[%s15977_s4 + $0x40] sm:$0xff] }
 0x545   : > { %v7546_v34 = vsel %vm329_vm0, %v12377_v24, 0  ;;  %v7736_v33 = vsub.f32 %v7542_v50, %v7709_v8 }
 0x546   : > { %16094 = vst [vmem:[#allocation2_spill] sm:$0xff] %v15099_v3  ;;  %7140 = vmatmul.f32.vlgmr.msrb.gmra.mxu3 %v15040_v59  ;;  %7212 = vmatmul.f32.vlgmr.msra.gmra.mxu2 %v15040_v59  ;;  %v15106_v42 = vpop.f32.mrf.mxu0  ;;  %v15121_v25 = vand.u32 4294901760, %v7546_v34 }
 0x547   : > { %7330 = vmatpush.msrb.mxu3 %v15027_v5  ;;  %7286 = vmatmul.f32.vlgmr.msrb.gmra.mxu1 %v15040_v59  ;;  %v7592_v5 = vsub.f32 %v7590_v36, %v7591_v21  ;;  %v7737_v14 = vand.u32 4294901760, %v7736_v33 }
 0x548   : > { %7400 = vmatpush.msra.mxu2 %v15085_v26  ;;  %7476 = vmatpush.msrb.mxu1 %v15085_v26  ;;  %v15139_v17 = vsub.f32 %v7546_v34, %v15121_v25 }
 0x549   : > { %v5511_v35 = vpop.f32.mrf.mxu3  ;;  %7260 = vmatmul.f32.vlgmr.msrb.gmra.mxu0 %v15079_v39  ;;  %v15115_v45 = vpop.f32.mrf.mxu2  ;;  %v7593_v48 = vand.u32 4294901760, %v7592_v5 }
 0x54a   : > { %v5512_v49 = vadd.f32 %v5511_v35, %v5488_v12  ;;  %7453 = vmatpush.msrb.mxu0 %v7426_v18  ;;  %v15149_v10 = vand.u32 4294901760, %v15139_v17 }
 0x54c   : > { %v5536_v6 = vadd.f32 %v5535_v2, %v5512_v49  ;;  %v15118_v37 = vpop.f32.mrf.mxu1  ;;  %v7568_v31 = vsub.f32 %v15139_v17, %v15149_v10 }
 0x54e   : > { %v5558_v47 = vadd.f32 %v5557_v63, %v5536_v6  ;;  %7234 = vmatmul.f32.vlgmr.msra.gmra.mxu3 %v15040_v59  ;;  %7310 = vmatmul.f32.vlgmr.msrb.gmra.mxu2 %v15050_v4  ;;  %v15124_v28 = vpop.f32.mrf.mxu0  ;;  %v15186_v63 = vld [vmem:[%s15979_s6] sm:$0xff] }
 0x54f   : > { %7430 = vmatpush.msra.mxu3 %v7429_v57  ;;  %7380 = vmatmul.f32.vlgmr.msra.gmra.mxu1 %v15040_v59  ;;  %16098 = vst [vmem:[#allocation19_spill] sm:$0xff] %v15186_v63 }
 0x550   : > { %v15127_v62 = vadd.f32 %v5558_v47, %v15043_v46  ;;  %7502 = vmatpush.msrb.mxu2 %v7427_v40  ;;  %7594 = vmatpush.msra.mxu1 %v7593_v48  ;;  %v7544_v46 = vsel %vm7541_vm9, %v7540_v11, %v15075_v15 }
 0x551   : > { %v15130_v13 = vpop.f32.mrf.mxu3  ;;  %7358 = vmatmul.f32.vlgmr.msra.gmra.mxu0 %v15040_v59  ;;  %v15136_v51 = vpop.f32.mrf.mxu2  ;;  %v7855_v20 = vand.u32 4294901760, %v7544_v46 }
 0x552   : > { %16095 = vst [vmem:[#allocation22_spill] sm:$0xff] %v15127_v62  ;;  %7564 = vmatpush.msra.mxu0 %v15088_v23 }
 0x553   : > { %v7882_v22 = vsub.f32 %v7544_v46, %v7855_v20 }
 0x554   : > { %v15145_v1 = vpop.f32.mrf.mxu1 }
 0x555   : > { %16096 = vst [vmem:[#allocation10_spill] sm:$0xff] %v15145_v1  ;;  %v7883_v53 = vand.u32 4294901760, %v7882_v22 }
 0x556   : > { %7334 = vmatmul.f32.vlgmr.msrb.gmra.mxu3 %v15058_v44  ;;  %7406 = vmatmul.f32.vlgmr.msra.gmra.mxu2 %v15079_v39  ;;  %v15153_v54 = vpop.f32.mrf.mxu0 }
 0x557   : > { %7524 = vmatpush.msrb.mxu3 %v15085_v26  ;;  %7480 = vmatmul.f32.vlgmr.msrb.gmra.mxu1 %v15058_v44  ;;  %v7569_v44 = vand.u32 4294901760, %v7568_v31  ;;  %v7884_v15 = vsub.f32 %v7882_v22, %v7883_v53 }
 0x558   : > { %7617 = vmatpush.msra.mxu2 %v7590_v36  ;;  %7688 = vmatpush.msrb.mxu1 %v15088_v23 }
 0x559   : > { %v15157_v27 = vpop.f32.mrf.mxu3  ;;  %7456 = vmatmul.f32.vlgmr.msrb.gmra.mxu0 %v15050_v4  ;;  %v15160_v19 = vpop.f32.mrf.mxu2  ;;  %v7738_v4 = vsub.f32 %v7736_v33, %v7737_v14  ;;  %v7885_v58 = vand.u32 4294901760, %v7884_v15 }
 0x55a   : > { %16097 = vst [vmem:[#allocation3_spill] sm:$0xff] %v15157_v27  ;;  %7666 = vmatpush.msrb.mxu0 %v7591_v21 }
 0x55b   : > { %v7739_v39 = vand.u32 4294901760, %v7738_v4 }
 0x55c   : > { %v15164_v32 = vpop.f32.mrf.mxu1 }
 0x55e   : > { %7432 = vmatmul.f32.vlgmr.msra.gmra.mxu3 %v15040_v59  ;;  %7504 = vmatmul.f32.vlgmr.msrb.gmra.mxu2 %v15040_v59  ;;  %v15169_v61 = vpop.f32.mrf.mxu0 }
 0x55f   : > { %7640 = vmatpush.msra.mxu3 %v15088_v23  ;;  %7596 = vmatmul.f32.vlgmr.msra.gmra.mxu1 %v15121_v25  ;;  %v12444_v23 = vmov 0  }
 0x560   : > { %7710 = vmatpush.msrb.mxu2 %v7709_v8  ;;  %7786 = vmatpush.msra.mxu1 %v7709_v8 }
 0x561   : > { %v15172_v38 = vpop.f32.mrf.mxu3  ;;  %7570 = vmatmul.f32.vlgmr.msra.gmra.mxu0 %v7569_v44  ;;  %v15174_v60 = vpop.f32.mrf.mxu2  ;;  %12416 = vset.pattern.permute.xlu0 %v12444_v23 }
 0x562   : > { %7763 = vmatpush.msra.mxu0 %v7736_v33  ;;  %7992 = vperm.xlu0 %12416, %v15186_v63  }
 0x564   : > { %v15176_v52 = vpop.f32.mrf.mxu1 }
 0x566   : > { %7526 = vmatmul.f32.vlgmr.msrb.gmra.mxu3 %v15040_v59  ;;  %7620 = vmatmul.f32.vlgmr.msra.gmra.mxu2 %v15139_v17  ;;  %v15180_v26 = vpop.f32.mrf.mxu0 }
 0x567   : > { %7740 = vmatpush.msrb.mxu3 %v7739_v39  ;;  %7690 = vmatmul.f32.vlgmr.msrb.gmra.mxu1 %v15121_v25 }
 0x568   : > { %7812 = vmatpush.msra.mxu2 %v7737_v14  ;;  %7886 = vmatpush.msrb.mxu1 %v7885_v58 }
 0x569   : > { %v15188_v43 = vpop.f32.mrf.mxu3  ;;  %7668 = vmatmul.f32.vlgmr.msrb.gmra.mxu0 %v15121_v25  ;;  %v15191_v59 = vpop.f32.mrf.mxu2 }
 0x56a   : > { %7856 = vmatpush.msrb.mxu0 %v7855_v20 }
 0x56c   : > { %v15194_v7 = vpop.f32.mrf.mxu1 }
 0x56d   : > { %16099 = vst [vmem:[#allocation11_spill] sm:$0xff] %v15194_v7 }
 0x56e   : > { %7644 = vmatmul.f32.vlgmr.msra.gmra.mxu3 %v15149_v10  ;;  %7716 = vmatmul.f32.vlgmr.msrb.gmra.mxu2 %v7569_v44  ;;  %v15197_v2 = vpop.f32.mrf.mxu0 }
 0x56f   : > { %7834 = vmatpush.msra.mxu3 %v7709_v8  ;;  %16100 = vst [vmem:[#allocation20_spill] sm:$0xff] %v15197_v2  ;;  %7790 = vmatmul.f32.vlgmr.msra.gmra.mxu1 %v15149_v10 }
 0x570   : > { %7909 = vmatpush.msrb.mxu2 %v7882_v22  ;;  %7980 = vmatpush.msra.mxu1 %v7855_v20 }
 0x571   : > { %v15200_v41 = vpop.f32.mrf.mxu3  ;;  %7766 = vmatmul.f32.vlgmr.msra.gmra.mxu0 %v15139_v17  ;;  %v15203_v18 = vpop.f32.mrf.mxu2 }
 0x572   : > { %7958 = vmatpush.msra.mxu0 %v7883_v53 }
 0x574   : > { %v15205_v55 = vpop.f32.mrf.mxu1 }
 0x576   : > { %7742 = vmatmul.f32.vlgmr.msrb.gmra.mxu3 %v15121_v25  ;;  %7814 = vmatmul.f32.vlgmr.msra.gmra.mxu2 %v15121_v25  ;;  %v15209_v29 = vpop.f32.mrf.mxu0 }
 0x577   : > { %7932 = vmatpush.msrb.mxu3 %v7855_v20  ;;  %7888 = vmatmul.f32.vlgmr.msrb.gmra.mxu1 %v15121_v25 }
 0x579   : > { %v15212_v56 = vpop.f32.mrf.mxu3  ;;  %v15214_v36 = vpop.f32.mrf.mxu2  ;;  %7862 = vmatmul.f32.vlgmr.msrb.gmra.mxu0 %v7569_v44 }
 0x57c   : > { %v15216_v12 = vpop.f32.mrf.mxu1 }
 0x57e   : > { %7836 = vmatmul.f32.vlgmr.msra.gmra.mxu3 %v15121_v25  ;;  %7912 = vmatmul.f32.vlgmr.msrb.gmra.mxu2 %v15139_v17  ;;  %v15220_v40 = vpop.f32.mrf.mxu0 }
 0x57f   : > { %7982 = vmatmul.f32.vlgmr.msra.gmra.mxu1 %v15121_v25 }
 0x581   : > { %v6229_v21 = vpop.f32.mrf.mxu3  ;;  %v15223_v24 = vpop.f32.mrf.mxu2  ;;  %7960 = vmatmul.f32.vlgmr.msra.gmra.mxu0 %v15121_v25 }
 0x584   : > { %v15226_v9 = vpop.f32.mrf.mxu1 }
 0x585   : > { %16101 = vst [vmem:[#allocation7_spill] sm:$0xff] %v15226_v9 }
 0x586   : > { %7936 = vmatmul.f32.vlgmr.msrb.gmra.mxu3 %v15149_v10  ;;  %v15229_v35 = vpop.f32.mrf.mxu0 }
 0x589   : > { %v15231_v49 = vpop.f32.mrf.mxu3  ;;  %v15233_v5 = vpop.f32.mrf.mxu2 }
 0x58a   : > { %16102 = vst [vmem:[#allocation6_spill] sm:$0xff] %v15231_v49 }
 0x58c   : > { %v15235_v34 = vpop.f32.mrf.mxu1 }
 0x58d   : > { %16103 = vst [vmem:[#allocation16_spill] sm:$0xff] %v15235_v34 }
 0x58e   : > { %v15237_v6 = vpop.f32.mrf.mxu0 }
 0x591   : > { %v15239_v57 = vpop.f32.mrf.mxu3  ;;  %v15241_v47 = vpop.f32.mrf.mxu2 }
 0x594   : > { %v6685_v48 = vpop.f32.mrf.mxu1 }
 0x596   : > { %v6659_v25 = vpop.f32.mrf.mxu0 }
 0x599   : > { %v15243_v11 = vpop.f32.mrf.mxu3  ;;  %v15245_v50 = vpop.f32.mrf.mxu2 }
 0x59a   : > { %16104 = vst [vmem:[#allocation15_spill] sm:$0xff] %v15245_v50 }
 0x59c   : > { %v15247_v17 = vpop.f32.mrf.mxu1 }
 0x59d   : > { %16105 = vst [vmem:[#allocation4_spill] sm:$0xff] %v15247_v17 }
 0x59e   : > { %v15249_v46 = vpop.f32.mrf.mxu0 }
 0x59f   : > { %16106 = vst [vmem:[#allocation26_spill] sm:$0xff] %v15249_v46 }
 0x5a1   : > { %v15251_v8 = vpop.f32.mrf.mxu3  ;;  %v15253_v10 = vpop.f32.mrf.mxu2 }
 0x5a2   : > { %16107 = vst [vmem:[#allocation25_spill] sm:$0xff] %v15251_v8 }
 0x5a4   : > { %v15255_v20 = vpop.f32.mrf.mxu1 }
 0x5a6   : > { %v6855_v33 = vpop.f32.mrf.mxu0 }
 0x5a9   : > { %v15257_v31 = vpop.f32.mrf.mxu3  ;;  %v6805_v22 = vpop.f32.mrf.mxu2 }
 0x5ac   : > { %v15259_v14 = vpop.f32.mrf.mxu1 }
 0x5ae   : > { %v15261_v44 = vpop.f32.mrf.mxu0 }
 0x5b1   : > { %v6831_v53 = vpop.f32.mrf.mxu3  ;;  %v15263_v4 = vpop.f32.mrf.mxu2 }
 0x5b2   : > { %16108 = vst [vmem:[#allocation13_spill] sm:$0xff] %v15263_v4  ;;  %v6832_v4 = vadd.f32 %v6831_v53, %v6805_v22 }
 0x5b4   : > { %v15265_v15 = vpop.f32.mrf.mxu1 }
 0x5b5   : > { %16109 = vst [vmem:[#allocation5_spill] sm:$0xff] %v15265_v15 }
 0x5b6   : > { %v15267_v39 = vpop.f32.mrf.mxu0 }
 0x5b7   : > { %16110 = vst [vmem:[#allocation21_spill] sm:$0xff] %v15267_v39 }
 0x5b9   : > { %v15269_v58 = vpop.f32.mrf.mxu3  ;;  %v15271_v23 = vpop.f32.mrf.mxu2 }
 0x5ba   : > { %16111 = vst [vmem:[#allocation9_spill] sm:$0xff] %v15269_v58 }
 0x5bb   : > { %16112 = vst [vmem:[#allocation14_spill] sm:$0xff] %v15271_v23 }
 0x5bc   : > { %v15273_v16 = vpop.f32.mrf.mxu1 }
 0x5bd   : > { %16113 = vst [vmem:[#allocation18_spill] sm:$0xff] %v15273_v16 }
 0x5be   : > { %v7165_v63 = vpop.f32.mrf.mxu0 }
 0x5c1   : > { %v15275_v8 = vpop.f32.mrf.mxu3  ;;  %v7115_v0 = vpop.f32.mrf.mxu2 }
 0x5c2   : > { %16114 = vst [vmem:[#allocation24_spill] sm:$0xff] %v15275_v8 }
 0x5c4   : > { %v7287_v7 = vpop.f32.mrf.mxu1 }
 0x5c6   : > { %v7261_v17 = vpop.f32.mrf.mxu0 }
 0x5c9   : > { %v7141_v50 = vpop.f32.mrf.mxu3  ;;  %v15277_v3 = vpop.f32.mrf.mxu2 }
 0x5ca   : > { %16115 = vst [vmem:[#allocation8_spill] sm:$0xff] %v15277_v3  ;;  %v5920_v3 = vadd.f32 %v15188_v43, %v15174_v60 }
 0x5cc   : > { %v15281_v15 = vpop.f32.mrf.mxu1  ;;  %v5944_v1 = vadd.f32 %v15169_v61, %v5920_v3  ;;  %v6856_v61 = vadd.f32 %v6855_v33, %v6832_v4  ;;  %v16128_v33 = vld [vmem:[#allocation7_spill] sm:$0xff] }
 0x5cd   : > { %16117 = vst [vmem:[#allocation17_spill] sm:$0xff] %v15281_v15 }
 0x5ce   : > { %v15279_v27 = vpop.f32.mrf.mxu0 }
 0x5cf   : > { %16116 = vst [vmem:[#allocation28_spill] sm:$0xff] %v15279_v27 }
 0x5d1   : > { %v15283_v39 = vpop.f32.mrf.mxu3  ;;  %v7311_v58 = vpop.f32.mrf.mxu2 }
 0x5d2   : > { %16118 = vst [vmem:[#allocation27_spill] sm:$0xff] %v15283_v39  ;;  %v5774_v39 = vadd.f32 %v15118_v37, %v15124_v28  ;;  %v5968_v28 = vadd.f32 %v15164_v32, %v5944_v1 }
 0x5d4   : > { %v15287_v62 = vpop.f32.mrf.mxu1  ;;  %v5798_v60 = vadd.f32 %v15160_v19, %v5774_v39  ;;  %v16134_v39 = vld [vmem:[#allocation22_spill] sm:$0xff] }
 0x5d5   : > { %16120 = vst [vmem:[#allocation30_spill] sm:$0xff] %v15287_v62  ;;  %v5610_v62 = vadd.f32 %v15130_v13, %v15115_v45  ;;  %v6686_v13 = vadd.f32 %v6685_v48, %v6659_v25 }
 0x5d6   : > { %v15285_v49 = vpop.f32.mrf.mxu0  ;;  %v5822_v37 = vadd.f32 %v15172_v38, %v5798_v60  ;;  %v5992_v38 = vadd.f32 %v15191_v59, %v5968_v28  ;;  %v16137_v28 = vld [vmem:[#allocation9_spill] sm:$0xff] }
 0x5d7   : > { %16119 = vst [vmem:[#allocation29_spill] sm:$0xff] %v15285_v49 }
 0x5d8   : > { %v5846_v32 = vadd.f32 %v15153_v54, %v5822_v37 }
 0x5d9   : > { %v7335_v2 = vpop.f32.mrf.mxu3  ;;  %v7407_v23 = vpop.f32.mrf.mxu2 }
 0x5dc   : > { %v7597_v9 = vpop.f32.mrf.mxu1 }
 0x5de   : > { %v7571_v46 = vpop.f32.mrf.mxu0 }
 0x5e1   : > { %v7433_v8 = vpop.f32.mrf.mxu3  ;;  %v15289_v34 = vpop.f32.mrf.mxu2 }
 0x5e2   : > { %16121 = vst [vmem:[#allocation31_spill] sm:$0xff] %v15289_v34  ;;  %v6230_v34 = vadd.f32 %v6229_v21, %v15214_v36  ;;  %v6066_v36 = vadd.f32 %v15176_v52, %v15180_v26  ;;  %v6880_v52 = vadd.f32 %v15255_v20, %v6856_v61 }
 0x5e4   : > { %v15299_v49 = vpop.f32.mrf.mxu1  ;;  %v6254_v45 = vadd.f32 %v15209_v29, %v6230_v34  ;;  %v6710_v29 = vadd.f32 %v15253_v10, %v6686_v13  ;;  %v6090_v26 = vadd.f32 %v15203_v18, %v6066_v36  ;;  %v6014_v18 = vadd.f32 %v15200_v41, %v5992_v38  ;;  %v16131_v41 = vld [vmem:[#allocation14_spill] sm:$0xff]  ;;  %v16138_v13 = vld [vmem:[#allocation24_spill] sm:$0xff] }
 0x5e5   : > { %16124 = vst [vmem:[#allocation34_spill] sm:$0xff] %v15299_v49  ;;  %v16139_v36 = vld [vmem:[#allocation8_spill] sm:$0xff] }
 0x5e6   : > { %v15295_v27 = vpop.f32.mrf.mxu0  ;;  %v6734_v54 = vadd.f32 %v15257_v31, %v6710_v29 }
 0x5e7   : > { %16123 = vst [vmem:[#allocation33_spill] sm:$0xff] %v15295_v27  ;;  %v5634_v27 = vadd.f32 %v15106_v42, %v5610_v62  ;;  %v6522_v42 = vadd.f32 %v15243_v11, %v15241_v47  ;;  %v7434_v47 = vadd.f32 %v7433_v8, %v7407_v23  ;;  %v16126_v11 = vld [vmem:[#allocation10_spill] sm:$0xff]  ;;  %v16135_v23 = vld [vmem:[#allocation20_spill] sm:$0xff] }
 0x5e9   : > { %v15291_v16 = vpop.f32.mrf.mxu3  ;;  %v7621_v15 = vpop.f32.mrf.mxu2  ;;  %v5658_v1 = vadd.f32 %v15101_v30, %v5634_v27  ;;  %v6546_v30 = vadd.f32 %v15237_v6, %v6522_v42  ;;  %v6978_v27 = vadd.f32 %v15259_v14, %v15261_v44 }
 0x5ea   : > { %16122 = vst [vmem:[#allocation32_spill] sm:$0xff] %v15291_v16  ;;  %v6376_v16 = vadd.f32 %v15216_v12, %v15220_v40  ;;  %v7142_v12 = vadd.f32 %v7141_v50, %v7115_v0  ;;  %v7288_v40 = vadd.f32 %v7287_v7, %v7261_v17  ;;  %v5868_v50 = vadd.f32 %v16126_v11, %v5846_v32  ;;  %v16127_v17 = vld [vmem:[#allocation18_spill] sm:$0xff]  ;;  %v16142_v32 = vld [vmem:[#allocation15_spill] sm:$0xff] }
 0x5eb   : > { %v7002_v22 = vadd.f32 %v16131_v41, %v6978_v27 }
 0x5ec   : > { %v6400_v3 = vadd.f32 %v15233_v5, %v6376_v16  ;;  %v6278_v16 = vadd.f32 %v15205_v55, %v6254_v45  ;;  %v7791_v0 = vpop.f32.mrf.mxu1  ;;  %v7166_v7 = vadd.f32 %v7165_v63, %v7142_v12  ;;  %v7312_v21 = vadd.f32 %v7311_v58, %v7288_v40 }
 0x5ed   : > { %v7598_v5 = vadd.f32 %v7597_v9, %v7571_v46  ;;  %v5682_v55 = vadd.f32 %v15136_v51, %v5658_v1  ;;  %v6114_v63 = vadd.f32 %v15212_v56, %v6090_v26  ;;  %v16132_v56 = vld [vmem:[#allocation28_spill] sm:$0xff]  ;;  %v6163_v58 = vadd.f32 %v6014_v18, %v16134_v39  ;;  %v16144_v26 = vld [vmem:[#allocation17_spill] sm:$0xff] }
 0x5ee   : > { %v6424_v19 = vadd.f32 %v15239_v57, %v6400_v3  ;;  %v7767_v62 = vpop.f32.mrf.mxu0  ;;  %v7336_v57 = vadd.f32 %v7335_v2, %v7312_v21  ;;  %v6302_v9 = vadd.f32 %v15223_v24, %v6278_v16  ;;  %v7190_v46 = vadd.f32 %v16127_v17, %v7166_v7  ;;  %v16129_v2 = vld [vmem:[#allocation16_spill] sm:$0xff]  ;;  %v16133_v24 = vld [vmem:[#allocation29_spill] sm:$0xff]  ;;  %v16145_v21 = vld [vmem:[#allocation30_spill] sm:$0xff] }
 0x5ef   : > { %v7622_v10 = vadd.f32 %v7621_v15, %v7598_v5  ;;  %v6570_v8 = vadd.f32 %v16129_v2, %v6546_v30  ;;  %v7458_v44 = vadd.f32 %v16133_v24, %v7434_v47  ;;  %v6138_v60 = vadd.f32 %v16135_v23, %v6114_v63  ;;  %v16136_v15 = vld [vmem:[#allocation6_spill] sm:$0xff] }
 0x5f0   : > { %v6448_v34 = vadd.f32 %v15229_v35, %v6424_v19  ;;  %v16125_v35 = vld [vmem:[#allocation13_spill] sm:$0xff]  ;;  %v7360_v14 = vadd.f32 %v16132_v56, %v7336_v57  ;;  %v6324_v37 = vadd.f32 %v16136_v15, %v6302_v9  ;;  %v7026_v61 = vadd.f32 %v16138_v13, %v7002_v22  ;;  %v16140_v19 = vld [vmem:[#allocation3_spill] sm:$0xff] }
 0x5f1   : > { %v7645_v43 = vpop.f32.mrf.mxu3  ;;  %v7717_v49 = vpop.f32.mrf.mxu2  ;;  %v6904_v25 = vadd.f32 %v16125_v35, %v6880_v52  ;;  %v7214_v12 = vadd.f32 %v16139_v36, %v7190_v46  ;;  %v5704_v42 = vadd.f32 %v16140_v19, %v5682_v55  ;;  %v6594_v38 = vadd.f32 %v16142_v32, %v6570_v8  ;;  %v16143_v52 = vld [vmem:[#allocation4_spill] sm:$0xff]  ;;  %v16148_v55 = vld [vmem:[#allocation21_spill] sm:$0xff] }
 0x5f2   : > { %v6470_v51 = vadd.f32 %v16128_v33, %v6448_v34  ;;  %v7646_v53 = vadd.f32 %v7645_v43, %v7622_v10  ;;  %v7382_v7 = vadd.f32 %v16144_v26, %v7360_v14  ;;  %v7482_v5 = vadd.f32 %v16145_v21, %v7458_v44  ;;  %v16146_v34 = vld [vmem:[#allocation33_spill] sm:$0xff]  ;;  %v16150_v35 = vld [vmem:[#allocation12_spill] sm:$0xff]  ;;  %v16152_v10 = vld [vmem:[#allocation31_spill] sm:$0xff] }
 0x5f3   : > { %v6926_v45 = vadd.f32 %v16137_v28, %v6904_v25  ;;  %v7050_v47 = vadd.f32 %v16148_v55, %v7026_v61  ;;  %v5708_v25 = vadd.f32 %v5704_v42, %v16150_v35  ;;  %v16153_v33 = vld [vmem:[#allocation34_spill] sm:$0xff]  ;;  %v16154_v8 = vld [vmem:[#allocation5_spill] sm:$0xff]  ;;  %v16155_v44 = vld [vmem:[#allocation32_spill] sm:$0xff] }
 0x5f4   : > { %v6619_v43 = vadd.f32 %v6470_v51, %v6163_v58  ;;  %v7889_v29 = vpop.f32.mrf.mxu1  ;;  %v7670_v30 = vadd.f32 %v16146_v34, %v7646_v53  ;;  %v7993_v58 = vpop.permute.xlu0 %7992 }
 0x5f6   : > { %v7863_v3 = vpop.f32.mrf.mxu0  ;;  %v7075_v57 = vadd.f32 %v6926_v45, %v6619_v43  ;;  %v7692_v51 = vadd.f32 %v16153_v33, %v7670_v30 }
 0x5f7   : > { %v7890_v9 = vadd.f32 %v7889_v29, %v7863_v3  ;;  %v12446_v29 = vmov 2  }
 0x5f8   : > { %v7531_v46 = vadd.f32 %v7382_v7, %v7075_v57 }
 0x5f9   : > { %v7743_v59 = vpop.f32.mrf.mxu3  ;;  %v7815_v6 = vpop.f32.mrf.mxu2 }
 0x5fa   : > { %v7744_v48 = vadd.f32 %v7743_v59, %v7717_v49  ;;  %v16130_v49 = vld [vmem:[#allocation26_spill] sm:$0xff] }
 0x5fb   : > { %v6758_v31 = vadd.f32 %v16130_v49, %v6734_v54  ;;  %v16147_v54 = vld [vmem:[#allocation11_spill] sm:$0xff]  ;;  %v7072_v49 = vadd.f32 %v16154_v8, %v7050_v47 }
 0x5fc   : > { %v7768_v20 = vadd.f32 %v7767_v62, %v7744_v48  ;;  %v16141_v62 = vld [vmem:[#allocation2_spill] sm:$0xff]  ;;  %v6160_v27 = vadd.f32 %v16147_v54, %v6138_v60  ;;  %v16149_v48 = vld [vmem:[#allocation27_spill] sm:$0xff]  ;;  %v7983_v23 = vpop.f32.mrf.mxu1 }
 0x5fd   : > { %v6162_v1 = vadd.f32 %v5868_v50, %v16141_v62  ;;  %v7236_v18 = vadd.f32 %v16149_v48, %v7214_v12  ;;  %v323_v60 = vld [vmem:[%s15980_s7] sm:$0x7] }
 0x5fe   : > { %v7792_v4 = vadd.f32 %v7791_v0, %v7768_v20  ;;  %v6780_v0 = vadd.f32 %v16143_v52, %v6758_v31  ;;  %v7506_v20 = vadd.f32 %v16152_v10, %v7482_v5  ;;  %v6164_v2 = vadd.f32 %v6160_v27, %v5708_v25  ;;  %v7961_v14 = vpop.f32.mrf.mxu0 }
 0x5ff   : > { %v6618_v59 = vadd.f32 %v6324_v37, %v6162_v1  ;;  %v15368_v45 = vperm.slane %v323_v60, 1  ;;  %v15370_v36 = vperm.slane %v323_v60, 0 }
 0x600   : > { %v7816_v40 = vadd.f32 %v7815_v6, %v7792_v4  ;;  %v16151_v6 = vld [vmem:[#allocation25_spill] sm:$0xff]  ;;  %v7528_v53 = vadd.f32 %v16155_v44, %v7506_v20 }
 0x601   : > { %v7837_v16 = vpop.f32.mrf.mxu3  ;;  %v6616_v11 = vadd.f32 %v16151_v6, %v6594_v38  ;;  %v7913_v50 = vpop.f32.mrf.mxu2  ;;  %v7074_v17 = vadd.f32 %v6780_v0, %v6618_v59  ;;  %v12445_v38 = vmov 1  }
 0x602   : > { %v7838_v63 = vadd.f32 %v7837_v16, %v7816_v40  ;;  %v7914_v22 = vadd.f32 %v7913_v50, %v7890_v9  ;;  %v15372_v40 = vperm.slane %v323_v60, 2  ;;  %12417 = vset.pattern.permute.xlu0 %v12445_v38  ;;  %v16156_v16 = vld [vmem:[#allocation19_spill] sm:$0xff] }
 0x603   : > { %v7530_v31 = vadd.f32 %v7236_v18, %v7074_v17  ;;  %v6620_v24 = vadd.f32 %v6616_v11, %v6164_v2  ;;  %8042 = vperm.xlu0 %12417, %v16156_v16  }
 0x604   : > { %v7987_v41 = vadd.f32 %v7838_v63, %v7531_v46 }
 0x605   : > { %v7986_v4 = vadd.f32 %v7692_v51, %v7530_v31  ;;  %v7076_v15 = vadd.f32 %v7072_v49, %v6620_v24 }
 0x606   : > { %v7996_v37 = vadd.f32 %v7993_v58, %v7987_v41 }
 0x607   : > { %v7532_v3 = vadd.f32 %v7528_v53, %v7076_v15  ;;  %v7995_v13 = vadd.f32 %v7993_v58, %v7986_v4 }
 0x608   : > { %v8006_v19 = vmul.f32 %v15368_v45, %v7996_v37 }
 0x609   : > { %v7937_v56 = vpop.f32.mrf.mxu3  ;;  %v8005_v62 = vmul.f32 %v15370_v36, %v7995_v13 }
 0x60a   : > { %v7938_v39 = vadd.f32 %v7937_v56, %v7914_v22 }
 0x60b   : > { %v8008_v43 = vadd.f32 %v8006_v19, %v8005_v62  ;;  %12418 = vset.pattern.permute.xlu0 %v12446_v29 }
 0x60c   : > { %v7962_v28 = vadd.f32 %v7961_v14, %v7938_v39  ;;  %8049 = vperm.xlu0 %12418, %v16156_v16  }
 0x60e   : > { %v7984_v61 = vadd.f32 %v7983_v23, %v7962_v28  ;;  %v12378_v23 = vld [vmem:[%s15978_s5 + $0x8] sm:$0xff] }
 0x60f   : > { %v8091_v60 = vsel %vm329_vm0, %v12378_v23, 0 }
 0x610   : > { %v7988_v12 = vadd.f32 %v7984_v61, %v7532_v3  ;;  %v15428_v15 = vand.u32 4294901760, %v8091_v60 }
 0x612   : > { %v7997_v42 = vadd.f32 %v7993_v58, %v7988_v12 }
 0x614   : > { %v8007_v1 = vmul.f32 %v15372_v40, %v7997_v42 }
 0x616   : > { %v8009_v32 = vadd.f32 %v8008_v43, %v8007_v1 }
 0x618   : > { %8010 = vadd.xlane.f32.xlu1 %v8009_v32 }
 0x675   : > { %v8043_v25 = vpop.permute.xlu0 %8042 }
 0x67e   : > { %v8050_v33 = vpop.permute.xlu0 %8049 }
 0x68b   : > { %v8011_v52 = vpop.xlane.xlu1 %8010 }
 0x68c   : > { %v8012_v0 = vmul.f32 0.00390625, %v8011_v52 }
 0x68e   : > { %v8013_v26 = vsub.f32 %v7995_v13, %v8012_v0  ;;  %v8014_v7 = vsub.f32 %v7996_v37, %v8012_v0  ;;  %v8015_v21 = vsub.f32 %v7997_v42, %v8012_v0  ;;  %v15431_v37 = vsub.f32 %v8091_v60, %v15428_v15  ;;  %v16157_v13 = vld [vmem:[#allocation23_spill] sm:$0xff] }
 0x68f   : > { %vm8086_vm1 = vcmp.lt.s32.totalorder %v16157_v13, 18  ;;  %vm8074_vm3 = vcmp.lt.s32.totalorder %v16157_v13, 19  ;;  %vm8980_vm6 = vcmp.lt.s32.totalorder %v16157_v13, 17  ;;  %vm9436_vm7 = vcmp.lt.s32.totalorder %v16157_v13, 1 }
 0x690   : > { %v8016_v5 = vmul.f32 %v8013_v26, %v15370_v36  ;;  %v8017_v34 = vmul.f32 %v8014_v7, %v15368_v45  ;;  %v8018_v30 = vmul.f32 %v8015_v21, %v15372_v40  ;;  %v15434_v28 = vand.u32 4294901760, %v15431_v37 }
 0x692   : > { %v8019_v54 = vmul.f32 %v8016_v5, %v8016_v5  ;;  %v8020_v27 = vmul.f32 %v8017_v34, %v8017_v34  ;;  %v8021_v59 = vmul.f32 %v8018_v30, %v8018_v30  ;;  %v8113_v3 = vsub.f32 %v15431_v37, %v15434_v28 }
 0x694   : > { %v8022_v57 = vadd.f32 %v8020_v27, %v8019_v54  ;;  %v15439_v43 = vand.u32 4294901760, %v8113_v3 }
 0x696   : > { %v8023_v55 = vadd.f32 %v8022_v57, %v8021_v59  ;;  %v8067_v59 = vld [vmem:[%s15978_s5] sm:$0xff] }
 0x698   : > { %8024 = vadd.xlane.f32.xlu2 %v8023_v55 }
 0x70b   : > { %v8025_v47 = vpop.xlane.xlu2 %8024 }
 0x70c   : > { %v8026_v48 = vmul.f32 0.00390625, %v8025_v47 }
 0x70e   : > { %v8027_v18 = vadd.f32 1e-05, %v8026_v48 }
 0x710   : > { %12423 = vrsqrt.f32 %v8027_v18  ;;  %vm8034_vm11 = vweird.f32 %v8027_v18 }
 0x716   : > { %v12424_v63 = vpop.eup %12423 }
 0x717   : > { %v8029_v9 = vmul.f32 %v12424_v63, %v8027_v18  ;;  %vm8035_vm10 = vweird.f32 %v12424_v63  ;;  %v8532_v18 = vsel %vm329_vm0, %v8067_v59, 0 }
 0x718   : > { %vm8036_vm12 = vmor %vm8034_vm11, %vm8035_vm10 }
 0x719   : > { %v8030_v35 = vmul.f32 %v12424_v63, %v8029_v9 }
 0x71b   : > { %v8031_v6 = vmul.f32 0.5, %v8030_v35  ;;  %v15457_v35 = vand.u32 4294901760, %v8532_v18 }
 0x71d   : > { %v8032_v11 = vsub.f32 1.5, %v8031_v6 }
 0x71f   : > { %v8033_v50 = vmul.f32 %v12424_v63, %v8032_v11 }
 0x721   : > { %v8037_v17 = vsel %vm8036_vm12, %v12424_v63, %v8033_v50 }
 0x722   : > { %v8038_v46 = vmul.f32 %v8037_v17, %v8013_v26  ;;  %v8039_v10 = vmul.f32 %v8037_v17, %v8014_v7  ;;  %v8040_v20 = vmul.f32 %v8037_v17, %v8015_v21  ;;  %v15464_v17 = vsub.f32 %v8532_v18, %v15457_v35 }
 0x724   : > { %v8045_v51 = vmul.f32 %v8043_v25, %v8038_v46  ;;  %v8046_v2 = vmul.f32 %v8043_v25, %v8039_v10  ;;  %v8047_v8 = vmul.f32 %v8043_v25, %v8040_v20 }
 0x726   : > { %v8052_v49 = vadd.f32 %v8050_v33, %v8045_v51  ;;  %v8053_v31 = vadd.f32 %v8050_v33, %v8046_v2  ;;  %v8054_v41 = vadd.f32 %v8050_v33, %v8047_v8  ;;  %v15471_v51 = vand.u32 4294901760, %v15464_v17 }
 0x728   : > { %vm8055_vm13 = vcmp.ge.f32.partialorder %v8052_v49, 0.0  ;;  %vm8056_vm14 = vcmp.ge.f32.partialorder %v8053_v31, 0.0  ;;  %vm8057_vm15 = vcmp.ge.f32.partialorder %v8054_v41, 0.0  ;;  %v8058_v22 = vmul.f32 0.1, %v8052_v49 }
 0x729   : > { %v8059_v56 = vmul.f32 0.1, %v8053_v31  ;;  %v8060_v14 = vmul.f32 0.1, %v8054_v41 }
 0x72a   : > { %v8061_v24 = vsel %vm8055_vm13, %v8052_v49, %v8058_v22  ;;  %v8554_v49 = vsub.f32 %v15464_v17, %v15471_v51 }
 0x72b   : > { %v8062_v44 = vsel %vm8056_vm14, %v8053_v31, %v8059_v56  ;;  %v8063_v53 = vsel %vm8057_vm15, %v8054_v41, %v8060_v14  ;;  %v15383_v4 = vmul.f32 %v8061_v24, %v15370_v36 }
 0x72c   : > { %v15386_v39 = vmul.f32 %v8062_v44, %v15368_v45  ;;  %v15389_v58 = vmul.f32 %v8063_v53, %v15372_v40  ;;  %v8555_v22 = vand.u32 4294901760, %v8554_v49 }
 0x72d   : > { %8080 = vrot.lane.b32.xlu2 %v15383_v4, %s12447_s9 }
 0x72e   : > { %8084 = vrot.lane.b32.xlu1 %v15389_v58, %s12447_s9  ;;  %8082 = vrot.lane.b32.xlu0 %v15386_v39, %s12447_s9 }
 0x735   : > { %8070 = vrot.lane.b32.xlu2 %v15386_v39, %s12448_s10 }
 0x736   : > { %8974 = vrot.lane.b32.xlu1 %v15383_v4, %s12449_s12  ;;  %8068 = vrot.lane.b32.xlu0 %v15383_v4, %s12448_s10 }
 0x73d   : > { %8976 = vrot.lane.b32.xlu2 %v15386_v39, %s12449_s12 }
 0x73e   : > { %9430 = vrot.lane.b32.xlu1 %v15383_v4, %s12450_s13  ;;  %8072 = vrot.lane.b32.xlu0 %v15389_v58, %s12448_s10 }
 0x745   : > { %9432 = vrot.lane.b32.xlu2 %v15386_v39, %s12450_s13 }
 0x746   : > { %10332 = vrot.lane.b32.xlu1 %v15383_v4, %s12436_s15  ;;  %8978 = vrot.lane.b32.xlu0 %v15389_v58, %s12449_s12 }
 0x74d   : > { %10336 = vrot.lane.b32.xlu2 %v15389_v58, %s12436_s15 }
 0x74e   : > { %10787 = vrot.lane.b32.xlu1 %v15383_v4, %s12451_s14  ;;  %9434 = vrot.lane.b32.xlu0 %v15389_v58, %s12450_s13 }
 0x755   : > { %10791 = vrot.lane.b32.xlu2 %v15389_v58, %s12451_s14 }
 0x756   : > { %11243 = vrot.lane.b32.xlu1 %v15383_v4, %s12438_s17  ;;  %10334 = vrot.lane.b32.xlu0 %v15386_v39, %s12436_s15 }
 0x75d   : > { %11247 = vrot.lane.b32.xlu2 %v15389_v58, %s12438_s17 }
 0x75e   : > { %11698 = vrot.lane.b32.xlu1 %v15383_v4, %s12439_s18  ;;  %10789 = vrot.lane.b32.xlu0 %v15386_v39, %s12451_s14 }
 0x765   : > { %11702 = vrot.lane.b32.xlu2 %v15389_v58, %s12439_s18 }
 0x766   : > { %11245 = vrot.lane.b32.xlu0 %v15386_v39, %s12438_s17  ;;  %s322_s17 = scalar_lea.vmem %s15981_s8, %s12388_s11 }
 0x76e   : > { %11700 = vrot.lane.b32.xlu0 %v15386_v39, %s12439_s18 }
 0x787   : > { %v8081_v61 = vpop.permute.xlu2 %8080 }
 0x78f   : > { %v8071_v6 = vpop.permute.xlu2 %8070 }
 0x797   : > { %v8977_v60 = vpop.permute.xlu2 %8976 }
 0x7a0   : > { %v8085_v12 = vpop.permute.xlu1 %8084  ;;  %v8083_v19 = vpop.permute.xlu0 %8082 }
 0x7a1   : > { %v8089_v42 = vsel %vm8086_vm1, %v8085_v12, %v8081_v61  ;;  %v8087_v62 = vsel %vm8086_vm1, %v8083_v19, %v8085_v12  ;;  %v8088_v1 = vsel %vm8086_vm1, %v8081_v61, %v8083_v19 }
 0x7a2   : > { %v8108_v32 = vand.u32 4294901760, %v8089_v42  ;;  %v8254_v38 = vand.u32 4294901760, %v8088_v1  ;;  %v8400_v52 = vand.u32 4294901760, %v8087_v62 }
 0x7a4   : > { %v8135_v16 = vsub.f32 %v8089_v42, %v8108_v32  ;;  %v8281_v29 = vsub.f32 %v8088_v1, %v8254_v38  ;;  %8109 = vmatpush.msra.mxu2 %v8108_v32  ;;  %8185 = vmatpush.msrb.mxu1 %v8108_v32  ;;  %v8427_v5 = vsub.f32 %v8087_v62, %v8400_v52 }
 0x7a5   : > { %8115 = vmatmul.f32.vlgmr.msra.gmra.mxu2 %v15439_v43  ;;  %8189 = vmatmul.f32.vlgmr.msrb.gmra.mxu1 %v15434_v28 }
 0x7a6   : > { %v8136_v0 = vand.u32 4294901760, %v8135_v16  ;;  %v8282_v26 = vand.u32 4294901760, %v8281_v29  ;;  %8162 = vmatpush.msrb.mxu0 %v8135_v16  ;;  %v8428_v27 = vand.u32 4294901760, %v8427_v5 }
 0x7a7   : > { %8165 = vmatmul.f32.vlgmr.msrb.gmra.mxu0 %v15431_v37 }
 0x7a8   : > { %v8137_v7 = vsub.f32 %v8135_v16, %v8136_v0  ;;  %v8283_v21 = vsub.f32 %v8281_v29, %v8282_v26  ;;  %8255 = vmatpush.msra.mxu0 %v8254_v38  ;;  %v8069_v34 = vpop.permute.xlu0 %8068  ;;  %8211 = vmatpush.msrb.mxu2 %v8136_v0  ;;  %v8429_v57 = vsub.f32 %v8427_v5, %v8428_v27  ;;  %v8975_v23 = vpop.permute.xlu1 %8974 }
 0x7a9   : > { %v8076_v50 = vsel %vm8074_vm3, %v8069_v34, %v8071_v6 }
 0x7aa   : > { %8357 = vmatpush.msrb.mxu0 %v8282_v26  ;;  %8308 = vmatpush.msra.mxu2 %v8281_v29  ;;  %v8138_v30 = vand.u32 4294901760, %v8137_v7  ;;  %v8284_v54 = vand.u32 4294901760, %v8283_v21  ;;  %v8430_v9 = vand.u32 4294901760, %v8429_v57  ;;  %v8695_v20 = vand.u32 4294901760, %v8076_v50 }
 0x7ac   : > { %8139 = vmatpush.msra.mxu3 %v8138_v30  ;;  %8285 = vmatpush.msra.mxu1 %v8284_v54  ;;  %v8722_v2 = vsub.f32 %v8076_v50, %v8695_v20 }
 0x7ad   : > { %8141 = vmatmul.f32.vlgmr.msra.gmra.mxu3 %v15428_v15  ;;  %8213 = vmatmul.f32.vlgmr.msrb.gmra.mxu2 %v15428_v15 }
 0x7ae   : > { %8233 = vmatpush.msrb.mxu3 %v8108_v32  ;;  %8287 = vmatmul.f32.vlgmr.msra.gmra.mxu1 %v15428_v15  ;;  %v8723_v31 = vand.u32 4294901760, %v8722_v2 }
 0x7af   : > { %8379 = vmatpush.msrb.mxu1 %v8254_v38  ;;  %8401 = vmatpush.msrb.mxu2 %v8400_v52 }
 0x7b0   : > { %8331 = vmatpush.msra.mxu3 %v8254_v38  ;;  %v8073_v55 = vpop.permute.xlu0 %8072  ;;  %8261 = vmatmul.f32.vlgmr.msra.gmra.mxu0 %v15439_v43  ;;  %v8724_v56 = vsub.f32 %v8722_v2, %v8723_v31  ;;  %v9431_v21 = vpop.permute.xlu1 %9430 }
 0x7b1   : > { %8477 = vmatpush.msra.mxu1 %v8400_v52  ;;  %v8077_v47 = vsel %vm8074_vm3, %v8073_v55, %v8069_v34  ;;  %8454 = vmatpush.msra.mxu0 %v8427_v5  ;;  %v8075_v46 = vsel %vm8074_vm3, %v8071_v6, %v8073_v55 }
 0x7b2   : > { %v8549_v48 = vand.u32 4294901760, %v8077_v47  ;;  %v8841_v33 = vand.u32 4294901760, %v8075_v46  ;;  %v8725_v24 = vand.u32 4294901760, %v8724_v56 }
 0x7b4   : > { %v8576_v63 = vsub.f32 %v8077_v47, %v8549_v48  ;;  %v8868_v8 = vsub.f32 %v8075_v46, %v8841_v33 }
 0x7b5   : > { %8235 = vmatmul.f32.vlgmr.msrb.gmra.mxu3 %v15428_v15  ;;  %8311 = vmatmul.f32.vlgmr.msra.gmra.mxu2 %v15431_v37 }
 0x7b6   : > { %v8577_v25 = vand.u32 4294901760, %v8576_v63  ;;  %8381 = vmatmul.f32.vlgmr.msrb.gmra.mxu1 %v15428_v15  ;;  %8431 = vmatpush.msrb.mxu3 %v8430_v9  ;;  %v8869_v41 = vand.u32 4294901760, %v8868_v8 }
 0x7b7   : > { %8503 = vmatpush.msra.mxu2 %v8428_v27 }
 0x7b8   : > { %v8578_v11 = vsub.f32 %v8576_v63, %v8577_v25  ;;  %8359 = vmatmul.f32.vlgmr.msrb.gmra.mxu0 %v15428_v15  ;;  %v8870_v14 = vsub.f32 %v8868_v8, %v8869_v41  ;;  %v8979_v53 = vpop.permute.xlu0 %8978 }
 0x7b9   : > { %8550 = vmatpush.msrb.mxu0 %v8549_v48  ;;  %v8981_v5 = vsel %vm8980_vm6, %v8977_v60, %v8979_v53 }
 0x7ba   : > { %v8579_v10 = vand.u32 4294901760, %v8578_v11  ;;  %v8871_v44 = vand.u32 4294901760, %v8870_v14  ;;  %v9294_v54 = vand.u32 4294901760, %v8981_v5  ;;  %v9433_v11 = vpop.permute.xlu2 %9432 }
 0x7bb   : > { %v9438_v50 = vsel %vm9436_vm7, %v9431_v21, %v9433_v11 }
 0x7bc   : > { %8580 = vmatpush.msrb.mxu1 %v8579_v10  ;;  %v9321_v59 = vsub.f32 %v8981_v5, %v9294_v54  ;;  %v9604_v10 = vand.u32 4294901760, %v9438_v50 }
 0x7bd   : > { %8335 = vmatmul.f32.vlgmr.msra.gmra.mxu3 %v15434_v28  ;;  %8407 = vmatmul.f32.vlgmr.msrb.gmra.mxu2 %v15439_v43 }
 0x7be   : > { %8481 = vmatmul.f32.vlgmr.msra.gmra.mxu1 %v15434_v28  ;;  %8525 = vmatpush.msra.mxu3 %v8400_v52  ;;  %v12379_v28 = vld [vmem:[%s15978_s5 + $0x10] sm:$0xff]  ;;  %v9322_v55 = vand.u32 4294901760, %v9321_v59 }
 0x7bf   : > { %8603 = vmatpush.msrb.mxu2 %v8576_v63  ;;  %8674 = vmatpush.msra.mxu1 %v8549_v48  ;;  %v8985_v12 = vsel %vm329_vm0, %v12379_v28, 0 }
 0x7c0   : > { %8457 = vmatmul.f32.vlgmr.msra.gmra.mxu0 %v15431_v37  ;;  %v8983_v37 = vsel %vm8980_vm6, %v8979_v53, %v8975_v23  ;;  %v15496_v62 = vand.u32 4294901760, %v8985_v12  ;;  %v9435_v7 = vpop.permute.xlu0 %9434  ;;  %v9323_v18 = vsub.f32 %v9321_v59, %v9322_v55  ;;  %v9904_v53 = vand.u32 4294901760, %v15383_v4 }
 0x7c1   : > { %8652 = vmatpush.msra.mxu0 %v8577_v25  ;;  %v9002_v3 = vand.u32 4294901760, %v8983_v37  ;;  %v9439_v30 = vsel %vm9436_vm7, %v9435_v7, %v9431_v21  ;;  %v9437_v46 = vsel %vm9436_vm7, %v9433_v11, %v9435_v7  ;;  %v15588_v7 = vpop.permute.xlu1 %10332 }
 0x7c2   : > { %v15501_v32 = vsub.f32 %v8985_v12, %v15496_v62  ;;  %v9458_v27 = vand.u32 4294901760, %v9439_v30 }
 0x7c3   : > { %v9029_v19 = vsub.f32 %v8983_v37, %v9002_v3  ;;  %v9931_v37 = vsub.f32 %v15383_v4, %v9904_v53 }
 0x7c4   : > { %v15505_v29 = vand.u32 4294901760, %v15501_v32  ;;  %v9485_v57 = vsub.f32 %v9439_v30, %v9458_v27 }
 0x7c5   : > { %8433 = vmatmul.f32.vlgmr.msrb.gmra.mxu3 %v15428_v15  ;;  %8505 = vmatmul.f32.vlgmr.msra.gmra.mxu2 %v15428_v15  ;;  %v9030_v1 = vand.u32 4294901760, %v9029_v19  ;;  %v9932_v12 = vand.u32 4294901760, %v9931_v37 }
 0x7c6   : > { %8582 = vmatmul.f32.vlgmr.msrb.gmra.mxu1 %v15457_v35  ;;  %8626 = vmatpush.msrb.mxu3 %v8549_v48  ;;  %v9007_v26 = vsub.f32 %v15501_v32, %v15505_v29  ;;  %v9486_v47 = vand.u32 4294901760, %v9485_v57  ;;  %v12380_v48 = vld [vmem:[%s15978_s5 + $0x18] sm:$0xff] }
 0x7c7   : > { %8696 = vmatpush.msra.mxu2 %v8695_v20  ;;  %8772 = vmatpush.msrb.mxu1 %v8695_v20  ;;  %v9031_v38 = vsub.f32 %v9029_v19, %v9030_v1  ;;  %v9441_v9 = vsel %vm329_vm0, %v12380_v48, 0 }
 0x7c8   : > { %8556 = vmatmul.f32.vlgmr.msrb.gmra.mxu0 %v8555_v22  ;;  %v9008_v34 = vand.u32 4294901760, %v9007_v26  ;;  %v9487_v63 = vsub.f32 %v9485_v57, %v9486_v47  ;;  %v15530_v6 = vand.u32 4294901760, %v9441_v9 }
 0x7c9   : > { %8749 = vmatpush.msrb.mxu0 %v8722_v2  ;;  %v9032_v52 = vand.u32 4294901760, %v9031_v38 }
 0x7ca   : > { %v9488_v25 = vand.u32 4294901760, %v9487_v63 }
 0x7cd   : > { %8527 = vmatmul.f32.vlgmr.msra.gmra.mxu3 %v15428_v15  ;;  %8606 = vmatmul.f32.vlgmr.msrb.gmra.mxu2 %v15464_v17  ;;  %v8982_v15 = vsel %vm8980_vm6, %v8975_v23, %v8977_v60  ;;  %v15562_v23 = vand.u32 4294901760, %v15386_v39 }
 0x7ce   : > { %8676 = vmatmul.f32.vlgmr.msra.gmra.mxu1 %v15457_v35  ;;  %8726 = vmatpush.msra.mxu3 %v8725_v24  ;;  %v9148_v61 = vand.u32 4294901760, %v8982_v15 }
 0x7cf   : > { %8798 = vmatpush.msrb.mxu2 %v8723_v31  ;;  %8872 = vmatpush.msra.mxu1 %v8871_v44  ;;  %v12381_v44 = vld [vmem:[%s15978_s5 + $0x20] sm:$0xff] }
 0x7d0   : > { %8654 = vmatmul.f32.vlgmr.msra.gmra.mxu0 %v15457_v35  ;;  %v9175_v42 = vsub.f32 %v8982_v15, %v9148_v61  ;;  %v9887_v60 = vsel %vm329_vm0, %v12381_v44, 0  ;;  %v10077_v15 = vsub.f32 %v15386_v39, %v15562_v23  ;;  %v9933_v39 = vsub.f32 %v9931_v37, %v9932_v12  ;;  %v10337_v44 = vpop.permute.xlu2 %10336 }
 0x7d1   : > { %8842 = vmatpush.msra.mxu0 %v8841_v33  ;;  %v15570_v28 = vand.u32 4294901760, %v9887_v60 }
 0x7d2   : > { %v9176_v43 = vand.u32 4294901760, %v9175_v42 }
 0x7d4   : > { %v9177_v16 = vsub.f32 %v9175_v42, %v9176_v43 }
 0x7d5   : > { %8630 = vmatmul.f32.vlgmr.msrb.gmra.mxu3 %v15471_v51  ;;  %8702 = vmatmul.f32.vlgmr.msra.gmra.mxu2 %v8555_v22 }
 0x7d6   : > { %8776 = vmatmul.f32.vlgmr.msrb.gmra.mxu1 %v15471_v51  ;;  %8820 = vmatpush.msrb.mxu3 %v8695_v20  ;;  %v9178_v0 = vand.u32 4294901760, %v9177_v16  ;;  %v9750_v20 = vand.u32 4294901760, %v9437_v46 }
 0x7d7   : > { %8895 = vmatpush.msra.mxu2 %v8868_v8  ;;  %8966 = vmatpush.msrb.mxu1 %v8841_v33 }
 0x7d8   : > { %8752 = vmatmul.f32.vlgmr.msrb.gmra.mxu0 %v15464_v17  ;;  %v9777_v2 = vsub.f32 %v9437_v46, %v9750_v20 }
 0x7d9   : > { %8944 = vmatpush.msrb.mxu0 %v8869_v41 }
 0x7da   : > { %v9778_v31 = vand.u32 4294901760, %v9777_v2 }
 0x7dc   : > { %v9779_v56 = vsub.f32 %v9777_v2, %v9778_v31 }
 0x7dd   : > { %8728 = vmatmul.f32.vlgmr.msra.gmra.mxu3 %v15457_v35  ;;  %8800 = vmatmul.f32.vlgmr.msrb.gmra.mxu2 %v15457_v35 }
 0x7de   : > { %8874 = vmatmul.f32.vlgmr.msra.gmra.mxu1 %v15457_v35  ;;  %8918 = vmatpush.msra.mxu3 %v8841_v33  ;;  %v9780_v24 = vand.u32 4294901760, %v9779_v56 }
 0x7df   : > { %9003 = vmatpush.msrb.mxu2 %v9002_v3  ;;  %9079 = vmatpush.msra.mxu1 %v9002_v3 }
 0x7e0   : > { %8848 = vmatmul.f32.vlgmr.msra.gmra.mxu0 %v8555_v22 }
 0x7e1   : > { %9056 = vmatpush.msra.mxu0 %v9029_v19  ;;  %v10078_v19 = vand.u32 4294901760, %v10077_v15 }
 0x7e5   : > { %8822 = vmatmul.f32.vlgmr.msrb.gmra.mxu3 %v15457_v35  ;;  %8898 = vmatmul.f32.vlgmr.msra.gmra.mxu2 %v15464_v17  ;;  %v15537_v17 = vsub.f32 %v9441_v9, %v15530_v6 }
 0x7e6   : > { %8968 = vmatmul.f32.vlgmr.msrb.gmra.mxu1 %v15457_v35  ;;  %9033 = vmatpush.msrb.mxu3 %v9032_v52  ;;  %v15586_v52 = vpop.permute.xlu0 %10334 }
 0x7e7   : > { %9105 = vmatpush.msra.mxu2 %v9030_v1  ;;  %9179 = vmatpush.msrb.mxu1 %v9178_v0  ;;  %v15543_v33 = vand.u32 4294901760, %v15537_v17 }
 0x7e8   : > { %8946 = vmatmul.f32.vlgmr.msrb.gmra.mxu0 %v15457_v35  ;;  %v9324_v35 = vand.u32 4294901760, %v9323_v18 }
 0x7e9   : > { %9149 = vmatpush.msrb.mxu0 %v9148_v61  ;;  %v9463_v8 = vsub.f32 %v15537_v17, %v15543_v33 }
 0x7eb   : > { %v9464_v41 = vand.u32 4294901760, %v9463_v8 }
 0x7ed   : > { %8922 = vmatmul.f32.vlgmr.msra.gmra.mxu3 %v15471_v51  ;;  %9009 = vmatmul.f32.vlgmr.msrb.gmra.mxu2 %v9008_v34  ;;  %v9631_v51 = vsub.f32 %v9438_v50, %v9604_v10 }
 0x7ee   : > { %9083 = vmatmul.f32.vlgmr.msra.gmra.mxu1 %v15505_v29  ;;  %9127 = vmatpush.msra.mxu3 %v9002_v3 }
 0x7ef   : > { %9202 = vmatpush.msrb.mxu2 %v9175_v42  ;;  %9273 = vmatpush.msra.mxu1 %v9148_v61  ;;  %v9632_v49 = vand.u32 4294901760, %v9631_v51  ;;  %v15575_v42 = vsub.f32 %v9887_v60, %v15570_v28 }
 0x7f0   : > { %9059 = vmatmul.f32.vlgmr.msra.gmra.mxu0 %v15501_v32 }
 0x7f1   : > { %9251 = vmatpush.msra.mxu0 %v9176_v43  ;;  %v9633_v22 = vsub.f32 %v9631_v51, %v9632_v49  ;;  %v15579_v1 = vand.u32 4294901760, %v15575_v42 }
 0x7f3   : > { %v9634_v14 = vand.u32 4294901760, %v9633_v22  ;;  %v9909_v16 = vsub.f32 %v15575_v42, %v15579_v1 }
 0x7f5   : > { %9035 = vmatmul.f32.vlgmr.msrb.gmra.mxu3 %v15496_v62  ;;  %9107 = vmatmul.f32.vlgmr.msra.gmra.mxu2 %v15496_v62  ;;  %v15591_v5 = vand.u32 4294901760, %v9909_v16 }
 0x7f6   : > { %9181 = vmatmul.f32.vlgmr.msrb.gmra.mxu1 %v15496_v62  ;;  %9225 = vmatpush.msrb.mxu3 %v9148_v61 }
 0x7f7   : > { %9295 = vmatpush.msra.mxu2 %v9294_v54  ;;  %9371 = vmatpush.msrb.mxu1 %v9294_v54 }
 0x7f8   : > { %9155 = vmatmul.f32.vlgmr.msrb.gmra.mxu0 %v9008_v34 }
 0x7f9   : > { %9348 = vmatpush.msrb.mxu0 %v9321_v59 }
 0x7fd   : > { %9129 = vmatmul.f32.vlgmr.msra.gmra.mxu3 %v15496_v62  ;;  %9205 = vmatmul.f32.vlgmr.msrb.gmra.mxu2 %v15501_v32 }
 0x7fe   : > { %9275 = vmatmul.f32.vlgmr.msra.gmra.mxu1 %v15496_v62  ;;  %9325 = vmatpush.msra.mxu3 %v9324_v35 }
 0x7ff   : > { %9397 = vmatpush.msrb.mxu2 %v9322_v55  ;;  %9489 = vmatpush.msra.mxu1 %v9488_v25 }
 0x800   : > { %9253 = vmatmul.f32.vlgmr.msra.gmra.mxu0 %v15496_v62 }
 0x801   : > { %9459 = vmatpush.msra.mxu0 %v9458_v27 }
 0x805   : > { %9229 = vmatmul.f32.vlgmr.msrb.gmra.mxu3 %v15505_v29  ;;  %9301 = vmatmul.f32.vlgmr.msra.gmra.mxu2 %v9008_v34  ;;  %v10339_v34 = vsel %vm3911_vm2, %v15588_v7, %v15586_v52 }
 0x806   : > { %9375 = vmatmul.f32.vlgmr.msrb.gmra.mxu1 %v15505_v29  ;;  %9419 = vmatpush.msrb.mxu3 %v9294_v54  ;;  %v15601_v59 = vand.u32 4294901760, %v10339_v34 }
 0x807   : > { %9512 = vmatpush.msra.mxu2 %v9485_v57  ;;  %9583 = vmatpush.msrb.mxu1 %v9458_v27 }
 0x808   : > { %9351 = vmatmul.f32.vlgmr.msrb.gmra.mxu0 %v15501_v32  ;;  %v9934_v32 = vand.u32 4294901760, %v9933_v39  ;;  %v15610_v35 = vsub.f32 %v10339_v34, %v15601_v59 }
 0x809   : > { %9561 = vmatpush.msrb.mxu0 %v9486_v47 }
 0x80d   : > { %9327 = vmatmul.f32.vlgmr.msra.gmra.mxu3 %v15496_v62  ;;  %9399 = vmatmul.f32.vlgmr.msrb.gmra.mxu2 %v15496_v62 }
 0x80e   : > { %9491 = vmatmul.f32.vlgmr.msra.gmra.mxu1 %v15530_v6  ;;  %9535 = vmatpush.msra.mxu3 %v9458_v27  ;;  %v15599_v27 = vand.u32 4294901760, %v15389_v58 }
 0x80f   : > { %9605 = vmatpush.msrb.mxu2 %v9604_v10  ;;  %9681 = vmatpush.msra.mxu1 %v9604_v10 }
 0x810   : > { %9465 = vmatmul.f32.vlgmr.msra.gmra.mxu0 %v9464_v41  ;;  %v10223_v9 = vsub.f32 %v15389_v58, %v15599_v27  ;;  %v12382_v58 = vld [vmem:[%s15978_s5 + $0x28] sm:$0xff] }
 0x811   : > { %9658 = vmatpush.msra.mxu0 %v9631_v51  ;;  %v10342_v8 = vsel %vm329_vm0, %v12382_v58, 0 }
 0x812   : > { %v10224_v50 = vand.u32 4294901760, %v10223_v9  ;;  %v15630_v56 = vand.u32 4294901760, %v10342_v8 }
 0x815   : > { %9421 = vmatmul.f32.vlgmr.msrb.gmra.mxu3 %v15496_v62  ;;  %9515 = vmatmul.f32.vlgmr.msra.gmra.mxu2 %v15537_v17  ;;  %v10079_v62 = vsub.f32 %v10077_v15, %v10078_v19 }
 0x816   : > { %9585 = vmatmul.f32.vlgmr.msrb.gmra.mxu1 %v15530_v6  ;;  %9635 = vmatpush.msrb.mxu3 %v9634_v14 }
 0x817   : > { %9707 = vmatpush.msra.mxu2 %v9632_v49  ;;  %9781 = vmatpush.msrb.mxu1 %v9780_v24  ;;  %v10080_v38 = vand.u32 4294901760, %v10079_v62 }
 0x818   : > { %9563 = vmatmul.f32.vlgmr.msrb.gmra.mxu0 %v15530_v6 }
 0x819   : > { %9751 = vmatpush.msrb.mxu0 %v9750_v20 }
 0x81d   : > { %9539 = vmatmul.f32.vlgmr.msra.gmra.mxu3 %v15543_v33  ;;  %9611 = vmatmul.f32.vlgmr.msrb.gmra.mxu2 %v9464_v41 }
 0x81e   : > { %9685 = vmatmul.f32.vlgmr.msra.gmra.mxu1 %v15543_v33  ;;  %9729 = vmatpush.msra.mxu3 %v9604_v10 }
 0x81f   : > { %9804 = vmatpush.msrb.mxu2 %v9777_v2  ;;  %9875 = vmatpush.msra.mxu1 %v9750_v20 }
 0x820   : > { %9661 = vmatmul.f32.vlgmr.msra.gmra.mxu0 %v15537_v17 }
 0x821   : > { %9853 = vmatpush.msra.mxu0 %v9778_v31 }
 0x822   : > { %v8190_v3 = vpop.f32.mrf.mxu1 }
 0x824   : > { %v8166_v61 = vpop.f32.mrf.mxu0 }
 0x825   : > { %9637 = vmatmul.f32.vlgmr.msrb.gmra.mxu3 %v15530_v6  ;;  %9709 = vmatmul.f32.vlgmr.msra.gmra.mxu2 %v15530_v6 }
 0x826   : > { %9783 = vmatmul.f32.vlgmr.msrb.gmra.mxu1 %v15530_v6  ;;  %9827 = vmatpush.msrb.mxu3 %v9750_v20 }
 0x827   : > { %9905 = vmatpush.msra.mxu2 %v9904_v53  ;;  %9981 = vmatpush.msrb.mxu1 %v9904_v53 }
 0x828   : > { %v8116_v4 = vpop.f32.mrf.mxu2  ;;  %9757 = vmatmul.f32.vlgmr.msrb.gmra.mxu0 %v9464_v41 }
 0x829   : > { %9958 = vmatpush.msrb.mxu0 %v9931_v37  ;;  %v10338_v37 = vsel %vm3911_vm2, %v15586_v52, %v10337_v44 }
 0x82a   : > { %v15644_v39 = vand.u32 4294901760, %v10338_v37 }
 0x82b   : > { %v8288_v43 = vpop.f32.mrf.mxu1 }
 0x82d   : > { %9731 = vmatmul.f32.vlgmr.msra.gmra.mxu3 %v15530_v6  ;;  %9807 = vmatmul.f32.vlgmr.msrb.gmra.mxu2 %v15537_v17  ;;  %v8262_v29 = vpop.f32.mrf.mxu0  ;;  %v10387_v17 = vand.u32 4294901760, %v15610_v35 }
 0x82e   : > { %9877 = vmatmul.f32.vlgmr.msra.gmra.mxu1 %v15530_v6  ;;  %9935 = vmatpush.msra.mxu3 %v9934_v32  ;;  %v8289_v57 = vadd.f32 %v8288_v43, %v8262_v29  ;;  %v10532_v29 = vsub.f32 %v10338_v37, %v15644_v39 }
 0x82f   : > { %10007 = vmatpush.msrb.mxu2 %v9932_v12  ;;  %10081 = vmatpush.msra.mxu1 %v10080_v38  ;;  %v10388_v51 = vsub.f32 %v15610_v35, %v10387_v17  ;;  %v10340_v12 = vsel %vm3911_vm2, %v10337_v44, %v15588_v7  ;;  %vm10793_vm2 = vcmp.lt.s32.totalorder %v16157_v13, 111 }
 0x830   : > { %v8142_v0 = vpop.f32.mrf.mxu3  ;;  %v8214_v26 = vpop.f32.mrf.mxu2  ;;  %9855 = vmatmul.f32.vlgmr.msra.gmra.mxu0 %v15530_v6  ;;  %v15646_v62 = vand.u32 4294901760, %v10340_v12  ;;  %v10533_v34 = vand.u32 4294901760, %v10532_v29 }
 0x831   : > { %v8143_v21 = vadd.f32 %v8142_v0, %v8116_v4  ;;  %10051 = vmatpush.msra.mxu0 %v15562_v23  ;;  %v10389_v22 = vand.u32 4294901760, %v10388_v51 }
 0x833   : > { %v8167_v30 = vadd.f32 %v8166_v61, %v8143_v21  ;;  %v8382_v54 = vpop.f32.mrf.mxu1  ;;  %v15638_v61 = vsub.f32 %v10342_v8, %v15630_v56 }
 0x835   : > { %v8191_v55 = vadd.f32 %v8190_v3, %v8167_v30  ;;  %9831 = vmatmul.f32.vlgmr.msrb.gmra.mxu3 %v15543_v33  ;;  %9911 = vmatmul.f32.vlgmr.msra.gmra.mxu2 %v15591_v5  ;;  %v8360_v47 = vpop.f32.mrf.mxu0  ;;  %v10225_v33 = vsub.f32 %v10223_v9, %v10224_v50  ;;  %v15651_v32 = vand.u32 4294901760, %v15638_v61 }
 0x836   : > { %9985 = vmatmul.f32.vlgmr.msrb.gmra.mxu1 %v15579_v1  ;;  %10029 = vmatpush.msrb.mxu3 %v9904_v53 }
 0x837   : > { %v8215_v48 = vadd.f32 %v8214_v26, %v8191_v55  ;;  %10104 = vmatpush.msra.mxu2 %v10077_v15  ;;  %10175 = vmatpush.msrb.mxu1 %v15562_v23  ;;  %v10226_v41 = vand.u32 4294901760, %v10225_v33  ;;  %v15659_v26 = vsub.f32 %v10340_v12, %v15646_v62 }
 0x838   : > { %v8236_v18 = vpop.f32.mrf.mxu3  ;;  %v8312_v63 = vpop.f32.mrf.mxu2  ;;  %9961 = vmatmul.f32.vlgmr.msrb.gmra.mxu0 %v15575_v42 }
 0x839   : > { %v8237_v25 = vadd.f32 %v8236_v18, %v8215_v48  ;;  %v8313_v6 = vadd.f32 %v8312_v63, %v8289_v57  ;;  %10153 = vmatpush.msrb.mxu0 %v10078_v19  ;;  %v10679_v30 = vand.u32 4294901760, %v15659_v26 }
 0x83b   : > { %v8482_v11 = vpop.f32.mrf.mxu1 }
 0x83d   : > { %9937 = vmatmul.f32.vlgmr.msra.gmra.mxu3 %v15570_v28  ;;  %10009 = vmatmul.f32.vlgmr.msrb.gmra.mxu2 %v15570_v28  ;;  %v8458_v46 = vpop.f32.mrf.mxu0 }
 0x83e   : > { %10083 = vmatmul.f32.vlgmr.msra.gmra.mxu1 %v15570_v28  ;;  %10127 = vmatpush.msra.mxu3 %v15562_v23 }
 0x83f   : > { %10197 = vmatpush.msrb.mxu2 %v15599_v27  ;;  %10273 = vmatpush.msra.mxu1 %v15599_v27 }
 0x840   : > { %v8336_v10 = vpop.f32.mrf.mxu3  ;;  %v8408_v20 = vpop.f32.mrf.mxu2  ;;  %10057 = vmatmul.f32.vlgmr.msra.gmra.mxu0 %v15591_v5 }
 0x841   : > { %v8337_v2 = vadd.f32 %v8336_v10, %v8313_v6  ;;  %10250 = vmatpush.msra.mxu0 %v10223_v9  ;;  %v10790_v6 = vpop.permute.xlu0 %10789 }
 0x843   : > { %v8361_v49 = vadd.f32 %v8360_v47, %v8337_v2  ;;  %v8583_v31 = vpop.f32.mrf.mxu1  ;;  %v10680_v47 = vsub.f32 %v15659_v26, %v10679_v30 }
 0x845   : > { %10031 = vmatmul.f32.vlgmr.msrb.gmra.mxu3 %v15570_v28  ;;  %10107 = vmatmul.f32.vlgmr.msra.gmra.mxu2 %v15575_v42  ;;  %v8383_v14 = vadd.f32 %v8382_v54, %v8361_v49  ;;  %v8557_v24 = vpop.f32.mrf.mxu0  ;;  %v12383_v49 = vld [vmem:[%s15978_s5 + $0x30] sm:$0xff] }
 0x846   : > { %10177 = vmatmul.f32.vlgmr.msrb.gmra.mxu1 %v15570_v28  ;;  %10227 = vmatpush.msrb.mxu3 %v10226_v41  ;;  %v8558_v53 = vadd.f32 %v8557_v24, %v8237_v25  ;;  %v10798_v24 = vsel %vm329_vm0, %v12383_v49, 0 }
 0x847   : > { %10299 = vmatpush.msra.mxu2 %v10224_v50  ;;  %10390 = vmatpush.msrb.mxu1 %v10389_v22  ;;  %v15684_v50 = vpop.permute.xlu1 %10787  ;;  %v15718_v12 = vand.u32 4294901760, %v10798_v24 }
 0x848   : > { %v8434_v23 = vpop.f32.mrf.mxu3  ;;  %v8506_v60 = vpop.f32.mrf.mxu2  ;;  %v8584_v15 = vadd.f32 %v8583_v31, %v8558_v53  ;;  %10155 = vmatmul.f32.vlgmr.msrb.gmra.mxu0 %v15570_v28  ;;  %v10795_v10 = vsel %vm10793_vm2, %v15684_v50, %v10790_v6 }
 0x849   : > { %v8435_v3 = vadd.f32 %v8434_v23, %v8408_v20  ;;  %10360 = vmatpush.msrb.mxu0 %v15601_v59  ;;  %v15700_v31 = vand.u32 4294901760, %v10795_v10 }
 0x84b   : > { %v8459_v19 = vadd.f32 %v8458_v46, %v8435_v3  ;;  %v8677_v4 = vpop.f32.mrf.mxu1  ;;  %v10842_v53 = vsub.f32 %v10795_v10, %v15700_v31 }
 0x84d   : > { %v8483_v43 = vadd.f32 %v8482_v11, %v8459_v19  ;;  %10131 = vmatmul.f32.vlgmr.msra.gmra.mxu3 %v15579_v1  ;;  %10203 = vmatmul.f32.vlgmr.msrb.gmra.mxu2 %v15591_v5  ;;  %v8655_v38 = vpop.f32.mrf.mxu0 }
 0x84e   : > { %10277 = vmatmul.f32.vlgmr.msra.gmra.mxu1 %v15579_v1  ;;  %10321 = vmatpush.msra.mxu3 %v15599_v27  ;;  %v10364_v1 = vsub.f32 %v15638_v61, %v15651_v32 }
 0x84f   : > { %v8507_v16 = vadd.f32 %v8506_v60, %v8483_v43  ;;  %10413 = vmatpush.msrb.mxu2 %v15610_v35  ;;  %10484 = vmatpush.msra.mxu1 %v15601_v59  ;;  %v15726_v43 = vsub.f32 %v10798_v24, %v15718_v12 }
 0x850   : > { %v8528_v52 = vpop.f32.mrf.mxu3  ;;  %v8607_v0 = vpop.f32.mrf.mxu2  ;;  %10253 = vmatmul.f32.vlgmr.msra.gmra.mxu0 %v15575_v42  ;;  %v15669_v54 = vand.u32 4294901760, %v10364_v1  ;;  %v10534_v42 = vsub.f32 %v10532_v29, %v10533_v34 }
 0x851   : > { %v8529_v7 = vadd.f32 %v8528_v52, %v8507_v16  ;;  %v8608_v21 = vadd.f32 %v8607_v0, %v8584_v15  ;;  %10462 = vmatpush.msra.mxu0 %v10387_v17 }
 0x852   : > { %v10535_v35 = vand.u32 4294901760, %v10534_v42 }
 0x853   : > { %v8777_v5 = vpop.f32.mrf.mxu1 }
 0x855   : > { %10229 = vmatmul.f32.vlgmr.msrb.gmra.mxu3 %v15570_v28  ;;  %10301 = vmatmul.f32.vlgmr.msra.gmra.mxu2 %v15570_v28  ;;  %v8753_v27 = vpop.f32.mrf.mxu0 }
 0x856   : > { %10392 = vmatmul.f32.vlgmr.msrb.gmra.mxu1 %v15630_v56  ;;  %10436 = vmatpush.msrb.mxu3 %v15601_v59  ;;  %v10681_v59 = vand.u32 4294901760, %v10680_v47 }
 0x857   : > { %10506 = vmatpush.msra.mxu2 %v15644_v39  ;;  %10582 = vmatpush.msrb.mxu1 %v15644_v39 }
 0x858   : > { %v8631_v57 = vpop.f32.mrf.mxu3  ;;  %v8703_v55 = vpop.f32.mrf.mxu2  ;;  %10366 = vmatmul.f32.vlgmr.msrb.gmra.mxu0 %v15669_v54 }
 0x859   : > { %v8632_v48 = vadd.f32 %v8631_v57, %v8608_v21  ;;  %v8704_v18 = vadd.f32 %v8703_v55, %v8383_v14  ;;  %10559 = vmatpush.msrb.mxu0 %v10532_v29 }
 0x85b   : > { %v8656_v63 = vadd.f32 %v8655_v38, %v8632_v48  ;;  %v8875_v9 = vpop.f32.mrf.mxu1 }
 0x85d   : > { %10323 = vmatmul.f32.vlgmr.msra.gmra.mxu3 %v15570_v28  ;;  %10416 = vmatmul.f32.vlgmr.msrb.gmra.mxu2 %v15638_v61  ;;  %v15681_v25 = vadd.f32 %v8677_v4, %v8656_v63  ;;  %v8849_v11 = vpop.f32.mrf.mxu0  ;;  %v15687_v28 = vpop.permute.xlu2 %10791  ;;  %v10843_v4 = vand.u32 4294901760, %v10842_v53 }
 0x85e   : > { %10486 = vmatmul.f32.vlgmr.msra.gmra.mxu1 %v15630_v56  ;;  %10536 = vmatpush.msra.mxu3 %v10535_v35  ;;  %v8850_v17 = vadd.f32 %v8849_v11, %v8529_v7  ;;  %v10794_v51 = vsel %vm10793_vm2, %v10790_v6, %v15687_v28  ;;  %v15735_v7 = vand.u32 4294901760, %v15726_v43  ;;  %v10796_v55 = vsel %vm10793_vm2, %v15687_v28, %v15684_v50 }
 0x85f   : > { %10608 = vmatpush.msrb.mxu2 %v10533_v34  ;;  %10682 = vmatpush.msra.mxu1 %v10681_v59  ;;  %v15702_v41 = vand.u32 4294901760, %v10794_v51  ;;  %v10844_v16 = vsub.f32 %v10842_v53, %v10843_v4  ;;  %v15760_v35 = vand.u32 4294901760, %v10796_v55 }
 0x860   : > { %v8729_v46 = vpop.f32.mrf.mxu3  ;;  %v8801_v58 = vpop.f32.mrf.mxu2  ;;  %v8876_v20 = vadd.f32 %v8875_v9, %v8850_v17  ;;  %10464 = vmatmul.f32.vlgmr.msra.gmra.mxu0 %v15630_v56 }
 0x861   : > { %v8730_v33 = vadd.f32 %v8729_v46, %v8704_v18  ;;  %10652 = vmatpush.msra.mxu0 %v15646_v62  ;;  %v15713_v37 = vsub.f32 %v10794_v51, %v15702_v41  ;;  %v11134_v17 = vsub.f32 %v10796_v55, %v15760_v35 }
 0x863   : > { %v8754_v2 = vadd.f32 %v8753_v27, %v8730_v33  ;;  %v8969_v8 = vpop.f32.mrf.mxu1  ;;  %v15744_v27 = vpop.permute.xlu0 %11245  ;;  %v11135_v51 = vand.u32 4294901760, %v11134_v17 }
 0x865   : > { %v8778_v22 = vadd.f32 %v8777_v5, %v8754_v2  ;;  %10440 = vmatmul.f32.vlgmr.msrb.gmra.mxu3 %v15651_v32  ;;  %10512 = vmatmul.f32.vlgmr.msra.gmra.mxu2 %v15669_v54  ;;  %v8947_v14 = vpop.f32.mrf.mxu0  ;;  %v11136_v49 = vsub.f32 %v11134_v17, %v11135_v51 }
 0x866   : > { %10586 = vmatmul.f32.vlgmr.msrb.gmra.mxu1 %v15651_v32  ;;  %10630 = vmatpush.msrb.mxu3 %v15644_v39  ;;  %v10989_v39 = vand.u32 4294901760, %v15713_v37 }
 0x867   : > { %v8802_v44 = vadd.f32 %v8801_v58, %v8778_v22  ;;  %10705 = vmatpush.msra.mxu2 %v15659_v26  ;;  %10776 = vmatpush.msrb.mxu1 %v15646_v62 }
 0x868   : > { %v8823_v23 = vpop.f32.mrf.mxu3  ;;  %v8899_v60 = vpop.f32.mrf.mxu2  ;;  %10562 = vmatmul.f32.vlgmr.msrb.gmra.mxu0 %v15638_v61  ;;  %v10990_v0 = vsub.f32 %v15713_v37, %v10989_v39 }
 0x869   : > { %v15716_v15 = vadd.f32 %v8823_v23, %v8802_v44  ;;  %v8900_v3 = vadd.f32 %v8899_v60, %v8876_v20  ;;  %10754 = vmatpush.msrb.mxu0 %v10679_v30  ;;  %v10820_v30 = vsub.f32 %v15726_v43, %v15735_v7  ;;  %v11137_v23 = vand.u32 4294901760, %v11136_v49 }
 0x86a   : > { %v10991_v34 = vand.u32 4294901760, %v10990_v0 }
 0x86b   : > { %v9084_v19 = vpop.f32.mrf.mxu1  ;;  %v15753_v48 = vand.u32 4294901760, %v10820_v30 }
 0x86d   : > { %10538 = vmatmul.f32.vlgmr.msra.gmra.mxu3 %v15630_v56  ;;  %10610 = vmatmul.f32.vlgmr.msrb.gmra.mxu2 %v15630_v56  ;;  %v9060_v38 = vpop.f32.mrf.mxu0 }
 0x86e   : > { %10684 = vmatmul.f32.vlgmr.msra.gmra.mxu1 %v15630_v56  ;;  %10728 = vmatpush.msra.mxu3 %v15646_v62  ;;  %v10845_v62 = vand.u32 4294901760, %v10844_v16 }
 0x86f   : > { %10816 = vmatpush.msrb.mxu2 %v15700_v31  ;;  %10892 = vmatpush.msra.mxu1 %v15700_v31 }
 0x870   : > { %v8923_v29 = vpop.f32.mrf.mxu3  ;;  %v9010_v52 = vpop.f32.mrf.mxu2  ;;  %10658 = vmatmul.f32.vlgmr.msra.gmra.mxu0 %v15669_v54 }
 0x871   : > { %v8924_v26 = vadd.f32 %v8923_v29, %v8900_v3  ;;  %10869 = vmatpush.msra.mxu0 %v10842_v53 }
 0x873   : > { %v8948_v21 = vadd.f32 %v8947_v14, %v8924_v26  ;;  %v9182_v1 = vpop.f32.mrf.mxu1 }
 0x875   : > { %v15737_v5 = vadd.f32 %v8969_v8, %v8948_v21  ;;  %10632 = vmatmul.f32.vlgmr.msrb.gmra.mxu3 %v15630_v56  ;;  %10708 = vmatmul.f32.vlgmr.msra.gmra.mxu2 %v15638_v61  ;;  %v9156_v54 = vpop.f32.mrf.mxu0  ;;  %v15750_v61 = vpop.permute.xlu1 %11243 }
 0x876   : > { %10778 = vmatmul.f32.vlgmr.msrb.gmra.mxu1 %v15630_v56  ;;  %10846 = vmatpush.msrb.mxu3 %v10845_v62  ;;  %v11250_v18 = vsel %vm5261_vm4, %v15750_v61, %v15744_v27 }
 0x877   : > { %10918 = vmatpush.msra.mxu2 %v10843_v4  ;;  %10992 = vmatpush.msrb.mxu1 %v10991_v34  ;;  %v15762_v59 = vand.u32 4294901760, %v11250_v18  ;;  %v11248_v4 = vpop.permute.xlu2 %11247 }
 0x878   : > { %v9036_v42 = vpop.f32.mrf.mxu3  ;;  %v9108_v57 = vpop.f32.mrf.mxu2  ;;  %10756 = vmatmul.f32.vlgmr.msrb.gmra.mxu0 %v15630_v56  ;;  %v9183_v56 = vadd.f32 %v9182_v1, %v9156_v54  ;;  %v11249_v29 = vsel %vm5261_vm4, %v15744_v27, %v11248_v4  ;;  %v11251_v26 = vsel %vm5261_vm4, %v11248_v4, %v15750_v61 }
 0x879   : > { %v9037_v47 = vadd.f32 %v9036_v42, %v9010_v52  ;;  %10962 = vmatpush.msrb.mxu0 %v15702_v41  ;;  %v15772_v28 = vsub.f32 %v11250_v18, %v15762_v59  ;;  %v15812_v1 = vand.u32 4294901760, %v11249_v29  ;;  %v15814_v62 = vand.u32 4294901760, %v11251_v26 }
 0x87b   : > { %v9061_v63 = vadd.f32 %v9060_v38, %v9037_v47  ;;  %v9276_v9 = vpop.f32.mrf.mxu1  ;;  %v11298_v2 = vand.u32 4294901760, %v15772_v28  ;;  %v15827_v47 = vsub.f32 %v11251_v26, %v15814_v62 }
 0x87d   : > { %v9085_v6 = vadd.f32 %v9084_v19, %v9061_v63  ;;  %10732 = vmatmul.f32.vlgmr.msra.gmra.mxu3 %v15651_v32  ;;  %10822 = vmatmul.f32.vlgmr.msrb.gmra.mxu2 %v15753_v48  ;;  %v9254_v11 = vpop.f32.mrf.mxu0  ;;  %v11299_v14 = vsub.f32 %v15772_v28, %v11298_v2 }
 0x87e   : > { %10896 = vmatmul.f32.vlgmr.msra.gmra.mxu1 %v15735_v7  ;;  %10940 = vmatpush.msra.mxu3 %v15700_v31 }
 0x87f   : > { %11015 = vmatpush.msrb.mxu2 %v15713_v37  ;;  %11086 = vmatpush.msra.mxu1 %v15702_v41  ;;  %v9109_v50 = vadd.f32 %v9108_v57, %v9085_v6  ;;  %v11300_v37 = vand.u32 4294901760, %v11299_v14  ;;  %v11443_v57 = vsub.f32 %v11249_v29, %v15812_v1  ;;  %v11590_v6 = vand.u32 4294901760, %v15827_v47 }
 0x880   : > { %v9130_v46 = vpop.f32.mrf.mxu3  ;;  %v9206_v58 = vpop.f32.mrf.mxu2  ;;  %10872 = vmatmul.f32.vlgmr.msra.gmra.mxu0 %v15726_v43 }
 0x881   : > { %v9131_v32 = vadd.f32 %v9130_v46, %v9109_v50  ;;  %v9207_v10 = vadd.f32 %v9206_v58, %v9183_v56  ;;  %11064 = vmatpush.msra.mxu0 %v10989_v39 }
 0x883   : > { %v15776_v20 = vadd.f32 %v9131_v32, %v15681_v25  ;;  %v9376_v33 = vpop.f32.mrf.mxu1  ;;  %v12384_v25 = vld [vmem:[%s15978_s5 + $0x38] sm:$0xff] }
 0x885   : > { %10848 = vmatmul.f32.vlgmr.msrb.gmra.mxu3 %v15718_v12  ;;  %10920 = vmatmul.f32.vlgmr.msra.gmra.mxu2 %v15718_v12  ;;  %v9352_v8 = vpop.f32.mrf.mxu0 }
 0x886   : > { %10994 = vmatmul.f32.vlgmr.msrb.gmra.mxu1 %v15718_v12  ;;  %11038 = vmatpush.msrb.mxu3 %v15702_v41  ;;  %v11253_v41 = vsel %vm329_vm0, %v12384_v25, 0 }
 0x887   : > { %11108 = vmatpush.msra.mxu2 %v15760_v35  ;;  %11184 = vmatpush.msrb.mxu1 %v15760_v35  ;;  %v15795_v3 = vand.u32 4294901760, %v11253_v41 }
 0x888   : > { %v9230_v31 = vpop.f32.mrf.mxu3  ;;  %v9302_v22 = vpop.f32.mrf.mxu2  ;;  %10968 = vmatmul.f32.vlgmr.msrb.gmra.mxu0 %v15753_v48 }
 0x889   : > { %v9231_v24 = vadd.f32 %v9230_v31, %v9207_v10  ;;  %11161 = vmatpush.msrb.mxu0 %v11134_v17  ;;  %v15806_v0 = vsub.f32 %v11253_v41, %v15795_v3  ;;  %v11591_v17 = vsub.f32 %v15827_v47, %v11590_v6 }
 0x88b   : > { %v9255_v44 = vadd.f32 %v9254_v11, %v9231_v24  ;;  %v9492_v53 = vpop.f32.mrf.mxu1  ;;  %v15819_v54 = vand.u32 4294901760, %v15806_v0 }
 0x88d   : > { %v9277_v60 = vadd.f32 %v9276_v9, %v9255_v44  ;;  %10942 = vmatmul.f32.vlgmr.msra.gmra.mxu3 %v15718_v12  ;;  %11018 = vmatmul.f32.vlgmr.msrb.gmra.mxu2 %v15726_v43  ;;  %v9466_v19 = vpop.f32.mrf.mxu0  ;;  %v12385_v44 = vld [vmem:[%s15978_s5 + $0x40] sm:$0xff] }
 0x88e   : > { %11088 = vmatmul.f32.vlgmr.msra.gmra.mxu1 %v15718_v12  ;;  %11138 = vmatpush.msra.mxu3 %v11137_v23  ;;  %v9493_v30 = vadd.f32 %v9492_v53, %v9466_v19  ;;  %v11708_v19 = vsel %vm329_vm0, %v12385_v44, 0 }
 0x88f   : > { %v15799_v39 = vadd.f32 %v9277_v60, %v15716_v15  ;;  %11210 = vmatpush.msrb.mxu2 %v11135_v51  ;;  %11301 = vmatpush.msra.mxu1 %v11300_v37 }
 0x890   : > { %v9328_v38 = vpop.f32.mrf.mxu3  ;;  %v9400_v16 = vpop.f32.mrf.mxu2  ;;  %11066 = vmatmul.f32.vlgmr.msra.gmra.mxu0 %v15718_v12 }
 0x891   : > { %v9329_v52 = vadd.f32 %v9328_v38, %v9302_v22  ;;  %11271 = vmatpush.msra.mxu0 %v15762_v59  ;;  %v15856_v22 = vpop.permute.xlu2 %11702 }
 0x893   : > { %v9353_v15 = vadd.f32 %v9352_v8, %v9329_v52  ;;  %v9586_v21 = vpop.f32.mrf.mxu1 }
 0x895   : > { %v9377_v34 = vadd.f32 %v9376_v33, %v9353_v15  ;;  %11042 = vmatmul.f32.vlgmr.msrb.gmra.mxu3 %v15735_v7  ;;  %11114 = vmatmul.f32.vlgmr.msra.gmra.mxu2 %v15753_v48  ;;  %v9564_v27 = vpop.f32.mrf.mxu0  ;;  %v11701_v33 = vpop.permute.xlu0 %11700 }
 0x896   : > { %11188 = vmatmul.f32.vlgmr.msrb.gmra.mxu1 %v15735_v7  ;;  %11232 = vmatpush.msrb.mxu3 %v15760_v35  ;;  %v11275_v7 = vsub.f32 %v15806_v0, %v15819_v54  ;;  %v11444_v35 = vand.u32 4294901760, %v11443_v57  ;;  %v11704_v24 = vsel %vm5717_vm5, %v11701_v33, %v15856_v22 }
 0x897   : > { %11324 = vmatpush.msra.mxu2 %v15772_v28  ;;  %11395 = vmatpush.msrb.mxu1 %v15762_v59  ;;  %v9401_v42 = vadd.f32 %v9400_v16, %v9377_v34  ;;  %v15871_v23 = vand.u32 4294901760, %v11704_v24 }
 0x898   : > { %v9422_v55 = vpop.f32.mrf.mxu3  ;;  %v9516_v61 = vpop.f32.mrf.mxu2  ;;  %11164 = vmatmul.f32.vlgmr.msrb.gmra.mxu0 %v15726_v43  ;;  %v15840_v43 = vand.u32 4294901760, %v11275_v7 }
 0x899   : > { %v9423_v48 = vadd.f32 %v9422_v55, %v9401_v42  ;;  %v9517_v18 = vadd.f32 %v9516_v61, %v9493_v30  ;;  %11373 = vmatpush.msrb.mxu0 %v11298_v2  ;;  %v15851_v2 = vpop.permute.xlu1 %11698  ;;  %v15882_v52 = vsub.f32 %v11704_v24, %v15871_v23 }
 0x89b   : > { %v15835_v63 = vadd.f32 %v9423_v48, %v15737_v5  ;;  %v9686_v9 = vpop.f32.mrf.mxu1  ;;  %v11445_v5 = vsub.f32 %v11443_v57, %v11444_v35 }
 0x89d   : > { %11140 = vmatmul.f32.vlgmr.msra.gmra.mxu3 %v15718_v12  ;;  %11212 = vmatmul.f32.vlgmr.msrb.gmra.mxu2 %v15718_v12  ;;  %v9662_v56 = vpop.f32.mrf.mxu0  ;;  %v11446_v32 = vand.u32 4294901760, %v11445_v5 }
 0x89e   : > { %11303 = vmatmul.f32.vlgmr.msra.gmra.mxu1 %v15795_v3  ;;  %11347 = vmatpush.msra.mxu3 %v15762_v59  ;;  %v11592_v59 = vand.u32 4294901760, %v11591_v17 }
 0x89f   : > { %11417 = vmatpush.msrb.mxu2 %v15812_v1  ;;  %11493 = vmatpush.msra.mxu1 %v15812_v1 }
 0x8a0   : > { %v9540_v11 = vpop.f32.mrf.mxu3  ;;  %v9612_v50 = vpop.f32.mrf.mxu2  ;;  %11277 = vmatmul.f32.vlgmr.msra.gmra.mxu0 %v15840_v43 }
 0x8a1   : > { %v9541_v46 = vadd.f32 %v9540_v11, %v9517_v18  ;;  %11470 = vmatpush.msra.mxu0 %v11443_v57 }
 0x8a3   : > { %v9565_v58 = vadd.f32 %v9564_v27, %v9541_v46  ;;  %v9784_v28 = vpop.f32.mrf.mxu1  ;;  %v11899_v27 = vand.u32 4294901760, %v15882_v52 }
 0x8a5   : > { %v9587_v10 = vadd.f32 %v9586_v21, %v9565_v58  ;;  %11234 = vmatmul.f32.vlgmr.msrb.gmra.mxu3 %v15718_v12  ;;  %11327 = vmatmul.f32.vlgmr.msra.gmra.mxu2 %v15806_v0  ;;  %v9758_v51 = vpop.f32.mrf.mxu0  ;;  %v11705_v12 = vsel %vm5717_vm5, %v15851_v2, %v11701_v33  ;;  %v15885_v21 = vand.u32 4294901760, %v11708_v19 }
 0x8a6   : > { %11397 = vmatmul.f32.vlgmr.msrb.gmra.mxu1 %v15795_v3  ;;  %11447 = vmatpush.msrb.mxu3 %v11446_v32  ;;  %v9785_v25 = vadd.f32 %v9784_v28, %v9758_v51  ;;  %v15869_v53 = vand.u32 4294901760, %v11705_v12 }
 0x8a7   : > { %v15854_v8 = vadd.f32 %v9587_v10, %v15776_v20  ;;  %11519 = vmatpush.msra.mxu2 %v11444_v35  ;;  %11593 = vmatpush.msrb.mxu1 %v11592_v59  ;;  %v15894_v42 = vsub.f32 %v11708_v19, %v15885_v21 }
 0x8a8   : > { %v9638_v49 = vpop.f32.mrf.mxu3  ;;  %v9710_v31 = vpop.f32.mrf.mxu2  ;;  %11375 = vmatmul.f32.vlgmr.msrb.gmra.mxu0 %v15795_v3  ;;  %v11752_v38 = vsub.f32 %v11705_v12, %v15869_v53 }
 0x8a9   : > { %v9639_v14 = vadd.f32 %v9638_v49, %v9612_v50  ;;  %11563 = vmatpush.msrb.mxu0 %v15814_v62  ;;  %v15903_v18 = vand.u32 4294901760, %v15894_v42 }
 0x8aa   : > { %v11753_v30 = vand.u32 4294901760, %v11752_v38 }
 0x8ab   : > { %v9663_v20 = vadd.f32 %v9662_v56, %v9639_v14  ;;  %v9878_v41 = vpop.f32.mrf.mxu1  ;;  %v11730_v56 = vsub.f32 %v15894_v42, %v15903_v18 }
 0x8ad   : > { %v9687_v60 = vadd.f32 %v9686_v9, %v9663_v20  ;;  %11351 = vmatmul.f32.vlgmr.msra.gmra.mxu3 %v15819_v54  ;;  %11423 = vmatmul.f32.vlgmr.msrb.gmra.mxu2 %v15840_v43  ;;  %v9856_v37 = vpop.f32.mrf.mxu0  ;;  %v11731_v58 = vand.u32 4294901760, %v11730_v56 }
 0x8ae   : > { %11497 = vmatmul.f32.vlgmr.msra.gmra.mxu1 %v15819_v54  ;;  %11541 = vmatpush.msra.mxu3 %v15812_v1 }
 0x8af   : > { %11616 = vmatpush.msrb.mxu2 %v15827_v47  ;;  %11687 = vmatpush.msra.mxu1 %v15814_v62  ;;  %v9711_v4 = vadd.f32 %v9710_v31, %v9687_v60  ;;  %v11900_v47 = vsub.f32 %v15882_v52, %v11899_v27 }
 0x8b0   : > { %v9732_v16 = vpop.f32.mrf.mxu3  ;;  %v9808_v29 = vpop.f32.mrf.mxu2  ;;  %11473 = vmatmul.f32.vlgmr.msra.gmra.mxu0 %v15806_v0 }
 0x8b1   : > { %v9733_v26 = vadd.f32 %v9732_v16, %v9711_v4  ;;  %v9809_v15 = vadd.f32 %v9808_v29, %v9785_v25  ;;  %11665 = vmatpush.msra.mxu0 %v11590_v6  ;;  %v11901_v6 = vand.u32 4294901760, %v11900_v47 }
 0x8b3   : > { %v15888_v1 = vadd.f32 %v9733_v26, %v15799_v39  ;;  %v9986_v34 = vpop.f32.mrf.mxu1  ;;  %v11754_v39 = vsub.f32 %v11752_v38, %v11753_v30 }
 0x8b5   : > { %11449 = vmatmul.f32.vlgmr.msrb.gmra.mxu3 %v15795_v3  ;;  %11521 = vmatmul.f32.vlgmr.msra.gmra.mxu2 %v15795_v3  ;;  %v9962_v57 = vpop.f32.mrf.mxu0 }
 0x8b6   : > { %11595 = vmatmul.f32.vlgmr.msrb.gmra.mxu1 %v15795_v3  ;;  %11639 = vmatpush.msrb.mxu3 %v15814_v62  ;;  %v11755_v62 = vand.u32 4294901760, %v11754_v39 }
 0x8b7   : > { %11726 = vmatpush.msra.mxu2 %v15869_v53  ;;  %11802 = vmatpush.msrb.mxu1 %v15869_v53 }
 0x8b8   : > { %v9832_v55 = vpop.f32.mrf.mxu3  ;;  %v9912_v61 = vpop.f32.mrf.mxu2  ;;  %11569 = vmatmul.f32.vlgmr.msrb.gmra.mxu0 %v15840_v43 }
 0x8b9   : > { %v9833_v48 = vadd.f32 %v9832_v55, %v9809_v15  ;;  %11779 = vmatpush.msrb.mxu0 %v11752_v38 }
 0x8bb   : > { %v9857_v7 = vadd.f32 %v9856_v37, %v9833_v48  ;;  %v10084_v9 = vpop.f32.mrf.mxu1 }
 0x8bd   : > { %v9879_v35 = vadd.f32 %v9878_v41, %v9857_v7  ;;  %11543 = vmatmul.f32.vlgmr.msra.gmra.mxu3 %v15795_v3  ;;  %11619 = vmatmul.f32.vlgmr.msrb.gmra.mxu2 %v15806_v0  ;;  %v10058_v43 = vpop.f32.mrf.mxu0  ;;  %v11706_v0 = vsel %vm5717_vm5, %v15856_v22, %v15851_v2  ;;  %v15929_v22 = vld [vmem:[%s15979_s6] sm:$0xff] }
 0x8be   : > { %11689 = vmatmul.f32.vlgmr.msra.gmra.mxu1 %v15795_v3  ;;  %11756 = vmatpush.msra.mxu3 %v11755_v62  ;;  %v10085_v11 = vadd.f32 %v10084_v9, %v10058_v43 }
 0x8bf   : > { %v15911_v5 = vadd.f32 %v9879_v35, %v15835_v63  ;;  %11828 = vmatpush.msrb.mxu2 %v11753_v30  ;;  %11902 = vmatpush.msra.mxu1 %v11901_v6  ;;  %v12017_v63 = vand.u32 4294901760, %v11706_v0 }
 0x8c0   : > { %v9938_v50 = vpop.f32.mrf.mxu3  ;;  %v10010_v17 = vpop.f32.mrf.mxu2  ;;  %11667 = vmatmul.f32.vlgmr.msra.gmra.mxu0 %v15795_v3 }
 0x8c1   : > { %v9939_v46 = vadd.f32 %v9938_v50, %v9912_v61  ;;  %11872 = vmatpush.msra.mxu0 %v15871_v23  ;;  %v12044_v3 = vsub.f32 %v11706_v0, %v12017_v63 }
 0x8c3   : > { %v9963_v28 = vadd.f32 %v9962_v57, %v9939_v46  ;;  %v10178_v32 = vpop.f32.mrf.mxu1  ;;  %v12045_v12 = vand.u32 4294901760, %v12044_v3 }
 0x8c5   : > { %v9987_v10 = vadd.f32 %v9986_v34, %v9963_v28  ;;  %11643 = vmatmul.f32.vlgmr.msrb.gmra.mxu3 %v15819_v54  ;;  %11732 = vmatmul.f32.vlgmr.msra.gmra.mxu2 %v11731_v58  ;;  %v10156_v59 = vpop.f32.mrf.mxu0  ;;  %v12452_v54 = vmov 3  }
 0x8c6   : > { %11806 = vmatmul.f32.vlgmr.msrb.gmra.mxu1 %v15903_v18  ;;  %11850 = vmatpush.msrb.mxu3 %v15869_v53 }
 0x8c7   : > { %11925 = vmatpush.msra.mxu2 %v15882_v52  ;;  %11996 = vmatpush.msrb.mxu1 %v15871_v23  ;;  %v10011_v13 = vadd.f32 %v10010_v17, %v9987_v10 }
 0x8c8   : > { %v10032_v33 = vpop.f32.mrf.mxu3  ;;  %v10108_v51 = vpop.f32.mrf.mxu2  ;;  %11782 = vmatmul.f32.vlgmr.msrb.gmra.mxu0 %v15894_v42  ;;  %12419 = vset.pattern.permute.xlu1 %v12452_v54 }
 0x8c9   : > { %v10033_v2 = vadd.f32 %v10032_v33, %v10011_v13  ;;  %v10109_v25 = vadd.f32 %v10108_v51, %v10085_v11  ;;  %11974 = vmatpush.msrb.mxu0 %v11899_v27  ;;  %12152 = vperm.xlu1 %12419, %v15929_v22  }
 0x8cb   : > { %v10327_v49 = vadd.f32 %v10033_v2, %v15854_v8  ;;  %v10278_v31 = vpop.f32.mrf.mxu1  ;;  %v12046_v8 = vsub.f32 %v12044_v3, %v12045_v12 }
 0x8cd   : > { %11758 = vmatmul.f32.vlgmr.msra.gmra.mxu3 %v15885_v21  ;;  %11830 = vmatmul.f32.vlgmr.msrb.gmra.mxu2 %v15885_v21  ;;  %v10254_v14 = vpop.f32.mrf.mxu0  ;;  %v12047_v60 = vand.u32 4294901760, %v12046_v8 }
 0x8ce   : > { %11904 = vmatmul.f32.vlgmr.msra.gmra.mxu1 %v15885_v21  ;;  %11948 = vmatpush.msra.mxu3 %v15871_v23 }
 0x8cf   : > { %12018 = vmatpush.msrb.mxu2 %v12017_v63  ;;  %12094 = vmatpush.msra.mxu1 %v12017_v63 }
 0x8d0   : > { %v10132_v24 = vpop.f32.mrf.mxu3  ;;  %v10204_v20 = vpop.f32.mrf.mxu2  ;;  %11878 = vmatmul.f32.vlgmr.msra.gmra.mxu0 %v11731_v58 }
 0x8d1   : > { %v10133_v41 = vadd.f32 %v10132_v24, %v10109_v25  ;;  %12071 = vmatpush.msra.mxu0 %v12044_v3 }
 0x8d3   : > { %v10157_v44 = vadd.f32 %v10156_v59, %v10133_v41  ;;  %v10393_v53 = vpop.f32.mrf.mxu1 }
 0x8d5   : > { %v10179_v37 = vadd.f32 %v10178_v32, %v10157_v44  ;;  %11852 = vmatmul.f32.vlgmr.msrb.gmra.mxu3 %v15885_v21  ;;  %11928 = vmatmul.f32.vlgmr.msra.gmra.mxu2 %v15894_v42  ;;  %v10367_v23 = vpop.f32.mrf.mxu0 }
 0x8d6   : > { %12048 = vmatpush.msrb.mxu3 %v12047_v60  ;;  %12120 = vmatpush.msra.mxu2 %v12045_v12  ;;  %v10394_v4 = vadd.f32 %v10393_v53, %v10367_v23 }
 0x8d7   : > { %v10328_v19 = vadd.f32 %v10179_v37, %v15888_v1  ;;  %11998 = vmatmul.f32.vlgmr.msrb.gmra.mxu1 %v15885_v21 }
 0x8d8   : > { %v10230_v38 = vpop.f32.mrf.mxu3  ;;  %v10302_v16 = vpop.f32.mrf.mxu2  ;;  %11976 = vmatmul.f32.vlgmr.msrb.gmra.mxu0 %v15885_v21 }
 0x8d9   : > { %v10231_v29 = vadd.f32 %v10230_v38, %v10204_v20 }
 0x8db   : > { %v10255_v52 = vadd.f32 %v10254_v14, %v10231_v29  ;;  %v10487_v26 = vpop.f32.mrf.mxu1 }
 0x8dd   : > { %v10279_v15 = vadd.f32 %v10278_v31, %v10255_v52  ;;  %11952 = vmatmul.f32.vlgmr.msra.gmra.mxu3 %v15903_v18  ;;  %12024 = vmatmul.f32.vlgmr.msrb.gmra.mxu2 %v11731_v58  ;;  %v10465_v34 = vpop.f32.mrf.mxu0 }
 0x8de   : > { %12142 = vmatpush.msra.mxu3 %v12017_v63 }
 0x8df   : > { %v10303_v30 = vadd.f32 %v10302_v16, %v10279_v15  ;;  %12098 = vmatmul.f32.vlgmr.msra.gmra.mxu1 %v15903_v18 }
 0x8e0   : > { %v10324_v1 = vpop.f32.mrf.mxu3  ;;  %v10417_v27 = vpop.f32.mrf.mxu2  ;;  %12074 = vmatmul.f32.vlgmr.msra.gmra.mxu0 %v15894_v42 }
 0x8e1   : > { %v10325_v57 = vadd.f32 %v10324_v1, %v10303_v30  ;;  %v10418_v39 = vadd.f32 %v10417_v27, %v10394_v4 }
 0x8e3   : > { %v10329_v55 = vadd.f32 %v10325_v57, %v15911_v5  ;;  %v10587_v61 = vpop.f32.mrf.mxu1 }
 0x8e5   : > { %12050 = vmatmul.f32.vlgmr.msrb.gmra.mxu3 %v15885_v21  ;;  %12122 = vmatmul.f32.vlgmr.msra.gmra.mxu2 %v15885_v21  ;;  %v10563_v47 = vpop.f32.mrf.mxu0 }
 0x8e8   : > { %v10441_v48 = vpop.f32.mrf.mxu3  ;;  %v10513_v7 = vpop.f32.mrf.mxu2 }
 0x8e9   : > { %v10442_v9 = vadd.f32 %v10441_v48, %v10418_v39 }
 0x8eb   : > { %v10466_v62 = vadd.f32 %v10465_v34, %v10442_v9  ;;  %v10685_v35 = vpop.f32.mrf.mxu1 }
 0x8ed   : > { %v10488_v18 = vadd.f32 %v10487_v26, %v10466_v62  ;;  %12144 = vmatmul.f32.vlgmr.msra.gmra.mxu3 %v15885_v21  ;;  %v10659_v6 = vpop.f32.mrf.mxu0 }
 0x8ee   : > { %v10686_v43 = vadd.f32 %v10685_v35, %v10659_v6 }
 0x8ef   : > { %v10782_v56 = vadd.f32 %v10488_v18, %v10327_v49 }
 0x8f0   : > { %v10539_v42 = vpop.f32.mrf.mxu3  ;;  %v10611_v11 = vpop.f32.mrf.mxu2 }
 0x8f1   : > { %v10540_v5 = vadd.f32 %v10539_v42, %v10513_v7 }
 0x8f3   : > { %v10564_v50 = vadd.f32 %v10563_v47, %v10540_v5  ;;  %v10779_v17 = vpop.f32.mrf.mxu1 }
 0x8f5   : > { %v10588_v0 = vadd.f32 %v10587_v61, %v10564_v50  ;;  %v10757_v46 = vpop.f32.mrf.mxu0 }
 0x8f7   : > { %v10612_v58 = vadd.f32 %v10611_v11, %v10588_v0 }
 0x8f8   : > { %v10633_v28 = vpop.f32.mrf.mxu3  ;;  %v10709_v32 = vpop.f32.mrf.mxu2 }
 0x8f9   : > { %v10634_v63 = vadd.f32 %v10633_v28, %v10612_v58  ;;  %v10710_v10 = vadd.f32 %v10709_v32, %v10686_v43 }
 0x8fb   : > { %v10783_v59 = vadd.f32 %v10634_v63, %v10328_v19  ;;  %v10897_v13 = vpop.f32.mrf.mxu1 }
 0x8fd   : > { %v10873_v3 = vpop.f32.mrf.mxu0 }
 0x900   : > { %v10733_v33 = vpop.f32.mrf.mxu3  ;;  %v10823_v21 = vpop.f32.mrf.mxu2 }
 0x901   : > { %v10734_v51 = vadd.f32 %v10733_v33, %v10710_v10 }
 0x903   : > { %v10758_v2 = vadd.f32 %v10757_v46, %v10734_v51  ;;  %v10995_v25 = vpop.f32.mrf.mxu1 }
 0x905   : > { %v10780_v54 = vadd.f32 %v10779_v17, %v10758_v2  ;;  %v10969_v49 = vpop.f32.mrf.mxu0 }
 0x906   : > { %v10996_v12 = vadd.f32 %v10995_v25, %v10969_v49 }
 0x907   : > { %v10784_v31 = vadd.f32 %v10780_v54, %v10329_v55 }
 0x908   : > { %v10849_v14 = vpop.f32.mrf.mxu3  ;;  %v10921_v8 = vpop.f32.mrf.mxu2 }
 0x909   : > { %v10850_v24 = vadd.f32 %v10849_v14, %v10823_v21 }
 0x90b   : > { %v10874_v20 = vadd.f32 %v10873_v3, %v10850_v24  ;;  %v11089_v41 = vpop.f32.mrf.mxu1 }
 0x90d   : > { %v10898_v44 = vadd.f32 %v10897_v13, %v10874_v20  ;;  %v11067_v53 = vpop.f32.mrf.mxu0 }
 0x90f   : > { %v10922_v60 = vadd.f32 %v10921_v8, %v10898_v44 }
 0x910   : > { %v10943_v37 = vpop.f32.mrf.mxu3  ;;  %v11019_v23 = vpop.f32.mrf.mxu2 }
 0x911   : > { %v10944_v19 = vadd.f32 %v10943_v37, %v10922_v60  ;;  %v11020_v4 = vadd.f32 %v11019_v23, %v10996_v12 }
 0x913   : > { %v15948_v38 = vadd.f32 %v10944_v19, %v10782_v56  ;;  %v11189_v16 = vpop.f32.mrf.mxu1 }
 0x915   : > { %v11165_v29 = vpop.f32.mrf.mxu0 }
 0x918   : > { %v11043_v52 = vpop.f32.mrf.mxu3  ;;  %v11115_v26 = vpop.f32.mrf.mxu2 }
 0x919   : > { %v11044_v15 = vadd.f32 %v11043_v52, %v11020_v4 }
 0x91b   : > { %v11068_v34 = vadd.f32 %v11067_v53, %v11044_v15  ;;  %v11304_v30 = vpop.f32.mrf.mxu1 }
 0x91d   : > { %v11090_v1 = vadd.f32 %v11089_v41, %v11068_v34  ;;  %v11278_v27 = vpop.f32.mrf.mxu0 }
 0x91e   : > { %v11305_v49 = vadd.f32 %v11304_v30, %v11278_v27 }
 0x91f   : > { %v15950_v57 = vadd.f32 %v11090_v1, %v10783_v59 }
 0x920   : > { %v11141_v39 = vpop.f32.mrf.mxu3  ;;  %v11213_v55 = vpop.f32.mrf.mxu2 }
 0x921   : > { %v11142_v61 = vadd.f32 %v11141_v39, %v11115_v26 }
 0x923   : > { %v11166_v47 = vadd.f32 %v11165_v29, %v11142_v61  ;;  %v11398_v7 = vpop.f32.mrf.mxu1 }
 0x925   : > { %v11190_v48 = vadd.f32 %v11189_v16, %v11166_v47  ;;  %v11376_v9 = vpop.f32.mrf.mxu0 }
 0x927   : > { %v11214_v62 = vadd.f32 %v11213_v55, %v11190_v48 }
 0x928   : > { %v11235_v35 = vpop.f32.mrf.mxu3  ;;  %v11328_v18 = vpop.f32.mrf.mxu2 }
 0x929   : > { %v11236_v6 = vadd.f32 %v11235_v35, %v11214_v62  ;;  %v11329_v24 = vadd.f32 %v11328_v18, %v11305_v49 }
 0x92b   : > { %v15952_v56 = vadd.f32 %v11236_v6, %v10784_v31  ;;  %v11498_v42 = vpop.f32.mrf.mxu1 }
 0x92d   : > { %v11474_v43 = vpop.f32.mrf.mxu0 }
 0x930   : > { %v11352_v11 = vpop.f32.mrf.mxu3  ;;  %v11424_v5 = vpop.f32.mrf.mxu2 }
 0x931   : > { %v11353_v53 = vadd.f32 %v11352_v11, %v11329_v24 }
 0x933   : > { %v11596_v46 = vpop.f32.mrf.mxu1  ;;  %v11377_v26 = vadd.f32 %v11376_v9, %v11353_v53 }
 0x935   : > { %v11570_v50 = vpop.f32.mrf.mxu0  ;;  %v11399_v39 = vadd.f32 %v11398_v7, %v11377_v26 }
 0x936   : > { %v11597_v60 = vadd.f32 %v11596_v46, %v11570_v50 }
 0x938   : > { %v11450_v17 = vpop.f32.mrf.mxu3  ;;  %v11522_v0 = vpop.f32.mrf.mxu2 }
 0x939   : > { %v11451_v2 = vadd.f32 %v11450_v17, %v11424_v5 }
 0x93b   : > { %v11690_v63 = vpop.f32.mrf.mxu1  ;;  %v11475_v31 = vadd.f32 %v11474_v43, %v11451_v2  ;;  %v11693_v43 = vadd.f32 %v11399_v39, %v15948_v38 }
 0x93d   : > { %v11668_v58 = vpop.f32.mrf.mxu0  ;;  %v11499_v20 = vadd.f32 %v11498_v42, %v11475_v31 }
 0x93f   : > { %v11523_v4 = vadd.f32 %v11522_v0, %v11499_v20  ;;  %v12153_v0 = vpop.permute.xlu1 %12152 }
 0x940   : > { %v11544_v28 = vpop.f32.mrf.mxu3  ;;  %v11620_v32 = vpop.f32.mrf.mxu2 }
 0x941   : > { %v11621_v15 = vadd.f32 %v11620_v32, %v11597_v60  ;;  %v11545_v30 = vadd.f32 %v11544_v28, %v11523_v4 }
 0x943   : > { %v11807_v3 = vpop.f32.mrf.mxu1  ;;  %v11694_v48 = vadd.f32 %v11545_v30, %v15950_v57 }
 0x945   : > { %v11783_v13 = vpop.f32.mrf.mxu0 }
 0x948   : > { %v11644_v10 = vpop.f32.mrf.mxu3  ;;  %v11733_v59 = vpop.f32.mrf.mxu2 }
 0x949   : > { %v11645_v1 = vadd.f32 %v11644_v10, %v11621_v15 }
 0x94b   : > { %v11905_v54 = vpop.f32.mrf.mxu1  ;;  %v11669_v62 = vadd.f32 %v11668_v58, %v11645_v1 }
 0x94d   : > { %v11879_v51 = vpop.f32.mrf.mxu0  ;;  %v11691_v5 = vadd.f32 %v11690_v63, %v11669_v62 }
 0x94e   : > { %v11906_v8 = vadd.f32 %v11905_v54, %v11879_v51  ;;  %v12454_v51 = vmov 5  }
 0x94f   : > { %v11695_v32 = vadd.f32 %v11691_v5, %v15952_v56  ;;  %12422 = vset.pattern.permute.xlu0 %v12454_v51 }
 0x950   : > { %v11759_v33 = vpop.f32.mrf.mxu3  ;;  %v11831_v21 = vpop.f32.mrf.mxu2 }
 0x951   : > { %v11760_v12 = vadd.f32 %v11759_v33, %v11733_v59 }
 0x953   : > { %v11784_v41 = vadd.f32 %v11783_v13, %v11760_v12 }
 0x954   : > { %v11999_v19 = vpop.f32.mrf.mxu1 }
 0x955   : > { %v11977_v44 = vpop.f32.mrf.mxu0  ;;  %v11808_v16 = vadd.f32 %v11807_v3, %v11784_v41 }
 0x957   : > { %v11832_v27 = vadd.f32 %v11831_v21, %v11808_v16  ;;  %v12453_v21 = vmov 4  }
 0x958   : > { %v11853_v25 = vpop.f32.mrf.mxu3  ;;  %v11929_v14 = vpop.f32.mrf.mxu2  ;;  %12420 = vset.pattern.permute.xlu1 %v12453_v21 }
 0x959   : > { %v11930_v37 = vadd.f32 %v11929_v14, %v11906_v8  ;;  %v11854_v35 = vadd.f32 %v11853_v25, %v11832_v27  ;;  %12195 = vperm.xlu1 %12420, %v15929_v22  }
 0x95b   : > { %v12148_v50 = vadd.f32 %v11854_v35, %v11693_v43 }
 0x95c   : > { %v12099_v6 = vpop.f32.mrf.mxu1 }
 0x95d   : > { %v12075_v47 = vpop.f32.mrf.mxu0  ;;  %v12155_v10 = vadd.f32 %v12153_v0, %v12148_v50 }
 0x95f   : > { %v12158_v38 = vmul.f32 %v12155_v10, %v15370_v36 }
 0x960   : > { %v11953_v23 = vpop.f32.mrf.mxu3  ;;  %v12025_v52 = vpop.f32.mrf.mxu2 }
 0x961   : > { %v11954_v29 = vadd.f32 %v11953_v23, %v11930_v37  ;;  %12421 = vset.pattern.permute.xlu1 %v12454_v51 }
 0x962   : > { %12202 = vperm.xlu1 %12421, %v15929_v22  }
 0x963   : > { %v11978_v34 = vadd.f32 %v11977_v44, %v11954_v29 }
 0x965   : > { %v12000_v55 = vadd.f32 %v11999_v19, %v11978_v34 }
 0x967   : > { %v12149_v42 = vadd.f32 %v12000_v55, %v11694_v48 }
 0x968   : > { %v12051_v61 = vpop.f32.mrf.mxu3  ;;  %v12123_v9 = vpop.f32.mrf.mxu2 }
 0x969   : > { %v12052_v18 = vadd.f32 %v12051_v61, %v12025_v52  ;;  %v12156_v46 = vadd.f32 %v12153_v0, %v12149_v42 }
 0x96b   : > { %v12076_v11 = vadd.f32 %v12075_v47, %v12052_v18  ;;  %v12159_v59 = vmul.f32 %v12156_v46, %v15368_v45 }
 0x96d   : > { %v12100_v17 = vadd.f32 %v12099_v6, %v12076_v11  ;;  %v12161_v33 = vadd.f32 %v12159_v59, %v12158_v38 }
 0x96f   : > { %v12124_v7 = vadd.f32 %v12123_v9, %v12100_v17 }
 0x970   : > { %v12145_v28 = vpop.f32.mrf.mxu3 }
 0x971   : > { %v12146_v57 = vadd.f32 %v12145_v28, %v12124_v7 }
 0x973   : > { %v12150_v58 = vadd.f32 %v12146_v57, %v11695_v32 }
 0x975   : > { %v12157_v13 = vadd.f32 %v12153_v0, %v12150_v58 }
 0x977   : > { %v12160_v3 = vmul.f32 %v12157_v13, %v15372_v40 }
 0x979   : > { %v12162_v63 = vadd.f32 %v12161_v33, %v12160_v3 }
 0x97b   : > { %12163 = vadd.xlane.f32.xlu0 %v12162_v63 }
 0x9cb   : > { %v12196_v4 = vpop.permute.xlu1 %12195 }
 0x9d4   : > { %v12203_v15 = vpop.permute.xlu1 %12202 }
 0x9ee   : > { %v12164_v56 = vpop.xlane.xlu0 %12163 }
 0x9ef   : > { %v12165_v2 = vmul.f32 0.00390625, %v12164_v56 }
 0x9f1   : > { %v12166_v25 = vsub.f32 %v12155_v10, %v12165_v2  ;;  %v12167_v54 = vsub.f32 %v12156_v46, %v12165_v2  ;;  %v12168_v49 = vsub.f32 %v12157_v13, %v12165_v2 }
 0x9f3   : > { %v12169_v31 = vmul.f32 %v12166_v25, %v15370_v36  ;;  %v12170_v12 = vmul.f32 %v12167_v54, %v15368_v45  ;;  %v12171_v14 = vmul.f32 %v12168_v49, %v15372_v40 }
 0x9f5   : > { %v12172_v8 = vmul.f32 %v12169_v31, %v12169_v31  ;;  %v12173_v24 = vmul.f32 %v12170_v12, %v12170_v12  ;;  %v12174_v20 = vmul.f32 %v12171_v14, %v12171_v14 }
 0x9f7   : > { %v12175_v41 = vadd.f32 %v12173_v24, %v12172_v8 }
 0x9f9   : > { %v12176_v44 = vadd.f32 %v12175_v41, %v12174_v20 }
 0x9fb   : > { %12177 = vadd.xlane.f32.xlu2 %v12176_v44 }
 0xa6e   : > { %v12178_v53 = vpop.xlane.xlu2 %12177 }
 0xa6f   : > { %v12179_v60 = vmul.f32 0.00390625, %v12178_v53 }
 0xa71   : > { %v12180_v22 = vadd.f32 1e-05, %v12179_v60 }
 0xa73   : > { %12425 = vrsqrt.f32 %v12180_v22  ;;  %vm12187_vm4 = vweird.f32 %v12180_v22 }
 0xa79   : > { %v12426_v37 = vpop.eup %12425 }
 0xa7a   : > { %v12182_v23 = vmul.f32 %v12426_v37, %v12180_v22  ;;  %vm12188_vm0 = vweird.f32 %v12426_v37 }
 0xa7b   : > { %vm12189_vm5 = vmor %vm12187_vm4, %vm12188_vm0 }
 0xa7c   : > { %v12183_v19 = vmul.f32 %v12426_v37, %v12182_v23 }
 0xa7e   : > { %v12184_v16 = vmul.f32 0.5, %v12183_v19 }
 0xa80   : > { %v12185_v36 = vsub.f32 1.5, %v12184_v16 }
 0xa82   : > { %v12186_v45 = vmul.f32 %v12426_v37, %v12185_v36 }
 0xa84   : > { %v12190_v40 = vsel %vm12189_vm5, %v12426_v37, %v12186_v45 }
 0xa85   : > { %v12191_v29 = vmul.f32 %v12190_v40, %v12166_v25  ;;  %v12192_v52 = vmul.f32 %v12190_v40, %v12167_v54  ;;  %v12193_v26 = vmul.f32 %v12190_v40, %v12168_v49 }
 0xa87   : > { %v12198_v34 = vmul.f32 %v12196_v4, %v12191_v29  ;;  %v12199_v30 = vmul.f32 %v12196_v4, %v12192_v52  ;;  %v12200_v1 = vmul.f32 %v12196_v4, %v12193_v26 }
 0xa89   : > { %v12205_v27 = vadd.f32 %v12203_v15, %v12198_v34  ;;  %v12206_v39 = vadd.f32 %v12203_v15, %v12199_v30  ;;  %v12207_v55 = vadd.f32 %v12203_v15, %v12200_v1 }
 0xa8b   : > { %vm12208_vm8 = vcmp.ge.f32.partialorder %v12205_v27, 0.0  ;;  %vm12209_vm9 = vcmp.ge.f32.partialorder %v12206_v39, 0.0  ;;  %vm12210_vm10 = vcmp.ge.f32.partialorder %v12207_v55, 0.0  ;;  %v12211_v61 = vmul.f32 0.1, %v12205_v27 }
 0xa8c   : > { %v12212_v47 = vmul.f32 0.1, %v12206_v39  ;;  %v12213_v48 = vmul.f32 0.1, %v12207_v55 }
 0xa8d   : > { %v12214_v62 = vsel %vm12208_vm8, %v12205_v27, %v12211_v61 }
 0xa8e   : > { %v12215_v35 = vsel %vm12209_vm9, %v12206_v39, %v12212_v47  ;;  %v12216_v18 = vsel %vm12210_vm10, %v12207_v55, %v12213_v48  ;;  %12217 = vst [vmem:[%s322_s17] sm:$0xff] %v12214_v62 }
 0xa8f   : > { %12218 = vst [vmem:[%s322_s17 + $0x8] sm:$0xff] %v12215_v35 }
 0xa90   : > { %12219 = vst [vmem:[%s322_s17 + $0x10] sm:$0xff] %v12216_v18 }
 0xa91 PF: > { %s18_s27 = sadd.s32 1, %s12434_s27  }
 0xa92   : > { %p15_p4 = scmp.ge.s32.totalorder %s18_s27, 4  }
 0xa94   :  { %17 = sbr.rel (!%p15_p4) target bundleno = 1 (0x1), region = 107 }

</bundles_post_ra>
